<compile_context>
chip_gen: v7x
topology: tpu7x:2x2x1
jax: 0.10.0
libtpu: 0.0.40
codegen_flags: <defaults>
</compile_context>

<pallas_src>
import functools

import jax
import jax.numpy as jnp
from jax.experimental import pallas as pl
from jax.experimental.pallas import tpu as pltpu

EPS = 1e-5


def _fused_conv_bn_add_kernel(x_ref, w_ref, res_ref, gamma_ref, beta_ref,
                              o_ref, *, inv_count):
    # x_ref:     [Cin,  M]  bf16  (stride-2 subsampled pixels, channels-major)
    # w_ref:     [Cout, Cin] bf16 (1x1 conv weights)
    # res_ref:   [Cout, M]  f32   (residual, channels-major)
    # gamma_ref: [Cout, 1]  f32
    # beta_ref:  [Cout, 1]  f32
    # o_ref:     [Cout, M]  f32
    # 1x1 conv == matmul on the MXU, f32 accumulation; y stays in VMEM.
    y = jnp.dot(w_ref[...], x_ref[...], preferred_element_type=jnp.float32)

    # Per-channel batch statistics: last-axis (lane) reductions -> XLU slot.
    ch_sum = jnp.sum(y, axis=-1, keepdims=True)          # [Cout, 1]
    ch_sumsq = jnp.sum(y * y, axis=-1, keepdims=True)    # [Cout, 1]

    # Tiny per-channel math, done once; rsqrt goes to the EUP.
    mean = ch_sum * inv_count
    var = jnp.maximum(ch_sumsq * inv_count - mean * mean, 0.0)
    inv_std = jax.lax.rsqrt(var + EPS)
    scale = gamma_ref[...] * inv_std                     # [Cout, 1]
    bias = beta_ref[...] - mean * scale                  # [Cout, 1]

    # Folded BN affine + residual add over the big [Cout, M] tile.
    o_ref[...] = (y * scale + bias + res_ref[...]).astype(o_ref.dtype)


def conv_bn_add(x37, x53, w, gamma, beta):
    """x37: [N, Cin, H, W], x53: [N, Cout, Ho, Wo], w: [Cout, Cin, 1, 1]."""
    N, Cin, H, W = x37.shape
    _, Cout, Ho, Wo = x53.shape
    M = N * Ho * Wo

    # 1x1 conv with stride 2 only reads even spatial positions.
    x_sub = x37[:, :, ::2, ::2]                                   # [N, Cin, Ho, Wo]
    # Channels-major matrices; for N == 1 these transposes are free reshapes.
    x_mat = jnp.transpose(x_sub, (1, 0, 2, 3)).reshape(Cin, M).astype(jnp.bfloat16)
    res_mat = jnp.transpose(x53, (1, 0, 2, 3)).reshape(Cout, M).astype(jnp.float32)
    w_mat = w.reshape(Cout, Cin).astype(jnp.bfloat16)
    gamma2 = gamma.reshape(Cout, 1).astype(jnp.float32)
    beta2 = beta.reshape(Cout, 1).astype(jnp.float32)

    # Entire problem in one step: full-dimension blocks (no (8,128) constraint,
    # no padding), conv output y never leaves VMEM.
    out_mat = pl.pallas_call(
        functools.partial(_fused_conv_bn_add_kernel, inv_count=1.0 / M),
        out_shape=jax.ShapeDtypeStruct((Cout, M), jnp.float32),
        grid=(1,),
        in_specs=[
            pl.BlockSpec((Cin, M), lambda i: (0, 0)),
            pl.BlockSpec((Cout, Cin), lambda i: (0, 0)),
            pl.BlockSpec((Cout, M), lambda i: (0, 0)),
            pl.BlockSpec((Cout, 1), lambda i: (0, 0)),
            pl.BlockSpec((Cout, 1), lambda i: (0, 0)),
        ],
        out_specs=pl.BlockSpec((Cout, M), lambda i: (0, 0)),
        compiler_params=pltpu.CompilerParams(
            dimension_semantics=("arbitrary",),
            # ~2.2 MB of blocks (double-buffered) -- far under the scoped
            # default on every generation, incl. v7x's 64 MiB physical VMEM.
            vmem_limit_bytes=32 * 1024 * 1024,
        ),
    )(x_mat, w_mat, res_mat, gamma2, beta2)

    return jnp.transpose(out_mat.reshape(Cout, N, Ho, Wo), (1, 0, 2, 3))


def _reference(x37, x53, w, gamma, beta):
    """Pure-JAX (f32) reference for sanity checking."""
    N, Cin, H, W = x37.shape
    Cout = w.shape[0]
    x_sub = x37[:, :, ::2, ::2]
    y = jnp.einsum('nchw,oc->nohw', x_sub, w.reshape(Cout, Cin))
    mean = jnp.mean(y, axis=(0, 2, 3), keepdims=True)
    var = jnp.mean((y - mean) ** 2, axis=(0, 2, 3), keepdims=True)
    y_hat = (y - mean) * jax.lax.rsqrt(var + EPS)
    y_bn = y_hat * gamma.reshape(1, Cout, 1, 1) + beta.reshape(1, Cout, 1, 1)
    return y_bn + x53


if __name__ == "__main__":
    # Shapes implied by the module: 1x72x56x56 -> 1x216x28x28.
    N, Cin, Cout, H, W = 1, 72, 216, 56, 56
    Ho, Wo = H // 2, W // 2
    key = jax.random.PRNGKey(0)
    k1, k2, k3, k4, k5 = jax.random.split(key, 5)

    x37 = jax.random.normal(k1, (N, Cin, H, W), dtype=jnp.float32)
    x53 = jax.random.normal(k2, (N, Cout, Ho, Wo), dtype=jnp.float32)
    w = jax.random.normal(k3, (Cout, Cin, 1, 1), dtype=jnp.float32) * 0.05
    gamma = 1.0 + 0.1 * jax.random.normal(k4, (Cout,), dtype=jnp.float32)
    beta = 0.1 * jax.random.normal(k5, (Cout,), dtype=jnp.float32)

    out = jax.block_until_ready(conv_bn_add(x37, x53, w, gamma, beta))
    ref = _reference(x37, x53, w, gamma, beta)

    assert out.shape == (N, Cout, Ho, Wo)
    err = float(jnp.max(jnp.abs(out - ref)))
    assert jnp.allclose(out, ref, rtol=2e-2, atol=2e-2), f"max abs err {err}"
    print("KERNEL_OK")
</pallas_src>

<mosaic_0001>
module attributes {stable_mosaic.version = 11 : i64} {
  func.func @_fused_conv_bn_add_kernel(%arg0: i32, %arg1: memref<72x784xbf16, #tpu.memory_space<vmem>>, %arg2: memref<216x72xbf16, #tpu.memory_space<vmem>>, %arg3: memref<216x784xf32, #tpu.memory_space<vmem>>, %arg4: memref<216x1xf32, #tpu.memory_space<vmem>>, %arg5: memref<216x1xf32, #tpu.memory_space<vmem>>, %arg6: memref<216x784xf32, #tpu.memory_space<vmem>>) attributes {dimension_semantics = [#tpu.dimension_semantics<arbitrary>], iteration_bounds = array<i64: 1>, scalar_prefetch = 0 : i64, scratch_operands = 0 : i64, tpu.core_type = #tpu.core_type<tc>, window_params = [{pipeline_mode = #tpu.pipeline_mode<synchronous>, transform_indices = @transform_0, window_bounds = array<i64: 72, 784>}, {pipeline_mode = #tpu.pipeline_mode<synchronous>, transform_indices = @transform_1, window_bounds = array<i64: 216, 72>}, {pipeline_mode = #tpu.pipeline_mode<synchronous>, transform_indices = @transform_2, window_bounds = array<i64: 216, 784>}, {pipeline_mode = #tpu.pipeline_mode<synchronous>, transform_indices = @transform_3, window_bounds = array<i64: 216, 1>}, {pipeline_mode = #tpu.pipeline_mode<synchronous>, transform_indices = @transform_4, window_bounds = array<i64: 216, 1>}, {pipeline_mode = #tpu.pipeline_mode<synchronous>, transform_indices = @transform_5, window_bounds = array<i64: 216, 784>}]} {
    %c0 = arith.constant 0 : index
    %c0_0 = arith.constant 0 : index
    %0 = vector.load %arg2[%c0, %c0_0] : memref<216x72xbf16, #tpu.memory_space<vmem>>, vector<216x72xbf16>
    %c0_1 = arith.constant 0 : index
    %c0_2 = arith.constant 0 : index
    %1 = vector.load %arg1[%c0_1, %c0_2] : memref<72x784xbf16, #tpu.memory_space<vmem>>, vector<72x784xbf16>
    %cst = arith.constant dense<0.000000e+00> : vector<216x784xf32>
    %2 = tpu.matmul %0, %1, %cst {dimension_numbers = #tpu.dot_dimension_numbers<[1], [0], [0], [1], [0, 0, 1, 1], [], []>} : vector<216x72xbf16>, vector<72x784xbf16>, vector<216x784xf32> -> vector<216x784xf32>
    %cst_3 = arith.constant dense<0.000000e+00> : vector<216xf32>
    %3 = vector.multi_reduction <add>, %2, %cst_3 [1] : vector<216x784xf32> to vector<216xf32>
    %4 = vector.shape_cast %3 : vector<216xf32> to vector<216x1xf32>
    %5 = arith.mulf %2, %2 : vector<216x784xf32>
    %cst_4 = arith.constant dense<0.000000e+00> : vector<216xf32>
    %6 = vector.multi_reduction <add>, %5, %cst_4 [1] : vector<216x784xf32> to vector<216xf32>
    %7 = vector.shape_cast %6 : vector<216xf32> to vector<216x1xf32>
    %cst_5 = arith.constant 0.00127551018 : f32
    %8 = vector.broadcast %cst_5 : f32 to vector<216x1xf32>
    %9 = arith.mulf %4, %8 : vector<216x1xf32>
    %cst_6 = arith.constant 0.00127551018 : f32
    %10 = vector.broadcast %cst_6 : f32 to vector<216x1xf32>
    %11 = arith.mulf %7, %10 : vector<216x1xf32>
    %12 = arith.mulf %9, %9 : vector<216x1xf32>
    %13 = arith.subf %11, %12 : vector<216x1xf32>
    %cst_7 = arith.constant 0.000000e+00 : f32
    %14 = vector.broadcast %cst_7 : f32 to vector<216x1xf32>
    %15 = arith.maximumf %13, %14 : vector<216x1xf32>
    %cst_8 = arith.constant 9.99999974E-6 : f32
    %16 = vector.broadcast %cst_8 : f32 to vector<216x1xf32>
    %17 = arith.addf %15, %16 : vector<216x1xf32>
    %18 = math.rsqrt %17 : vector<216x1xf32>
    %c0_9 = arith.constant 0 : index
    %c0_10 = arith.constant 0 : index
    %19 = vector.load %arg4[%c0_9, %c0_10] : memref<216x1xf32, #tpu.memory_space<vmem>>, vector<216x1xf32>
    %20 = arith.mulf %19, %18 : vector<216x1xf32>
    %c0_11 = arith.constant 0 : index
    %c0_12 = arith.constant 0 : index
    %21 = vector.load %arg5[%c0_11, %c0_12] : memref<216x1xf32, #tpu.memory_space<vmem>>, vector<216x1xf32>
    %22 = arith.mulf %9, %20 : vector<216x1xf32>
    %23 = arith.subf %21, %22 : vector<216x1xf32>
    %24 = vector.broadcast %20 : vector<216x1xf32> to vector<216x784xf32>
    %25 = arith.mulf %2, %24 : vector<216x784xf32>
    %26 = vector.broadcast %23 : vector<216x1xf32> to vector<216x784xf32>
    %27 = arith.addf %25, %26 : vector<216x784xf32>
    %c0_13 = arith.constant 0 : index
    %c0_14 = arith.constant 0 : index
    %28 = vector.load %arg3[%c0_13, %c0_14] : memref<216x784xf32, #tpu.memory_space<vmem>>, vector<216x784xf32>
    %29 = arith.addf %27, %28 : vector<216x784xf32>
    %c0_15 = arith.constant 0 : index
    %c0_16 = arith.constant 0 : index
    %30 = vector.load %arg6[%c0_15, %c0_16] : memref<216x784xf32, #tpu.memory_space<vmem>>, vector<216x784xf32>
    tpu.vector_store %arg6[%c0_15, %c0_16], %29 {strides = array<i32>} : memref<216x784xf32, #tpu.memory_space<vmem>>, vector<216x784xf32>,
    return
  }
  func.func @transform_0(%arg0: i32) -> (i32, i32) {
    %c0_i32 = arith.constant 0 : i32
    %c0_i32_0 = arith.constant 0 : i32
    %c0_i32_1 = arith.constant 0 : i32
    return %c0_i32, %c0_i32_0 : i32, i32
  }
  func.func @transform_1(%arg0: i32) -> (i32, i32) {
    %c0_i32 = arith.constant 0 : i32
    %c0_i32_0 = arith.constant 0 : i32
    %c0_i32_1 = arith.constant 0 : i32
    return %c0_i32, %c0_i32_0 : i32, i32
  }
  func.func @transform_2(%arg0: i32) -> (i32, i32) {
    %c0_i32 = arith.constant 0 : i32
    %c0_i32_0 = arith.constant 0 : i32
    %c0_i32_1 = arith.constant 0 : i32
    return %c0_i32, %c0_i32_0 : i32, i32
  }
  func.func @transform_3(%arg0: i32) -> (i32, i32) {
    %c0_i32 = arith.constant 0 : i32
    %c0_i32_0 = arith.constant 0 : i32
    %c0_i32_1 = arith.constant 0 : i32
    return %c0_i32, %c0_i32_0 : i32, i32
  }
  func.func @transform_4(%arg0: i32) -> (i32, i32) {
    %c0_i32 = arith.constant 0 : i32
    %c0_i32_0 = arith.constant 0 : i32
    %c0_i32_1 = arith.constant 0 : i32
    return %c0_i32, %c0_i32_0 : i32, i32
  }
  func.func @transform_5(%arg0: i32) -> (i32, i32) {
    %c0_i32 = arith.constant 0 : i32
    %c0_i32_0 = arith.constant 0 : i32
    %c0_i32_1 = arith.constant 0 : i32
    return %c0_i32, %c0_i32_0 : i32, i32
  }
}

</mosaic_0001>

<bundles_post_ra>
// kernel: tpu_custom_call.1
= control target key start
LH: loop header
LB: loop body
LE: loop exit
PB: predicated region body
PF: predicated region fallthrough
CT: control target
= control target key end

     0   :  { %10 = vsyncpa [#allocation3], 0  ;;  %s6474_s0 = inlined_call_operand.vmem [shape: bf16[72,784], index: 0, kind: input, shape index: {}]   ;;  %s6475_s1 = inlined_call_operand.vmem [shape: bf16[216,72], index: 1, kind: input, shape index: {}]   ;;  %s6476_s2 = inlined_call_operand.hbm [shape: f32[216,784], index: 2, kind: input, shape index: {}]   ;;  %s6477_s3 = inlined_call_operand.vmem [shape: f32[216,1], index: 3, kind: input, shape index: {}]   ;;  %s6478_s4 = inlined_call_operand.vmem [shape: f32[216,1], index: 4, kind: input, shape index: {}]   ;;  %s6479_s5 = inlined_call_operand.hbm [shape: f32[216,784], index: 5, kind: output, shape index: {}]  }
   0x1   :  { %11 = vsyncpa [#allocation4], 0  ;;  %s3629_s18 = smov [#allocation2]   ;;  %s3581_s22 = scalar_lea.hbm %s6476_s2, 24192 }
   0x2   :  { %s21_s19 = sshll.u32 %s3629_s18, 4  ;;  %p3582_p0 = scmp.ne.s32.totalorder %s6476_s2, %s3581_s22  ;;  %s22_s19 = int_to_ptr.vmem [resolvable:$true] %s21_s19 }
   0x3   :  { %p3585_p1 = scmp.lt.u32.totalorder %s3581_s22, %s6476_s2 }
   0x5   :  { %p3587_p2 = pnand %p3585_p1, %p3582_p0 }
   0x7   :  { %3590 = shalt.err (!%p3587_p2)
}
   0x8   :  { %s3591_s27 = scalar_lea.vmem %s22_s19, 24192  ;;  %p3596_p4 = scmp.lt.s32.totalorder %s22_s19, %s22_s19 }
   0x9   :  { %p3592_p3 = scmp.ne.s32.totalorder %s22_s19, %s3591_s27  ;;  %p3597_p5 = scmp.lt.s32.totalorder %s3591_s27, %s3591_s27 }
   0xb   :  { %p3598_p6 = por %p3597_p5, %p3596_p4 }
   0xd   :  { %p3599_p7 = pnand %p3598_p6, %p3592_p3 }
   0xf   :  { %3602 = shalt.err (!%p3599_p7)
}
  0x10   :  { %s3630_s28 = smov 896   ;;  %s3631_s29 = smov 56  }
  0x11   :  { %27 = dma.hbm_to_vmem [thread:$0]  %s6476_s2, 24192, %s22_s19, [#allocation3], %s3630_s28, %s3630_s28, %s3631_s29  }
  0x12   :  { %3625 = dma.done.wait [#allocation3], 24192  }
  0x13   :  { %3626 = vsyncadd [#allocation3], 4294943104  ;;  %v3632_v0 = vmov 0   ;;  %v3466_v1 = vld [vmem:[%s6474_s0 + $0x4] ss:$28 sps:$4 sm:$0xff]   ;;  %vm372_vm0 = vcmask 1043456  }
  0x14   :  { %426 = vmatprep.mubr.bf16.mxu0 %v3632_v0  ;;  %536 = vmatprep.mubr.bf16.mxu1 %v3632_v0  ;;  %v3468_v2 = vld [vmem:[%s6474_s0] ss:$28 sps:$4 sm:$0xff]   ;;  %v3471_v4 = vld [vmem:[%s6474_s0 + $0x38] ss:$28 sps:$4 sm:$0xff]   ;;  %v3474_v6 = vld [vmem:[%s6474_s0 + $0x70] ss:$28 sps:$4 sm:$0xff]  }
  0x15   :  { %3464 = vset.pattern.permute.xlu1 %v3632_v0  ;;  %3465 = vset.pattern.permute.xlu0 %v3632_v0  ;;  %v3469_v3 = vld [vmem:[%s6474_s0 + $0x3c] ss:$28 sps:$4 sm:$0xff]   ;;  %v3472_v5 = vld [vmem:[%s6474_s0 + $0x74] ss:$28 sps:$4 sm:$0xff]   ;;  %v3475_v7 = vld [vmem:[%s6474_s0 + $0xac] ss:$28 sps:$4 sm:$0xff]  }
  0x16   :  { %394 = vmatprep.subr.bf16.mxu0 %v3466_v1  ;;  %3448 = vmatprep.subr.bf16.mxu1 %v3466_v1  ;;  %v95_v8 = vld [vmem:[%s6474_s0 + $0xe0] sm:$0xff]  ;;  %v3484_v13 = vld [vmem:[%s6474_s0 + $0xc] ss:$28 sps:$4 sm:$0xff]   ;;  %vm329_vm1 = vcmask 588800   ;;  %v3724_v15 = vld [vmem:[%s6475_s1 + $0x58] sm:$0xff]   ;;  %vm1056_vm2 = vcmask 130048  }
  0x17   :  { %395 = vmatpush1.bf16.msra.mxu0 %v3468_v2  ;;  %3453 = vmatpush1.bf16.msra.mxu1 %v3468_v2  ;;  %v3477_v9 = vld [vmem:[%s6474_s0 + $0xa8] ss:$28 sps:$4 sm:$0xff]   ;;  %v3326_v10 = vcombine.high %v95_v8, %v95_v8  ;;  %v3325_v11 = vcombine.low %v95_v8, %v95_v8  ;;  %v3505_v18 = vld [vmem:[%s6474_s0 + $0x14] ss:$28 sps:$4 sm:$0xff]   ;;  %v3485_v20 = vld [vmem:[%s6474_s0 + $0x40] ss:$28 sps:$4 sm:$0xff]  }
  0x18   :  { %396 = vmatprep.subr.bf16.mxu0 %v3469_v3  ;;  %3449 = vmatprep.subr.bf16.mxu1 %v3469_v3  ;;  %v3719_v14 = vld [vmem:[%s6475_s1] sm:$0xff]   ;;  %v3503_v19 = vld [vmem:[%s6474_s0 + $0x10] ss:$28 sps:$4 sm:$0xff]   ;;  %v3492_v22 = vld [vmem:[%s6474_s0 + $0x7c] ss:$28 sps:$4 sm:$0xff]  }
  0x19   :  { %v374_v12 = vsel %vm372_vm0, %v3325_v11, 0  ;;  %v3482_v16 = vld [vmem:[%s6474_s0 + $0x8] ss:$28 sps:$4 sm:$0xff]   ;;  %v3490_v25 = vld [vmem:[%s6474_s0 + $0x78] ss:$28 sps:$4 sm:$0xff]  }
  0x1a   :  { %v3487_v17 = vld [vmem:[%s6474_s0 + $0x44] ss:$28 sps:$4 sm:$0xff]   ;;  %v3750_v21 = vld [vmem:[%s6475_s1 + $0x8] sm:$0xff]   ;;  %v3495_v26 = vld [vmem:[%s6474_s0 + $0xb4] ss:$28 sps:$4 sm:$0xff]  }
  0x1b   :  { %397 = vmatpush1.bf16.msra.mxu0 %v3471_v4  ;;  %3454 = vmatpush1.bf16.msra.mxu1 %v3471_v4  ;;  %v3758_v23 = vld [vmem:[%s6475_s1 + $0x60] sm:$0xff]   ;;  %v3511_v24 = vld [vmem:[%s6474_s0 + $0x4c] ss:$28 sps:$4 sm:$0xff]   ;;  %v3790_v33 = vld [vmem:[%s6475_s1 + $0x10] sm:$0xff]  }
  0x1c   :  { %398 = vmatprep.subr.bf16.mxu0 %v3472_v5  ;;  %3450 = vmatprep.subr.bf16.mxu1 %v3472_v5  ;;  %v96_v27 = vld [vmem:[%s6474_s0 + $0xe8] sm:$0xff]  ;;  %v3518_v29 = vld [vmem:[%s6474_s0 + $0x84] ss:$28 sps:$4 sm:$0xff]   ;;  %v3501_v37 = vld [vmem:[%s6474_s0 + $0x18] ss:$28 sps:$4 sm:$0xff]  }
  0x1d   :  { %v3509_v28 = vld [vmem:[%s6474_s0 + $0x48] ss:$28 sps:$4 sm:$0xff]   ;;  %v3493_v30 = vld [vmem:[%s6474_s0 + $0xb0] ss:$28 sps:$4 sm:$0xff]   ;;  %v3328_v31 = vcombine.high %v96_v27, %v96_v27  ;;  %v3327_v32 = vcombine.low %v96_v27, %v96_v27  ;;  %v3516_v34 = vld [vmem:[%s6474_s0 + $0x80] ss:$28 sps:$4 sm:$0xff]  }
  0x1e   :  { %v3798_v35 = vld [vmem:[%s6475_s1 + $0x68] ss:$0 sps:$4 sm:$0xff]   ;;  %v97_v38 = vld [vmem:[%s6474_s0 + $0xf0] sm:$0xff]  ;;  %v3522_v39 = vld [vmem:[%s6474_s0 + $0xbc] ss:$28 sps:$4 sm:$0xff]  }
  0x1f   :  { %399 = vmatpush1.bf16.msra.mxu0 %v3474_v6  ;;  %3455 = vmatpush1.bf16.msra.mxu1 %v3474_v6  ;;  %v380_v36 = vsel %vm372_vm0, %v3327_v32, 0  ;;  %v3520_v40 = vld [vmem:[%s6474_s0 + $0xb8] ss:$28 sps:$4 sm:$0xff]   ;;  %v3330_v41 = vcombine.high %v97_v38, %v97_v38  ;;  %v3329_v43 = vcombine.low %v97_v38, %v97_v38  ;;  %v3507_v44 = vld [vmem:[%s6474_s0 + $0x50] ss:$28 sps:$4 sm:$0xff]   ;;  %v3842_v47 = vld [vmem:[%s6475_s1 + $0x20] sm:$0xff]  }
  0x20   :  { %400 = vmatprep.subr.bf16.mxu0 %v3475_v7  ;;  %3451 = vmatprep.subr.bf16.mxu1 %v3475_v7  ;;  %v3823_v42 = vld [vmem:[%s6475_s1 + $0x18] sm:$0xff]   ;;  %v3514_v46 = vld [vmem:[%s6474_s0 + $0x88] ss:$28 sps:$4 sm:$0xff]   ;;  %v3508_v52 = vld [vmem:[%s6475_s1 + $0x30] sm:$0xff]  }
  0x21   :  { %v386_v45 = vsel %vm372_vm0, %v3329_v43, 0  ;;  %v3525_v48 = vld [vmem:[%s6474_s0 + $0xc0] ss:$28 sps:$4 sm:$0xff]   ;;  %v3526_v49 = vld [vmem:[%s6474_s0 + $0xf8] ss:$0 sps:$4 sm:$0xff]   ;;  %v3859_v50 = vld [vmem:[%s6475_s1 + $0x28] sm:$0xff]  }
  0x22   :  { %v392_v51 = vsel %vm372_vm0, %v3526_v49, 0  ;;  %v3512_v53 = vld [vmem:[%s6475_s1 + $0x38] sm:$0xff]   ;;  %v3513_v54 = vld [vmem:[%s6475_s1 + $0x40] sm:$0xff]   ;;  %v3515_v55 = vld [vmem:[%s6475_s1 + $0x48] sm:$0xff]  }
  0x23   :  { %401 = vmatpush1.bf16.msra.mxu0 %v3477_v9  ;;  %3456 = vmatpush1.bf16.msra.mxu1 %v3477_v9  ;;  %v3519_v56 = vld [vmem:[%s6475_s1 + $0x50] sm:$0xff]  }
  0x24   :  { %3332 = vmatprep.subr.msk.bf16.mxu0 %vm372_vm0, %v3326_v10  ;;  %3452 = vmatprep.subr.msk.bf16.mxu1 %vm372_vm0, %v3326_v10 }
  0x27   :  { %403 = vmatpush1.bf16.msra.mxu0 %v374_v12  ;;  %3457 = vmatpush1.bf16.msra.mxu1 %v374_v12 }
  0x28   :  { %565 = vmatprep.subr.bf16.mxu1 %v3484_v13  ;;  %736 = vmatprep.subr.bf16.mxu0 %v3505_v18 }
  0x2a   :  { %3333 = vmatmul.mubr.msk.bf16.vlgmr.msra.gmra.mrb[0].mxu0 %vm329_vm1, %v3719_v14  ;;  %3344 = vmatmul.mubr.msk.bf16.vlgmr.msra.gmra.mrb[0].mxu1 %vm329_vm1, %v3724_v15 }
  0x2b   :  { %566 = vmatpush1.bf16.msra.mxu1 %v3482_v16  ;;  %436 = vmatprep.mubr.bf16.mxu0 %v3632_v0 }
  0x2c   :  { %567 = vmatprep.subr.bf16.mxu1 %v3487_v17  ;;  %546 = vmatprep.mubr.bf16.mxu1 %v3632_v0 }
  0x2d   :  { %737 = vmatpush1.bf16.msra.mxu0 %v3503_v19 }
  0x2e   :  { %738 = vmatprep.subr.bf16.mxu0 %v3511_v24 }
  0x2f   :  { %568 = vmatpush1.bf16.msra.mxu1 %v3485_v20 }
  0x30   :  { %569 = vmatprep.subr.bf16.mxu1 %v3492_v22 }
  0x31   :  { %739 = vmatpush1.bf16.msra.mxu0 %v3509_v28 }
  0x32   :  { %3334 = vmatmul.mubr.msk.bf16.gmra.mrb[4].mxu0 %vm329_vm1, %v3750_v21  ;;  %3345 = vmatmul.mubr.msk.bf16.gmra.mrb[4].mxu1 %vm329_vm1, %v3758_v23 }
  0x33   :  { %570 = vmatpush1.bf16.msra.mxu1 %v3490_v25  ;;  %446 = vmatprep.mubr.bf16.mxu0 %v3632_v0 }
  0x34   :  { %556 = vmatprep.mubr.bf16.mxu1 %v3632_v0  ;;  %571 = vmatprep.subr.bf16.mxu1 %v3495_v26 }
  0x35   :  { %740 = vmatprep.subr.bf16.mxu0 %v3518_v29 }
  0x36   :  { %741 = vmatpush1.bf16.msra.mxu0 %v3516_v34 }
  0x37   :  { %572 = vmatpush1.bf16.msra.mxu1 %v3493_v30  ;;  %742 = vmatprep.subr.bf16.mxu0 %v3522_v39 }
  0x38   :  { %3347 = vmatprep.subr.msk.bf16.mxu1 %vm372_vm0, %v3328_v31 }
  0x3a   :  { %3335 = vmatmul.mubr.msk.bf16.gmra.mrb[8].mxu0 %vm329_vm1, %v3790_v33  ;;  %3346 = vmatmul.mubr.msk.bf16.gmra.mrb[8].mxu1 %vm329_vm1, %v3798_v35 }
  0x3b   :  { %574 = vmatpush1.bf16.msra.mxu1 %v380_v36  ;;  %456 = vmatprep.mubr.bf16.mxu0 %v3632_v0 }
  0x3c   :  { %597 = vmatprep.mubr.bf16.mxu1 %v3632_v0  ;;  %3410 = vmatprep.subr.bf16.mxu1 %v3501_v37 }
  0x3d   :  { %743 = vmatpush1.bf16.msra.mxu0 %v3520_v40 }
  0x3e   :  { %3362 = vmatprep.subr.msk.bf16.mxu0 %vm372_vm0, %v3330_v41 }
  0x41   :  { %745 = vmatpush1.bf16.msra.mxu0 %v386_v45 }
  0x42   :  { %3336 = vmatmul.mubr.msk.bf16.gmra.mrb[12].mxu0 %vm329_vm1, %v3823_v42  ;;  %3348 = vmatmul.mubr.msk.bf16.vlgmr.msra.gmra.mrb[12].mxu1 %vm329_vm1, %v3719_v14 }
  0x43   :  { %3411 = vmatpush3.bf16.msra.mxu1 %v3501_v37  ;;  %466 = vmatprep.mubr.bf16.mxu0 %v3632_v0 }
  0x44   :  { %607 = vmatprep.mubr.bf16.mxu1 %v3632_v0  ;;  %3412 = vmatprep.subr.bf16.mxu1 %v3507_v44 }
  0x47   :  { %3413 = vmatpush3.bf16.msra.mxu1 %v3507_v44 }
  0x48   :  { %3414 = vmatprep.subr.bf16.mxu1 %v3514_v46 }
  0x4a   :  { %3337 = vmatmul.mubr.msk.bf16.gmra.mrb[16].mxu0 %vm329_vm1, %v3842_v47  ;;  %3349 = vmatmul.mubr.msk.bf16.gmra.mrb[16].mxu1 %vm329_vm1, %v3750_v21 }
  0x4b   :  { %476 = vmatprep.mubr.bf16.mxu0 %v3632_v0  ;;  %617 = vmatprep.mubr.bf16.mxu1 %v3632_v0 }
  0x4c   :  { %3415 = vmatpush3.bf16.msra.mxu1 %v3514_v46 }
  0x4d   :  { %3416 = vmatprep.subr.bf16.mxu1 %v3525_v48 }
  0x50   :  { %3417 = vmatpush3.bf16.msra.mxu1 %v3525_v48 }
  0x51   :  { %3458 = vmatprep.subr.msk.bf16.mxu1 %vm372_vm0, %v3526_v49 }
  0x52   :  { %3338 = vmatmul.mubr.msk.bf16.gmra.mrb[20].mxu0 %vm329_vm1, %v3859_v50  ;;  %3350 = vmatmul.mubr.msk.bf16.gmra.mrb[20].mxu1 %vm329_vm1, %v3790_v33 }
  0x53   :  { %486 = vmatprep.mubr.bf16.mxu0 %v3632_v0  ;;  %627 = vmatprep.mubr.bf16.mxu1 %v3632_v0 }
  0x54   :  { %3419 = vmatpush3.bf16.msra.mxu1 %v392_v51 }
  0x5a   :  { %3339 = vmatmul.mubr.msk.bf16.gmra.mrb[24].mxu0 %vm329_vm1, %v3508_v52  ;;  %3351 = vmatmul.mubr.msk.bf16.gmra.mrb[24].mxu1 %vm329_vm1, %v3823_v42 }
  0x5b   :  { %496 = vmatprep.mubr.bf16.mxu0 %v3632_v0  ;;  %637 = vmatprep.mubr.bf16.mxu1 %v3632_v0 }
  0x62   :  { %3340 = vmatmul.mubr.msk.bf16.gmra.mrb[28].mxu0 %vm329_vm1, %v3512_v53  ;;  %3352 = vmatmul.mubr.msk.bf16.gmra.mrb[28].mxu1 %vm329_vm1, %v3842_v47 }
  0x63   :  { %506 = vmatprep.mubr.bf16.mxu0 %v3632_v0  ;;  %647 = vmatprep.mubr.bf16.mxu1 %v3632_v0 }
  0x6a   :  { %3341 = vmatmul.mubr.msk.bf16.gmra.mrb[32].mxu0 %vm329_vm1, %v3513_v54  ;;  %3353 = vmatmul.mubr.msk.bf16.gmra.mrb[32].mxu1 %vm329_vm1, %v3859_v50 }
  0x6b   :  { %516 = vmatprep.mubr.bf16.mxu0 %v3632_v0  ;;  %657 = vmatprep.mubr.bf16.mxu1 %v3632_v0 }
  0x72   :  { %3342 = vmatmul.mubr.msk.bf16.gmra.mrb[36].mxu0 %vm329_vm1, %v3515_v55  ;;  %3354 = vmatmul.mubr.msk.bf16.gmra.mrb[36].mxu1 %vm329_vm1, %v3508_v52 }
  0x73   :  { %526 = vmatprep.mubr.bf16.mxu0 %v3632_v0  ;;  %667 = vmatprep.mubr.bf16.mxu1 %v3632_v0 }
  0x7a   :  { %3343 = vmatmul.mubr.msk.bf16.gmra.mrb[40].mxu0 %vm329_vm1, %v3519_v56  ;;  %3355 = vmatmul.mubr.msk.bf16.gmra.mrb[40].mxu1 %vm329_vm1, %v3512_v53 }
  0x7b   :  { %677 = vmatprep.mubr.bf16.mxu1 %v3632_v0  ;;  %768 = vmatprep.mubr.bf16.mxu0 %v3632_v0 }
  0x82   :  { %3356 = vmatmul.mubr.msk.bf16.gmra.mrb[44].mxu1 %vm329_vm1, %v3513_v54  ;;  %3363 = vmatmul.mubr.msk.bf16.vlgmr.msra.gmra.mrb[44].mxu0 %vm329_vm1, %v3719_v14 }
  0x83   :  { %687 = vmatprep.mubr.bf16.mxu1 %v3632_v0  ;;  %778 = vmatprep.mubr.bf16.mxu0 %v3632_v0 }
  0x8a   :  { %3357 = vmatmul.mubr.msk.bf16.gmra.mrb[48].mxu1 %vm329_vm1, %v3515_v55  ;;  %3364 = vmatmul.mubr.msk.bf16.gmra.mrb[48].mxu0 %vm329_vm1, %v3750_v21 }
  0x8b   :  { %697 = vmatprep.mubr.bf16.mxu1 %v3632_v0  ;;  %788 = vmatprep.mubr.bf16.mxu0 %v3632_v0 }
  0x92   :  { %3358 = vmatmul.mubr.msk.bf16.gmra.mrb[52].mxu1 %vm329_vm1, %v3519_v56  ;;  %3365 = vmatmul.mubr.msk.bf16.gmra.mrb[52].mxu0 %vm329_vm1, %v3790_v33 }
  0x93   :  { %707 = vmatprep.mubr.bf16.mxu1 %v3632_v0  ;;  %798 = vmatprep.mubr.bf16.mxu0 %v3632_v0 }
  0x9a   :  { %3359 = vmatmul.mubr.msk.bf16.gmra.mrb[56].mxu1 %vm329_vm1, %v3724_v15  ;;  %3366 = vmatmul.mubr.msk.bf16.gmra.mrb[56].mxu0 %vm329_vm1, %v3823_v42 }
  0x9b   :  { %717 = vmatprep.mubr.bf16.mxu1 %v3632_v0  ;;  %808 = vmatprep.mubr.bf16.mxu0 %v3632_v0 }
  0xa2   :  { %3360 = vmatmul.mubr.msk.bf16.gmra.mrb[60].mxu1 %vm329_vm1, %v3758_v23  ;;  %3367 = vmatmul.mubr.msk.bf16.gmra.mrb[60].mxu0 %vm329_vm1, %v3842_v47 }
  0xa3   :  { %727 = vmatprep.mubr.bf16.mxu1 %v3632_v0  ;;  %818 = vmatprep.mubr.bf16.mxu0 %v3632_v0 }
  0xaa   :  { %3361 = vmatmul.mubr.msk.bf16.gmra.mrb[64].mxu1 %vm329_vm1, %v3798_v35  ;;  %3368 = vmatmul.mubr.msk.bf16.gmra.mrb[64].mxu0 %vm329_vm1, %v3859_v50 }
  0xab   :  { %828 = vmatprep.mubr.bf16.mxu0 %v3632_v0  ;;  %3420 = vmatprep.mubr.msk.bf16.mxu1 %vm329_vm1, %v3719_v14 }
  0xb2   :  { %3369 = vmatmul.mubr.msk.bf16.gmra.mrb[68].mxu0 %vm329_vm1, %v3508_v52  ;;  %3421 = vmatmul.mubr.msk.bf16.vlgmr.msra.gmra.mrb[68].mxu1 %vm329_vm1, %v3750_v21 }
  0xb3   :  { %838 = vmatprep.mubr.bf16.mxu0 %v3632_v0  ;;  %3424 = vmatprep.mubr.msk.bf16.mxu1 %vm329_vm1, %v3790_v33 }
  0xba   :  { %3370 = vmatmul.mubr.msk.bf16.gmra.mrb[72].mxu0 %vm329_vm1, %v3512_v53  ;;  %3425 = vmatmul.mubr.msk.bf16.gmra.mrb[72].mxu1 %vm329_vm1, %v3823_v42 }
  0xbb   :  { %848 = vmatprep.mubr.bf16.mxu0 %v3632_v0  ;;  %3428 = vmatprep.mubr.msk.bf16.mxu1 %vm329_vm1, %v3842_v47 }
  0xc2   :  { %3371 = vmatmul.mubr.msk.bf16.gmra.mrb[76].mxu0 %vm329_vm1, %v3513_v54  ;;  %3429 = vmatmul.mubr.msk.bf16.gmra.mrb[76].mxu1 %vm329_vm1, %v3859_v50 }
  0xc3   :  { %858 = vmatprep.mubr.bf16.mxu0 %v3632_v0  ;;  %3432 = vmatprep.mubr.msk.bf16.mxu1 %vm329_vm1, %v3508_v52 }
  0xca   :  { %3372 = vmatmul.mubr.msk.bf16.gmra.mrb[80].mxu0 %vm329_vm1, %v3515_v55  ;;  %3433 = vmatmul.mubr.msk.bf16.gmra.mrb[80].mxu1 %vm329_vm1, %v3512_v53 }
  0xcb   :  { %868 = vmatprep.mubr.bf16.mxu0 %v3632_v0  ;;  %3436 = vmatprep.mubr.msk.bf16.mxu1 %vm329_vm1, %v3513_v54 }
  0xd2   :  { %3373 = vmatmul.mubr.msk.bf16.gmra.mrb[84].mxu0 %vm329_vm1, %v3519_v56  ;;  %3437 = vmatmul.mubr.msk.bf16.gmra.mrb[84].mxu1 %vm329_vm1, %v3515_v55 }
  0xd3   :  { %878 = vmatprep.mubr.bf16.mxu0 %v3632_v0  ;;  %3440 = vmatprep.mubr.msk.bf16.mxu1 %vm329_vm1, %v3519_v56 }
  0xda   :  { %3374 = vmatmul.mubr.msk.bf16.gmra.mrb[88].mxu0 %vm329_vm1, %v3724_v15  ;;  %3441 = vmatmul.mubr.msk.bf16.gmra.mrb[88].mxu1 %vm329_vm1, %v3724_v15 }
  0xdb   :  { %888 = vmatprep.mubr.bf16.mxu0 %v3632_v0  ;;  %3444 = vmatprep.mubr.msk.bf16.mxu1 %vm329_vm1, %v3758_v23 }
  0xe2   :  { %3375 = vmatmul.mubr.msk.bf16.gmra.mrb[92].mxu0 %vm329_vm1, %v3758_v23  ;;  %3445 = vmatmul.mubr.msk.bf16.gmra.mrb[92].mxu1 %vm329_vm1, %v3798_v35 }
  0xe3   :  { %898 = vmatprep.mubr.bf16.mxu0 %v3632_v0 }
  0xea   :  { %3376 = vmatmul.mubr.msk.bf16.gmra.mrb[96].mxu0 %vm329_vm1, %v3798_v35 }
  0xfd   :  { %v3980_v57 = vpop.f32.mrb[0].mxu1  ;;  %v3982_v58 = vpop.f32.mrb[0].mxu0 }
  0xfe   :  { %6660 = vst [vmem:[#allocation8_spill] sm:$0xff] %v3980_v57  ;;  %6661 = vst [vmem:[#allocation9_spill] sm:$0xff] %v3982_v58  ;;  %v1449_v59 = vmul.f32 %v3980_v57, %v3980_v57  ;;  %v3986_v60 = vpop.f32.mrb[1].mxu1  ;;  %v1295_v61 = vmul.f32 %v3982_v58, %v3982_v58  ;;  %v3990_v62 = vpop.f32.mrb[1].mxu0 }
  0xff   :  { %6662 = vst [vmem:[#allocation10_spill] sm:$0xff] %v3986_v60  ;;  %6663 = vst [vmem:[#allocation11_spill] sm:$0xff] %v3990_v62  ;;  %v3994_v63 = vadd.f32 %v3986_v60, %v3980_v57  ;;  %v1450_v0 = vmul.f32 %v3986_v60, %v3986_v60  ;;  %v3998_v1 = vpop.f32.mrb[2].mxu1  ;;  %v1051_v2 = vadd.f32 %v3990_v62, %v3982_v58  ;;  %v4004_v4 = vpop.f32.mrb[2].mxu0 }
 0x100   :  { %6664 = vst [vmem:[#allocation12_spill] sm:$0xff] %v3998_v1  ;;  %v1296_v3 = vmul.f32 %v3990_v62, %v3990_v62  ;;  %6665 = vst [vmem:[#allocation13_spill] sm:$0xff] %v4004_v4  ;;  %v1456_v5 = vmul.f32 %v3998_v1, %v3998_v1  ;;  %v4008_v6 = vpop.f32.mrb[3].mxu1  ;;  %v1302_v7 = vmul.f32 %v4004_v4, %v4004_v4  ;;  %v4012_v8 = vpop.f32.mrb[3].mxu0 }
 0x101   :  { %6666 = vst [vmem:[#allocation14_spill] sm:$0xff] %v4008_v6  ;;  %6667 = vst [vmem:[#allocation15_spill] sm:$0xff] %v4012_v8  ;;  %v4014_v9 = vadd.f32 %v1450_v0, %v1449_v59  ;;  %v4018_v10 = vadd.f32 %v4008_v6, %v3998_v1  ;;  %v1457_v11 = vmul.f32 %v4008_v6, %v4008_v6 }
 0x102   :  { %v1484_v12 = vadd.f32 %v1296_v3, %v1295_v61  ;;  %v1061_v13 = vadd.f32 %v4012_v8, %v4004_v4  ;;  %v1303_v14 = vmul.f32 %v4012_v8, %v4012_v8 }
 0x103   :  { %v4026_v15 = vadd.f32 %v1457_v11, %v1456_v5 }
 0x104   :  { %v4028_v16 = vadd.f32 %v1303_v14, %v1302_v7 }
 0x105   :  { %v4030_v17 = vpop.f32.mrb[4].mxu1  ;;  %v4032_v18 = vpop.f32.mrb[4].mxu0 }
 0x106   :  { %6668 = vst [vmem:[#allocation16_spill] sm:$0xff] %v4030_v17  ;;  %6669 = vst [vmem:[#allocation17_spill] sm:$0xff] %v4032_v18  ;;  %v1463_v19 = vmul.f32 %v4030_v17, %v4030_v17  ;;  %v4036_v20 = vpop.f32.mrb[5].mxu1  ;;  %v1309_v21 = vmul.f32 %v4032_v18, %v4032_v18  ;;  %v4040_v22 = vpop.f32.mrb[5].mxu0 }
 0x107   :  { %6670 = vst [vmem:[#allocation18_spill] sm:$0xff] %v4036_v20  ;;  %6671 = vst [vmem:[#allocation19_spill] sm:$0xff] %v4040_v22  ;;  %v4044_v23 = vadd.f32 %v4036_v20, %v4030_v17  ;;  %v1464_v24 = vmul.f32 %v4036_v20, %v4036_v20  ;;  %v4048_v25 = vpop.f32.mrb[6].mxu1  ;;  %v4052_v26 = vadd.f32 %v4040_v22, %v4032_v18  ;;  %v4056_v28 = vpop.f32.mrb[6].mxu0 }
 0x108   :  { %6672 = vst [vmem:[#allocation20_spill] sm:$0xff] %v4048_v25  ;;  %v1310_v27 = vmul.f32 %v4040_v22, %v4040_v22  ;;  %6673 = vst [vmem:[#allocation21_spill] sm:$0xff] %v4056_v28  ;;  %v1470_v29 = vmul.f32 %v4048_v25, %v4048_v25  ;;  %v4060_v30 = vpop.f32.mrb[7].mxu1  ;;  %v1316_v31 = vmul.f32 %v4056_v28, %v4056_v28  ;;  %v4064_v32 = vpop.f32.mrb[7].mxu0 }
 0x109   :  { %6674 = vst [vmem:[#allocation22_spill] sm:$0xff] %v4060_v30  ;;  %6675 = vst [vmem:[#allocation23_spill] sm:$0xff] %v4064_v32  ;;  %v4066_v33 = vadd.f32 %v1464_v24, %v1463_v19  ;;  %v4070_v34 = vadd.f32 %v4060_v30, %v4048_v25  ;;  %v1471_v35 = vmul.f32 %v4060_v30, %v4060_v30 }
 0x10a   :  { %v4074_v36 = vadd.f32 %v1310_v27, %v1309_v21  ;;  %v4078_v37 = vadd.f32 %v4064_v32, %v4056_v28  ;;  %v1317_v38 = vmul.f32 %v4064_v32, %v4064_v32 }
 0x10b   :  { %v4082_v39 = vadd.f32 %v1471_v35, %v1470_v29 }
 0x10c   :  { %v4084_v40 = vadd.f32 %v1317_v38, %v1316_v31 }
 0x10d   :  { %v4086_v41 = vpop.f32.mrb[8].mxu1  ;;  %v4088_v42 = vpop.f32.mrb[8].mxu0 }
 0x10e   :  { %6676 = vst [vmem:[#allocation24_spill] sm:$0xff] %v4086_v41  ;;  %6677 = vst [vmem:[#allocation25_spill] sm:$0xff] %v4088_v42  ;;  %v1477_v43 = vmul.f32 %v4086_v41, %v4086_v41  ;;  %v4092_v44 = vpop.f32.mrb[9].mxu1  ;;  %v1323_v45 = vmul.f32 %v4088_v42, %v4088_v42  ;;  %v4096_v46 = vpop.f32.mrb[9].mxu0 }
 0x10f   :  { %6678 = vst [vmem:[#allocation26_spill] sm:$0xff] %v4092_v44  ;;  %6679 = vst [vmem:[#allocation27_spill] sm:$0xff] %v4096_v46  ;;  %v4100_v47 = vadd.f32 %v4092_v44, %v4086_v41  ;;  %v1478_v48 = vmul.f32 %v4092_v44, %v4092_v44  ;;  %v562_v49 = vpop.f32.mrb[10].mxu1  ;;  %v4106_v50 = vadd.f32 %v4096_v46, %v4088_v42  ;;  %v4110_v52 = vpop.f32.mrb[10].mxu0 }
 0x110   :  { %v1324_v51 = vmul.f32 %v4096_v46, %v4096_v46  ;;  %6680 = vst [vmem:[#allocation28_spill] sm:$0xff] %v4110_v52  ;;  %v563_v53 = vpop.f32.mrb[11].mxu1  ;;  %v1330_v54 = vmul.f32 %v4110_v52, %v4110_v52  ;;  %v4114_v55 = vpop.f32.mrb[11].mxu0 }
 0x111   :  { %6681 = vst [vmem:[#allocation29_spill] sm:$0xff] %v4114_v55  ;;  %v4116_v56 = vadd.f32 %v1478_v48, %v1477_v43  ;;  %v4122_v61 = vadd.f32 %v4114_v55, %v4110_v52  ;;  %v1331_v0 = vmul.f32 %v4114_v55, %v4114_v55 }
 0x112   :  { %v4118_v59 = vadd.f32 %v1324_v51, %v1323_v45 }
 0x113   :  { %v4126_v3 = vadd.f32 %v1331_v0, %v1330_v54 }
 0x115   :  { %v4128_v5 = vpop.f32.mrb[12].mxu1  ;;  %v4130_v7 = vpop.f32.mrb[12].mxu0 }
 0x116   :  { %6682 = vst [vmem:[#allocation30_spill] sm:$0xff] %v4128_v5  ;;  %6683 = vst [vmem:[#allocation31_spill] sm:$0xff] %v4130_v7  ;;  %v1052_v11 = vadd.f32 %v1051_v2, %v4128_v5  ;;  %v1297_v14 = vmul.f32 %v4128_v5, %v4128_v5  ;;  %v4135_v19 = vpop.f32.mrb[13].mxu1  ;;  %v1337_v21 = vmul.f32 %v4130_v7, %v4130_v7  ;;  %v4139_v24 = vpop.f32.mrb[13].mxu0 }
 0x117   :  { %6684 = vst [vmem:[#allocation32_spill] sm:$0xff] %v4135_v19  ;;  %6685 = vst [vmem:[#allocation33_spill] sm:$0xff] %v4139_v24  ;;  %v1298_v27 = vmul.f32 %v4135_v19, %v4135_v19  ;;  %v4143_v29 = vpop.f32.mrb[14].mxu1  ;;  %v4147_v31 = vadd.f32 %v4139_v24, %v4130_v7  ;;  %v1338_v2 = vmul.f32 %v4139_v24, %v4139_v24  ;;  %v4151_v35 = vpop.f32.mrb[14].mxu0 }
 0x118   :  { %6686 = vst [vmem:[#allocation34_spill] sm:$0xff] %v4143_v29  ;;  %6687 = vst [vmem:[#allocation35_spill] sm:$0xff] %v4151_v35  ;;  %v1485_v38 = vadd.f32 %v1484_v12, %v1297_v14  ;;  %v4154_v43 = vadd.f32 %v1052_v11, %v4135_v19  ;;  %v1062_v45 = vadd.f32 %v1061_v13, %v4143_v29  ;;  %v4159_v49 = vpop.f32.mrb[15].mxu1  ;;  %v4161_v51 = vpop.f32.mrb[15].mxu0 }
 0x119   :  { %v1304_v48 = vmul.f32 %v4143_v29, %v4143_v29  ;;  %6688 = vst [vmem:[#allocation36_spill] sm:$0xff] %v4159_v49  ;;  %6689 = vst [vmem:[#allocation37_spill] sm:$0xff] %v4161_v51  ;;  %v1305_v53 = vmul.f32 %v4159_v49, %v4159_v49  ;;  %v4165_v54 = vadd.f32 %v1338_v2, %v1337_v21 }
 0x11a   :  { %v1344_v12 = vmul.f32 %v4151_v35, %v4151_v35  ;;  %v4171_v0 = vadd.f32 %v4161_v51, %v4151_v35  ;;  %v4173_v13 = vadd.f32 %v1485_v38, %v1298_v27  ;;  %v4177_v14 = vadd.f32 %v1062_v45, %v4159_v49 }
 0x11b   :  { %v1494_v11 = vadd.f32 %v4028_v16, %v1304_v48  ;;  %v1345_v30 = vmul.f32 %v4161_v51, %v4161_v51 }
 0x11d   :  { %v4181_v25 = vadd.f32 %v1494_v11, %v1305_v53  ;;  %v4183_v21 = vadd.f32 %v1345_v30, %v1344_v12  ;;  %v4185_v2 = vpop.f32.mrb[16].mxu1  ;;  %v4187_v44 = vpop.f32.mrb[16].mxu0 }
 0x11e   :  { %6690 = vst [vmem:[#allocation38_spill] sm:$0xff] %v4185_v2  ;;  %6691 = vst [vmem:[#allocation39_spill] sm:$0xff] %v4187_v44  ;;  %v1071_v27 = vadd.f32 %v4052_v26, %v4185_v2  ;;  %v1311_v16 = vmul.f32 %v4185_v2, %v4185_v2  ;;  %v4193_v38 = vpop.f32.mrb[17].mxu1  ;;  %v1351_v45 = vmul.f32 %v4187_v44, %v4187_v44  ;;  %v4197_v48 = vpop.f32.mrb[17].mxu0 }
 0x11f   :  { %6692 = vst [vmem:[#allocation40_spill] sm:$0xff] %v4193_v38  ;;  %6693 = vst [vmem:[#allocation41_spill] sm:$0xff] %v4197_v48  ;;  %v1312_v30 = vmul.f32 %v4193_v38, %v4193_v38  ;;  %v4201_v53 = vpop.f32.mrb[18].mxu1  ;;  %v4205_v12 = vadd.f32 %v4197_v48, %v4187_v44  ;;  %v1352_v26 = vmul.f32 %v4197_v48, %v4197_v48  ;;  %v4209_v11 = vpop.f32.mrb[18].mxu0 }
 0x120   :  { %6694 = vst [vmem:[#allocation42_spill] sm:$0xff] %v4201_v53  ;;  %6695 = vst [vmem:[#allocation43_spill] sm:$0xff] %v4209_v11  ;;  %v1503_v41 = vadd.f32 %v4074_v36, %v1311_v16  ;;  %v4213_v20 = vadd.f32 %v1071_v27, %v4193_v38  ;;  %v1080_v17 = vadd.f32 %v4078_v37, %v4201_v53  ;;  %v4219_v57 = vpop.f32.mrb[19].mxu1  ;;  %v4221_v6 = vpop.f32.mrb[19].mxu0 }
 0x121   :  { %v1318_v60 = vmul.f32 %v4201_v53, %v4201_v53  ;;  %6696 = vst [vmem:[#allocation44_spill] sm:$0xff] %v4219_v57  ;;  %6697 = vst [vmem:[#allocation45_spill] sm:$0xff] %v4221_v6  ;;  %v1319_v1 = vmul.f32 %v4219_v57, %v4219_v57  ;;  %v4225_v48 = vadd.f32 %v1352_v26, %v1351_v45 }
 0x122   :  { %v1358_v36 = vmul.f32 %v4209_v11, %v4209_v11  ;;  %v4231_v27 = vadd.f32 %v4221_v6, %v4209_v11  ;;  %v4233_v37 = vadd.f32 %v1503_v41, %v1312_v30  ;;  %v4237_v44 = vadd.f32 %v1080_v17, %v4219_v57 }
 0x123   :  { %v1512_v16 = vadd.f32 %v4084_v40, %v1318_v60  ;;  %v1359_v55 = vmul.f32 %v4221_v6, %v4221_v6 }
 0x125   :  { %v4241_v52 = vadd.f32 %v1512_v16, %v1319_v1  ;;  %v4243_v45 = vadd.f32 %v1359_v55, %v1358_v36  ;;  %v4245_v26 = vpop.f32.mrb[20].mxu1  ;;  %v4247_v51 = vpop.f32.mrb[20].mxu0 }
 0x126   :  { %6698 = vst [vmem:[#allocation46_spill] sm:$0xff] %v4245_v26  ;;  %6699 = vst [vmem:[#allocation47_spill] sm:$0xff] %v4247_v51  ;;  %v1089_v41 = vadd.f32 %v4106_v50, %v4245_v26  ;;  %v1325_v60 = vmul.f32 %v4245_v26, %v4245_v26  ;;  %v4253_v40 = vpop.f32.mrb[21].mxu1  ;;  %v1365_v17 = vmul.f32 %v4247_v51, %v4247_v51  ;;  %v4257_v30 = vpop.f32.mrb[21].mxu0 }
 0x127   :  { %6700 = vst [vmem:[#allocation48_spill] sm:$0xff] %v4253_v40  ;;  %6701 = vst [vmem:[#allocation49_spill] sm:$0xff] %v4257_v30  ;;  %v1326_v1 = vmul.f32 %v4253_v40, %v4253_v40  ;;  %v4261_v55 = vpop.f32.mrb[22].mxu1  ;;  %v4265_v36 = vadd.f32 %v4257_v30, %v4247_v51  ;;  %v1366_v50 = vmul.f32 %v4257_v30, %v4257_v30  ;;  %v4269_v16 = vpop.f32.mrb[22].mxu0 }
 0x128   :  { %6702 = vst [vmem:[#allocation50_spill] sm:$0xff] %v4261_v55  ;;  %6703 = vst [vmem:[#allocation51_spill] sm:$0xff] %v4269_v16  ;;  %v1521_v6 = vadd.f32 %v4118_v59, %v1325_v60  ;;  %v4273_v11 = vadd.f32 %v1089_v41, %v4253_v40  ;;  %v1098_v35 = vadd.f32 %v4122_v61, %v4261_v55  ;;  %v4279_v46 = vpop.f32.mrb[23].mxu1  ;;  %v4281_v51 = vpop.f32.mrb[23].mxu0 }
 0x129   :  { %v1332_v26 = vmul.f32 %v4261_v55, %v4261_v55  ;;  %6704 = vst [vmem:[#allocation52_spill] sm:$0xff] %v4279_v46  ;;  %6705 = vst [vmem:[#allocation53_spill] sm:$0xff] %v4281_v51  ;;  %v1333_v30 = vmul.f32 %v4279_v46, %v4279_v46  ;;  %v4285_v42 = vadd.f32 %v1366_v50, %v1365_v17 }
 0x12a   :  { %v1372_v59 = vmul.f32 %v4269_v16, %v4269_v16  ;;  %v4291_v41 = vadd.f32 %v4281_v51, %v4269_v16  ;;  %v4293_v61 = vadd.f32 %v1521_v6, %v1326_v1  ;;  %v4297_v55 = vadd.f32 %v1098_v35, %v4279_v46 }
 0x12b   :  { %v1530_v60 = vadd.f32 %v4126_v3, %v1332_v26  ;;  %v1373_v40 = vmul.f32 %v4281_v51, %v4281_v51 }
 0x12d   :  { %v4301_v24 = vadd.f32 %v1530_v60, %v1333_v30  ;;  %v4303_v17 = vadd.f32 %v1373_v40, %v1372_v59  ;;  %v4305_v50 = vpop.f32.mrb[24].mxu1  ;;  %v4307_v7 = vpop.f32.mrb[24].mxu0 }
 0x12e   :  { %6706 = vst [vmem:[#allocation54_spill] sm:$0xff] %v4305_v50  ;;  %6707 = vst [vmem:[#allocation55_spill] sm:$0xff] %v4307_v7  ;;  %v1107_v6 = vadd.f32 %v4147_v31, %v4305_v50  ;;  %v1339_v3 = vmul.f32 %v4305_v50, %v4305_v50  ;;  %v4313_v26 = vpop.f32.mrb[25].mxu1  ;;  %v1379_v35 = vmul.f32 %v4307_v7, %v4307_v7  ;;  %v4317_v1 = vpop.f32.mrb[25].mxu0 }
 0x12f   :  { %6708 = vst [vmem:[#allocation56_spill] sm:$0xff] %v4313_v26  ;;  %6709 = vst [vmem:[#allocation57_spill] sm:$0xff] %v4317_v1  ;;  %v1340_v40 = vmul.f32 %v4313_v26, %v4313_v26  ;;  %v4321_v30 = vpop.f32.mrb[26].mxu1  ;;  %v4325_v59 = vadd.f32 %v4317_v1, %v4307_v7  ;;  %v1380_v31 = vmul.f32 %v4317_v1, %v4317_v1  ;;  %v4329_v60 = vpop.f32.mrb[26].mxu0 }
 0x130   :  { %6710 = vst [vmem:[#allocation58_spill] sm:$0xff] %v4321_v30  ;;  %6711 = vst [vmem:[#allocation59_spill] sm:$0xff] %v4329_v60  ;;  %v1539_v51 = vadd.f32 %v4165_v54, %v1339_v3  ;;  %v4333_v16 = vadd.f32 %v1107_v6, %v4313_v26  ;;  %v1116_v46 = vadd.f32 %v4171_v0, %v4321_v30  ;;  %v4339_v49 = vpop.f32.mrb[27].mxu1  ;;  %v4341_v7 = vpop.f32.mrb[27].mxu0 }
 0x131   :  { %v1346_v50 = vmul.f32 %v4321_v30, %v4321_v30  ;;  %6712 = vst [vmem:[#allocation60_spill] sm:$0xff] %v4339_v49  ;;  %6713 = vst [vmem:[#allocation61_spill] sm:$0xff] %v4341_v7  ;;  %v1347_v1 = vmul.f32 %v4339_v49, %v4339_v49  ;;  %v4345_v29 = vadd.f32 %v1380_v31, %v1379_v35 }
 0x132   :  { %v1386_v54 = vmul.f32 %v4329_v60, %v4329_v60  ;;  %v4351_v6 = vadd.f32 %v4341_v7, %v4329_v60  ;;  %v4353_v0 = vadd.f32 %v1539_v51, %v1340_v40  ;;  %v4357_v30 = vadd.f32 %v1116_v46, %v4339_v49 }
 0x133   :  { %v1548_v3 = vadd.f32 %v4183_v21, %v1346_v50  ;;  %v1387_v26 = vmul.f32 %v4341_v7, %v4341_v7 }
 0x135   :  { %v4361_v8 = vadd.f32 %v1548_v3, %v1347_v1  ;;  %v4363_v35 = vadd.f32 %v1387_v26, %v1386_v54  ;;  %v4365_v31 = vpop.f32.mrb[28].mxu1  ;;  %v4367_v4 = vpop.f32.mrb[28].mxu0 }
 0x136   :  { %6714 = vst [vmem:[#allocation62_spill] sm:$0xff] %v4365_v31  ;;  %6715 = vst [vmem:[#allocation63_spill] sm:$0xff] %v4367_v4  ;;  %v1125_v51 = vadd.f32 %v4205_v12, %v4365_v31  ;;  %v1353_v21 = vmul.f32 %v4365_v31, %v4365_v31  ;;  %v4373_v50 = vpop.f32.mrb[29].mxu1  ;;  %v1393_v46 = vmul.f32 %v4367_v4, %v4367_v4  ;;  %v4377_v40 = vpop.f32.mrb[29].mxu0 }
 0x137   :  { %6716 = vst [vmem:[#allocation64_spill] sm:$0xff] %v4373_v50  ;;  %6717 = vst [vmem:[#allocation65_spill] sm:$0xff] %v4377_v40  ;;  %v1354_v26 = vmul.f32 %v4373_v50, %v4373_v50  ;;  %v4381_v1 = vpop.f32.mrb[30].mxu1  ;;  %v4385_v54 = vadd.f32 %v4377_v40, %v4367_v4  ;;  %v1394_v12 = vmul.f32 %v4377_v40, %v4377_v40  ;;  %v4389_v3 = vpop.f32.mrb[30].mxu0 }
 0x138   :  { %6718 = vst [vmem:[#allocation66_spill] sm:$0xff] %v4381_v1  ;;  %6719 = vst [vmem:[#allocation67_spill] sm:$0xff] %v4389_v3  ;;  %v1557_v7 = vadd.f32 %v4225_v48, %v1353_v21  ;;  %v4393_v60 = vadd.f32 %v1125_v51, %v4373_v50  ;;  %v1134_v31 = vadd.f32 %v4231_v27, %v4381_v1  ;;  %v4399_v19 = vpop.f32.mrb[31].mxu1  ;;  %v4401_v4 = vpop.f32.mrb[31].mxu0 }
 0x139   :  { %v1360_v49 = vmul.f32 %v4381_v1, %v4381_v1  ;;  %6720 = vst [vmem:[#allocation68_spill] sm:$0xff] %v4399_v19  ;;  %6721 = vst [vmem:[#allocation69_spill] sm:$0xff] %v4401_v4  ;;  %v1361_v40 = vmul.f32 %v4399_v19, %v4399_v19  ;;  %v4405_v5 = vadd.f32 %v1394_v12, %v1393_v46 }
 0x13a   :  { %v1400_v48 = vmul.f32 %v4389_v3, %v4389_v3  ;;  %v4411_v51 = vadd.f32 %v4401_v4, %v4389_v3  ;;  %v4413_v27 = vadd.f32 %v1557_v7, %v1354_v26  ;;  %v4417_v50 = vadd.f32 %v1134_v31, %v4399_v19 }
 0x13b   :  { %v1566_v21 = vadd.f32 %v4243_v45, %v1360_v49  ;;  %v1401_v1 = vmul.f32 %v4401_v4, %v4401_v4 }
 0x13d   :  { %v4421_v62 = vadd.f32 %v1566_v21, %v1361_v40  ;;  %v4423_v46 = vadd.f32 %v1401_v1, %v1400_v48  ;;  %v4425_v12 = vpop.f32.mrb[32].mxu1  ;;  %v4427_v58 = vpop.f32.mrb[32].mxu0 }
 0x13e   :  { %6722 = vst [vmem:[#allocation70_spill] sm:$0xff] %v4425_v12  ;;  %6723 = vst [vmem:[#allocation71_spill] sm:$0xff] %v4427_v58  ;;  %v1143_v7 = vadd.f32 %v4265_v36, %v4425_v12  ;;  %v1367_v49 = vmul.f32 %v4425_v12, %v4425_v12  ;;  %v4433_v45 = vpop.f32.mrb[33].mxu1  ;;  %v1407_v31 = vmul.f32 %v4427_v58, %v4427_v58  ;;  %v4437_v26 = vpop.f32.mrb[33].mxu0 }
 0x13f   :  { %6724 = vst [vmem:[#allocation72_spill] sm:$0xff] %v4433_v45  ;;  %6725 = vst [vmem:[#allocation73_spill] sm:$0xff] %v4437_v26  ;;  %v1368_v40 = vmul.f32 %v4433_v45, %v4433_v45  ;;  %v4441_v1 = vpop.f32.mrb[34].mxu1  ;;  %v4445_v48 = vadd.f32 %v4437_v26, %v4427_v58  ;;  %v1408_v36 = vmul.f32 %v4437_v26, %v4437_v26  ;;  %v4449_v21 = vpop.f32.mrb[34].mxu0 }
 0x140   :  { %6726 = vst [vmem:[#allocation74_spill] sm:$0xff] %v4441_v1  ;;  %6727 = vst [vmem:[#allocation75_spill] sm:$0xff] %v4449_v21  ;;  %v1575_v4 = vadd.f32 %v4285_v42, %v1367_v49  ;;  %v4453_v3 = vadd.f32 %v1143_v7, %v4433_v45  ;;  %v1152_v12 = vadd.f32 %v4291_v41, %v4441_v1  ;;  %v4459_v57 = vpop.f32.mrb[35].mxu1  ;;  %v4461_v58 = vpop.f32.mrb[35].mxu0 }
 0x141   :  { %v1374_v19 = vmul.f32 %v4441_v1, %v4441_v1  ;;  %6728 = vst [vmem:[#allocation76_spill] sm:$0xff] %v4459_v57  ;;  %6729 = vst [vmem:[#allocation77_spill] sm:$0xff] %v4461_v58  ;;  %v1375_v26 = vmul.f32 %v4459_v57, %v4459_v57  ;;  %v4465_v53 = vadd.f32 %v1408_v36, %v1407_v31 }
 0x142   :  { %v1414_v42 = vmul.f32 %v4449_v21, %v4449_v21  ;;  %v4471_v7 = vadd.f32 %v4461_v58, %v4449_v21  ;;  %v4473_v41 = vadd.f32 %v1575_v4, %v1368_v40  ;;  %v4477_v45 = vadd.f32 %v1152_v12, %v4459_v57 }
 0x143   :  { %v1584_v49 = vadd.f32 %v4303_v17, %v1374_v19  ;;  %v1415_v1 = vmul.f32 %v4461_v58, %v4461_v58 }
 0x145   :  { %v4481_v32 = vadd.f32 %v1584_v49, %v1375_v26  ;;  %v4483_v31 = vadd.f32 %v1415_v1, %v1414_v42  ;;  %v4485_v36 = vpop.f32.mrb[36].mxu1  ;;  %v4487_v28 = vpop.f32.mrb[36].mxu0 }
 0x146   :  { %6730 = vst [vmem:[#allocation78_spill] sm:$0xff] %v4485_v36  ;;  %6731 = vst [vmem:[#allocation79_spill] sm:$0xff] %v4487_v28  ;;  %v1161_v4 = vadd.f32 %v4325_v59, %v4485_v36  ;;  %v1381_v19 = vmul.f32 %v4485_v36, %v4485_v36  ;;  %v4493_v17 = vpop.f32.mrb[37].mxu1  ;;  %v1421_v12 = vmul.f32 %v4487_v28, %v4487_v28  ;;  %v4497_v40 = vpop.f32.mrb[37].mxu0 }
 0x147   :  { %6732 = vst [vmem:[#allocation80_spill] sm:$0xff] %v4493_v17  ;;  %6733 = vst [vmem:[#allocation81_spill] sm:$0xff] %v4497_v40  ;;  %v1382_v26 = vmul.f32 %v4493_v17, %v4493_v17  ;;  %v4501_v1 = vpop.f32.mrb[38].mxu1  ;;  %v4505_v42 = vadd.f32 %v4497_v40, %v4487_v28  ;;  %v1422_v59 = vmul.f32 %v4497_v40, %v4497_v40  ;;  %v4509_v49 = vpop.f32.mrb[38].mxu0 }
 0x148   :  { %6734 = vst [vmem:[#allocation82_spill] sm:$0xff] %v4501_v1  ;;  %6735 = vst [vmem:[#allocation83_spill] sm:$0xff] %v4509_v49  ;;  %v1593_v58 = vadd.f32 %v4345_v29, %v1381_v19  ;;  %v4513_v21 = vadd.f32 %v1161_v4, %v4493_v17  ;;  %v1170_v36 = vadd.f32 %v4351_v6, %v4501_v1  ;;  %v4519_v38 = vpop.f32.mrb[39].mxu1  ;;  %v4521_v28 = vpop.f32.mrb[39].mxu0 }
 0x149   :  { %v1388_v57 = vmul.f32 %v4501_v1, %v4501_v1  ;;  %6737 = vst [vmem:[#allocation85_spill] sm:$0xff] %v4519_v38  ;;  %6738 = vst [vmem:[#allocation86_spill] sm:$0xff] %v4521_v28  ;;  %v1389_v40 = vmul.f32 %v4519_v38, %v4519_v38  ;;  %v4525_v2 = vadd.f32 %v1422_v59, %v1421_v12 }
 0x14a   :  { %6736 = vst [vmem:[#allocation84_spill] sm:$0xff] %v4513_v21  ;;  %v1428_v29 = vmul.f32 %v4509_v49, %v4509_v49  ;;  %v4531_v4 = vadd.f32 %v4521_v28, %v4509_v49  ;;  %v4533_v6 = vadd.f32 %v1593_v58, %v1382_v26  ;;  %v4537_v17 = vadd.f32 %v1170_v36, %v4519_v38 }
 0x14b   :  { %v1602_v19 = vadd.f32 %v4363_v35, %v1388_v57  ;;  %v1429_v1 = vmul.f32 %v4521_v28, %v4521_v28 }
 0x14c   :  { %6739 = vst [vmem:[#allocation87_spill] sm:$0xff] %v4533_v6  ;;  %6740 = vst [vmem:[#allocation88_spill] sm:$0xff] %v4537_v17 }
 0x14d   :  { %v4541_v22 = vadd.f32 %v1602_v19, %v1389_v40  ;;  %v4543_v12 = vadd.f32 %v1429_v1, %v1428_v29  ;;  %v4545_v59 = vpop.f32.mrb[40].mxu1  ;;  %v4547_v18 = vpop.f32.mrb[40].mxu0 }
 0x14e   :  { %6742 = vst [vmem:[#allocation90_spill] sm:$0xff] %v4545_v59  ;;  %6743 = vst [vmem:[#allocation91_spill] sm:$0xff] %v4547_v18  ;;  %v1179_v58 = vadd.f32 %v4385_v54, %v4545_v59  ;;  %v1395_v57 = vmul.f32 %v4545_v59, %v4545_v59  ;;  %v4553_v35 = vpop.f32.mrb[41].mxu1  ;;  %v1435_v36 = vmul.f32 %v4547_v18, %v4547_v18  ;;  %v4557_v26 = vpop.f32.mrb[41].mxu0 }
 0x14f   :  { %6741 = vst [vmem:[#allocation89_spill] sm:$0xff] %v4541_v22  ;;  %6744 = vst [vmem:[#allocation92_spill] sm:$0xff] %v4553_v35  ;;  %v1396_v40 = vmul.f32 %v4553_v35, %v4553_v35  ;;  %v4561_v1 = vpop.f32.mrb[42].mxu1  ;;  %v4565_v29 = vadd.f32 %v4557_v26, %v4547_v18  ;;  %v1436_v54 = vmul.f32 %v4557_v26, %v4557_v26  ;;  %v4569_v19 = vpop.f32.mrb[42].mxu0 }
 0x150   :  { %6745 = vst [vmem:[#allocation93_spill] sm:$0xff] %v4557_v26  ;;  %6746 = vst [vmem:[#allocation94_spill] sm:$0xff] %v4561_v1  ;;  %v1611_v28 = vadd.f32 %v4405_v5, %v1395_v57  ;;  %v4573_v49 = vadd.f32 %v1179_v58, %v4553_v35  ;;  %v1188_v59 = vadd.f32 %v4411_v51, %v4561_v1  ;;  %v4579_v22 = vpop.f32.mrb[43].mxu1  ;;  %v4581_v18 = vpop.f32.mrb[43].mxu0 }
 0x151   :  { %6747 = vst [vmem:[#allocation95_spill] sm:$0xff] %v4569_v19  ;;  %v1402_v38 = vmul.f32 %v4561_v1, %v4561_v1  ;;  %6749 = vst [vmem:[#allocation97_spill] sm:$0xff] %v4579_v22  ;;  %v1403_v26 = vmul.f32 %v4579_v22, %v4579_v22  ;;  %v4585_v6 = vadd.f32 %v1436_v54, %v1435_v36 }
 0x152   :  { %6748 = vst [vmem:[#allocation96_spill] sm:$0xff] %v4573_v49  ;;  %6750 = vst [vmem:[#allocation98_spill] sm:$0xff] %v4581_v18  ;;  %v1442_v5 = vmul.f32 %v4569_v19, %v4569_v19  ;;  %v4591_v58 = vadd.f32 %v4581_v18, %v4569_v19  ;;  %v4593_v51 = vadd.f32 %v1611_v28, %v1396_v40 }
 0x153   :  { %v1620_v57 = vadd.f32 %v4423_v46, %v1402_v38  ;;  %v4597_v35 = vadd.f32 %v1188_v59, %v4579_v22  ;;  %v1443_v1 = vmul.f32 %v4581_v18, %v4581_v18 }
 0x154   :  { %6751 = vst [vmem:[#allocation99_spill] sm:$0xff] %v4593_v51 }
 0x155   :  { %6752 = vst [vmem:[#allocation100_spill] sm:$0xff] %v4597_v35  ;;  %v4601_v49 = vadd.f32 %v1620_v57, %v1403_v26  ;;  %v4603_v36 = vadd.f32 %v1443_v1, %v1442_v5  ;;  %v4605_v54 = vpop.f32.mrb[44].mxu1  ;;  %v4607_v17 = vpop.f32.mrb[44].mxu0 }
 0x156   :  { %6754 = vst [vmem:[#allocation102_spill] sm:$0xff] %v4605_v54  ;;  %6755 = vst [vmem:[#allocation103_spill] sm:$0xff] %v4607_v17  ;;  %v1197_v28 = vadd.f32 %v4445_v48, %v4605_v54  ;;  %v1409_v38 = vmul.f32 %v4605_v54, %v4605_v54  ;;  %v1054_v46 = vadd.f32 %v4154_v43, %v4607_v17  ;;  %v4615_v59 = vpop.f32.mrb[45].mxu1  ;;  %v4617_v40 = vpop.f32.mrb[45].mxu0 }
 0x157   :  { %6753 = vst [vmem:[#allocation101_spill] sm:$0xff] %v4601_v49  ;;  %6756 = vst [vmem:[#allocation104_spill] sm:$0xff] %v4615_v59  ;;  %v1299_v26 = vmul.f32 %v4607_v17, %v4607_v17  ;;  %v1410_v1 = vmul.f32 %v4615_v59, %v4615_v59  ;;  %v1300_v5 = vmul.f32 %v4617_v40, %v4617_v40  ;;  %v4625_v48 = vpop.f32.mrb[46].mxu1  ;;  %v4627_v57 = vpop.f32.mrb[46].mxu0 }
 0x158   :  { %6757 = vst [vmem:[#allocation105_spill] sm:$0xff] %v4617_v40  ;;  %6758 = vst [vmem:[#allocation106_spill] sm:$0xff] %v4625_v48  ;;  %v1629_v18 = vadd.f32 %v4465_v53, %v1409_v38  ;;  %v4631_v43 = vadd.f32 %v1197_v28, %v4615_v59  ;;  %v1206_v19 = vadd.f32 %v4471_v7, %v4625_v48  ;;  %v4637_v22 = vpop.f32.mrb[47].mxu1  ;;  %v4639_v17 = vpop.f32.mrb[47].mxu0 }
 0x159   :  { %6759 = vst [vmem:[#allocation107_spill] sm:$0xff] %v4627_v57  ;;  %v1416_v54 = vmul.f32 %v4625_v48, %v4625_v48  ;;  %6761 = vst [vmem:[#allocation109_spill] sm:$0xff] %v4637_v22  ;;  %v1064_v49 = vadd.f32 %v4177_v14, %v4627_v57  ;;  %v1306_v51 = vmul.f32 %v4627_v57, %v4627_v57 }
 0x15a   :  { %6760 = vst [vmem:[#allocation108_spill] sm:$0xff] %v4631_v43  ;;  %6762 = vst [vmem:[#allocation110_spill] sm:$0xff] %v4639_v17  ;;  %v1417_v53 = vmul.f32 %v4637_v22, %v4637_v22  ;;  %v1307_v28 = vmul.f32 %v4639_v17, %v4639_v17  ;;  %v4649_v7 = vadd.f32 %v1629_v18, %v1410_v1 }
 0x15b   :  { %v1638_v38 = vadd.f32 %v4483_v31, %v1416_v54  ;;  %v4653_v59 = vadd.f32 %v1206_v19, %v4637_v22  ;;  %v4656_v48 = vadd.f32 %v1054_v46, %v4617_v40  ;;  %v4659_v14 = vadd.f32 %v1064_v49, %v4639_v17 }
 0x15c   :  { %v1487_v57 = vadd.f32 %v4173_v13, %v1299_v26  ;;  %v1496_v43 = vadd.f32 %v4181_v25, %v1306_v51 }
 0x15d   :  { %v4663_v35 = vadd.f32 %v1638_v38, %v1417_v53  ;;  %v4665_v21 = vpop.f32.mrb[48].mxu1  ;;  %v4667_v18 = vpop.f32.mrb[48].mxu0 }
 0x15e   :  { %6763 = vst [vmem:[#allocation111_spill] sm:$0xff] %v4665_v21  ;;  %6764 = vst [vmem:[#allocation112_spill] sm:$0xff] %v4667_v18  ;;  %v4669_v31 = vadd.f32 %v1487_v57, %v1300_v5  ;;  %v4671_v19 = vadd.f32 %v1496_v43, %v1307_v28  ;;  %v1215_v54 = vadd.f32 %v4505_v42, %v4665_v21  ;;  %v4679_v25 = vpop.f32.mrb[49].mxu1  ;;  %v4681_v51 = vpop.f32.mrb[49].mxu0 }
 0x15f   :  { %v1423_v49 = vmul.f32 %v4665_v21, %v4665_v21  ;;  %v1073_v13 = vadd.f32 %v4213_v20, %v4667_v18  ;;  %6765 = vst [vmem:[#allocation113_spill] sm:$0xff] %v4679_v25  ;;  %6766 = vst [vmem:[#allocation114_spill] sm:$0xff] %v4681_v51  ;;  %v1313_v46 = vmul.f32 %v4667_v18, %v4667_v18  ;;  %v4689_v42 = vpop.f32.mrb[50].mxu1  ;;  %v4691_v5 = vpop.f32.mrb[50].mxu0 }
 0x160   :  { %v1424_v26 = vmul.f32 %v4679_v25, %v4679_v25  ;;  %v1314_v1 = vmul.f32 %v4681_v51, %v4681_v51  ;;  %6767 = vst [vmem:[#allocation115_spill] sm:$0xff] %v4689_v42  ;;  %6768 = vst [vmem:[#allocation116_spill] sm:$0xff] %v4691_v5  ;;  %v4695_v20 = vadd.f32 %v1215_v54, %v4679_v25  ;;  %v4701_v28 = vpop.f32.mrb[51].mxu1  ;;  %v4703_v38 = vpop.f32.mrb[51].mxu0 }
 0x161   :  { %v1647_v57 = vadd.f32 %v4525_v2, %v1423_v49  ;;  %v1224_v43 = vadd.f32 %v4531_v4, %v4689_v42  ;;  %v1430_v53 = vmul.f32 %v4689_v42, %v4689_v42  ;;  %6769 = vst [vmem:[#allocation117_spill] sm:$0xff] %v4701_v28  ;;  %6770 = vst [vmem:[#allocation118_spill] sm:$0xff] %v4703_v38 }
 0x162   :  { %v1082_v21 = vadd.f32 %v4237_v44, %v4691_v5  ;;  %v1320_v22 = vmul.f32 %v4691_v5, %v4691_v5  ;;  %v1431_v2 = vmul.f32 %v4701_v28, %v4701_v28  ;;  %v1321_v54 = vmul.f32 %v4703_v38, %v4703_v38 }
 0x163   :  { %v4713_v4 = vadd.f32 %v1647_v57, %v1424_v26  ;;  %v1656_v49 = vadd.f32 %v4543_v12, %v1430_v53  ;;  %v4717_v25 = vadd.f32 %v1224_v43, %v4701_v28  ;;  %v4720_v42 = vadd.f32 %v1073_v13, %v4681_v51 }
 0x164   :  { %v4723_v44 = vadd.f32 %v1082_v21, %v4703_v38  ;;  %v1505_v17 = vadd.f32 %v4233_v37, %v1313_v46  ;;  %v1514_v40 = vadd.f32 %v4241_v52, %v1320_v22 }
 0x165   :  { %v4727_v5 = vadd.f32 %v1656_v49, %v1431_v2  ;;  %v4729_v18 = vpop.f32.mrb[52].mxu1  ;;  %v4731_v26 = vpop.f32.mrb[52].mxu0 }
 0x166   :  { %6771 = vst [vmem:[#allocation119_spill] sm:$0xff] %v4729_v18  ;;  %6772 = vst [vmem:[#allocation120_spill] sm:$0xff] %v4731_v26  ;;  %v4733_v12 = vadd.f32 %v1505_v17, %v1314_v1  ;;  %v4735_v57 = vadd.f32 %v1514_v40, %v1321_v54  ;;  %v1233_v13 = vadd.f32 %v4565_v29, %v4729_v18  ;;  %v4743_v22 = vpop.f32.mrb[53].mxu1  ;;  %v4745_v52 = vpop.f32.mrb[53].mxu0 }
 0x167   :  { %v1437_v21 = vmul.f32 %v4729_v18, %v4729_v18  ;;  %v1091_v37 = vadd.f32 %v4273_v11, %v4731_v26  ;;  %6773 = vst [vmem:[#allocation121_spill] sm:$0xff] %v4743_v22  ;;  %6774 = vst [vmem:[#allocation122_spill] sm:$0xff] %v4745_v52  ;;  %v1327_v46 = vmul.f32 %v4731_v26, %v4731_v26  ;;  %v4753_v29 = vpop.f32.mrb[54].mxu1  ;;  %v4755_v1 = vpop.f32.mrb[54].mxu0 }
 0x168   :  { %v1438_v17 = vmul.f32 %v4743_v22, %v4743_v22  ;;  %v1328_v40 = vmul.f32 %v4745_v52, %v4745_v52  ;;  %6775 = vst [vmem:[#allocation123_spill] sm:$0xff] %v4753_v29  ;;  %6776 = vst [vmem:[#allocation124_spill] sm:$0xff] %v4755_v1  ;;  %v4759_v11 = vadd.f32 %v1233_v13, %v4743_v22  ;;  %v4765_v54 = vpop.f32.mrb[55].mxu1  ;;  %v4767_v49 = vpop.f32.mrb[55].mxu0 }
 0x169   :  { %v1665_v43 = vadd.f32 %v4585_v6, %v1437_v21  ;;  %v1242_v53 = vadd.f32 %v4591_v58, %v4753_v29  ;;  %v1444_v2 = vmul.f32 %v4753_v29, %v4753_v29  ;;  %6777 = vst [vmem:[#allocation125_spill] sm:$0xff] %v4765_v54  ;;  %6778 = vst [vmem:[#allocation126_spill] sm:$0xff] %v4767_v49 }
 0x16a   :  { %v1100_v18 = vadd.f32 %v4297_v55, %v4755_v1  ;;  %v1334_v28 = vmul.f32 %v4755_v1, %v4755_v1  ;;  %v1445_v6 = vmul.f32 %v4765_v54, %v4765_v54  ;;  %v1335_v13 = vmul.f32 %v4767_v49, %v4767_v49 }
 0x16b   :  { %v4777_v58 = vadd.f32 %v1665_v43, %v1438_v17  ;;  %v1674_v21 = vadd.f32 %v4603_v36, %v1444_v2  ;;  %v4781_v22 = vadd.f32 %v1242_v53, %v4765_v54  ;;  %v4784_v29 = vadd.f32 %v1091_v37, %v4745_v52 }
 0x16c   :  { %v4787_v55 = vadd.f32 %v1100_v18, %v4767_v49  ;;  %v1523_v1 = vadd.f32 %v4293_v61, %v1327_v46  ;;  %v1532_v26 = vadd.f32 %v4301_v24, %v1334_v28 }
 0x16d   :  { %v4791_v38 = vadd.f32 %v1674_v21, %v1445_v6  ;;  %v4793_v51 = vpop.f32.mrb[56].mxu1  ;;  %v4795_v17 = vpop.f32.mrb[56].mxu0 }
 0x16e   :  { %6779 = vst [vmem:[#allocation127_spill] sm:$0xff] %v4793_v51  ;;  %6780 = vst [vmem:[#allocation128_spill] sm:$0xff] %v4795_v17  ;;  %v4797_v36 = vadd.f32 %v1523_v1, %v1328_v40  ;;  %v4799_v43 = vadd.f32 %v1532_v26, %v1335_v13  ;;  %v1251_v37 = vadd.f32 %v3994_v63, %v4793_v51  ;;  %v4807_v24 = vpop.f32.mrb[57].mxu1  ;;  %v4809_v28 = vpop.f32.mrb[57].mxu0 }
 0x16f   :  { %v1451_v18 = vmul.f32 %v4793_v51, %v4793_v51  ;;  %v1109_v61 = vadd.f32 %v4333_v16, %v4795_v17  ;;  %6781 = vst [vmem:[#allocation129_spill] sm:$0xff] %v4807_v24  ;;  %6782 = vst [vmem:[#allocation130_spill] sm:$0xff] %v4809_v28  ;;  %v1341_v46 = vmul.f32 %v4795_v17, %v4795_v17  ;;  %v4817_v63 = vpop.f32.mrb[58].mxu1  ;;  %v4819_v1 = vpop.f32.mrb[58].mxu0 }
 0x170   :  { %v1452_v26 = vmul.f32 %v4807_v24, %v4807_v24  ;;  %v1342_v40 = vmul.f32 %v4809_v28, %v4809_v28  ;;  %6783 = vst [vmem:[#allocation131_spill] sm:$0xff] %v4817_v63  ;;  %6784 = vst [vmem:[#allocation132_spill] sm:$0xff] %v4819_v1  ;;  %v4823_v16 = vadd.f32 %v1251_v37, %v4807_v24  ;;  %v4829_v13 = vpop.f32.mrb[59].mxu1  ;;  %v4831_v21 = vpop.f32.mrb[59].mxu0 }
 0x171   :  { %v1683_v53 = vadd.f32 %v4014_v9, %v1451_v18  ;;  %v1260_v2 = vadd.f32 %v4018_v10, %v4817_v63  ;;  %v1458_v6 = vmul.f32 %v4817_v63, %v4817_v63  ;;  %6785 = vst [vmem:[#allocation133_spill] sm:$0xff] %v4829_v13  ;;  %6786 = vst [vmem:[#allocation134_spill] sm:$0xff] %v4831_v21 }
 0x172   :  { %v1118_v51 = vadd.f32 %v4357_v30, %v4819_v1  ;;  %v1348_v54 = vmul.f32 %v4819_v1, %v4819_v1  ;;  %v1459_v9 = vmul.f32 %v4829_v13, %v4829_v13  ;;  %v1349_v37 = vmul.f32 %v4831_v21, %v4831_v21 }
 0x173   :  { %v4841_v10 = vadd.f32 %v1683_v53, %v1452_v26  ;;  %v1692_v18 = vadd.f32 %v4026_v15, %v1458_v6  ;;  %v4845_v24 = vadd.f32 %v1260_v2, %v4829_v13  ;;  %v4848_v63 = vadd.f32 %v1109_v61, %v4809_v28 }
 0x174   :  { %v4851_v30 = vadd.f32 %v1118_v51, %v4831_v21  ;;  %v1541_v49 = vadd.f32 %v4353_v0, %v1341_v46  ;;  %v1550_v1 = vadd.f32 %v4361_v8, %v1348_v54 }
 0x175   :  { %v4855_v52 = vadd.f32 %v1692_v18, %v1459_v9  ;;  %v4857_v17 = vpop.f32.mrb[60].mxu1  ;;  %v4859_v26 = vpop.f32.mrb[60].mxu0 }
 0x176   :  { %6787 = vst [vmem:[#allocation135_spill] sm:$0xff] %v4857_v17  ;;  %6788 = vst [vmem:[#allocation136_spill] sm:$0xff] %v4859_v26  ;;  %v4861_v15 = vadd.f32 %v1541_v49, %v1342_v40  ;;  %v4863_v53 = vadd.f32 %v1550_v1, %v1349_v37  ;;  %v1269_v61 = vadd.f32 %v4044_v23, %v4857_v17  ;;  %v4871_v8 = vpop.f32.mrb[61].mxu1  ;;  %v4873_v54 = vpop.f32.mrb[61].mxu0 }
 0x177   :  { %v1465_v51 = vmul.f32 %v4857_v17, %v4857_v17  ;;  %v1127_v0 = vadd.f32 %v4393_v60, %v4859_v26  ;;  %6789 = vst [vmem:[#allocation137_spill] sm:$0xff] %v4871_v8  ;;  %6790 = vst [vmem:[#allocation138_spill] sm:$0xff] %v4873_v54  ;;  %v1355_v46 = vmul.f32 %v4859_v26, %v4859_v26  ;;  %v4881_v23 = vpop.f32.mrb[62].mxu1  ;;  %v4883_v1 = vpop.f32.mrb[62].mxu0 }
 0x178   :  { %v1466_v49 = vmul.f32 %v4871_v8, %v4871_v8  ;;  %v1356_v40 = vmul.f32 %v4873_v54, %v4873_v54  ;;  %6791 = vst [vmem:[#allocation139_spill] sm:$0xff] %v4881_v23  ;;  %6792 = vst [vmem:[#allocation140_spill] sm:$0xff] %v4883_v1  ;;  %v4887_v60 = vadd.f32 %v1269_v61, %v4871_v8  ;;  %v4893_v37 = vpop.f32.mrb[63].mxu1  ;;  %v4895_v18 = vpop.f32.mrb[63].mxu0 }
 0x179   :  { %v1701_v2 = vadd.f32 %v4066_v33, %v1465_v51  ;;  %v1278_v6 = vadd.f32 %v4070_v34, %v4881_v23  ;;  %v1472_v9 = vmul.f32 %v4881_v23, %v4881_v23  ;;  %6793 = vst [vmem:[#allocation141_spill] sm:$0xff] %v4893_v37  ;;  %6794 = vst [vmem:[#allocation142_spill] sm:$0xff] %v4895_v18 }
 0x17a   :  { %v1136_v17 = vadd.f32 %v4417_v50, %v4883_v1  ;;  %v1362_v13 = vmul.f32 %v4883_v1, %v4883_v1  ;;  %v1473_v33 = vmul.f32 %v4893_v37, %v4893_v37  ;;  %v1363_v61 = vmul.f32 %v4895_v18, %v4895_v18 }
 0x17b   :  { %v4905_v34 = vadd.f32 %v1701_v2, %v1466_v49  ;;  %v1710_v51 = vadd.f32 %v4082_v39, %v1472_v9  ;;  %v4909_v23 = vadd.f32 %v1278_v6, %v4893_v37  ;;  %v4912_v8 = vadd.f32 %v1127_v0, %v4873_v54 }
 0x17c   :  { %v4915_v50 = vadd.f32 %v1136_v17, %v4895_v18  ;;  %v1559_v26 = vadd.f32 %v4413_v27, %v1355_v46  ;;  %v1568_v1 = vadd.f32 %v4421_v62, %v1362_v13 }
 0x17d   :  { %6795 = vst [vmem:[#allocation143_spill] sm:$0xff] %v4905_v34  ;;  %6796 = vst [vmem:[#allocation144_spill] sm:$0xff] %v4909_v23  ;;  %v4919_v21 = vadd.f32 %v1710_v51, %v1473_v33  ;;  %v4921_v28 = vpop.f32.mrb[64].mxu1  ;;  %v4923_v49 = vpop.f32.mrb[64].mxu0 }
 0x17e   :  { %6798 = vst [vmem:[#allocation146_spill] sm:$0xff] %v4921_v28  ;;  %6799 = vst [vmem:[#allocation147_spill] sm:$0xff] %v4923_v49  ;;  %v4925_v39 = vadd.f32 %v1559_v26, %v1356_v40  ;;  %v4927_v2 = vadd.f32 %v1568_v1, %v1363_v61  ;;  %v1287_v0 = vadd.f32 %v4100_v47, %v4921_v28  ;;  %v4937_v13 = vpop.f32.mrb[65].mxu1  ;;  %v4939_v46 = vpop.f32.mrb[65].mxu0 }
 0x17f   :  { %6797 = vst [vmem:[#allocation145_spill] sm:$0xff] %v4919_v21  ;;  %v1479_v17 = vmul.f32 %v4921_v28, %v4921_v28  ;;  %v1145_v27 = vadd.f32 %v4453_v3, %v4923_v49  ;;  %v1369_v62 = vmul.f32 %v4923_v49, %v4923_v49  ;;  %6800 = vst [vmem:[#allocation148_spill] sm:$0xff] %v4937_v13  ;;  %v733_v47 = vpop.f32.mrb[66].mxu1  ;;  %v4945_v1 = vpop.f32.mrb[66].mxu0 }
 0x180   :  { %6801 = vst [vmem:[#allocation149_spill] sm:$0xff] %v4939_v46  ;;  %v1480_v26 = vmul.f32 %v4937_v13, %v4937_v13  ;;  %v1370_v40 = vmul.f32 %v4939_v46, %v4939_v46  ;;  %6802 = vst [vmem:[#allocation150_spill] sm:$0xff] %v4945_v1  ;;  %v4949_v3 = vadd.f32 %v1287_v0, %v4937_v13  ;;  %v734_v61 = vpop.f32.mrb[67].mxu1  ;;  %v4955_v51 = vpop.f32.mrb[67].mxu0 }
 0x181   :  { %v1719_v6 = vadd.f32 %v4116_v56, %v1479_v17  ;;  %v1154_v9 = vadd.f32 %v4477_v45, %v4945_v1  ;;  %v1376_v33 = vmul.f32 %v4945_v1, %v4945_v1  ;;  %6804 = vst [vmem:[#allocation152_spill] sm:$0xff] %v4955_v51  ;;  %v1377_v37 = vmul.f32 %v4955_v51, %v4955_v51 }
 0x182   :  { %6803 = vst [vmem:[#allocation151_spill] sm:$0xff] %v4949_v3  ;;  %v4960_v47 = vadd.f32 %v1145_v27, %v4939_v46  ;;  %v1577_v56 = vadd.f32 %v4473_v41, %v1369_v62  ;;  %v6808_v27 = vld [vmem:[#allocation84_spill] sm:$0xff] }
 0x183   :  { %v4963_v17 = vadd.f32 %v1719_v6, %v1480_v26  ;;  %v4966_v0 = vadd.f32 %v1154_v9, %v4955_v51  ;;  %v1586_v45 = vadd.f32 %v4481_v32, %v1376_v33 }
 0x184   :  { %v4969_v13 = vadd.f32 %v1577_v56, %v1370_v40 }
 0x185   :  { %6805 = vst [vmem:[#allocation153_spill] sm:$0xff] %v4963_v17  ;;  %v4971_v61 = vadd.f32 %v1586_v45, %v1377_v37  ;;  %v4973_v28 = vpop.f32.mrb[68].mxu0  ;;  %v4975_v54 = vpop.f32.mrb[68].mxu1  ;;  %v6813_v45 = vld [vmem:[#allocation88_spill] sm:$0xff] }
 0x186   :  { %6806 = vst [vmem:[#allocation154_spill] sm:$0xff] %v4973_v28  ;;  %6807 = vst [vmem:[#allocation155_spill] sm:$0xff] %v4975_v54  ;;  %v1163_v46 = vadd.f32 %v6808_v27, %v4973_v28  ;;  %v1315_v41 = vmul.f32 %v4975_v54, %v4975_v54  ;;  %v4981_v62 = vpop.f32.mrb[69].mxu0  ;;  %v4983_v26 = vpop.f32.mrb[69].mxu1  ;;  %v1075_v32 = vsel %vm1056_vm2, %v4975_v54, 0.0  ;;  %v1383_v56 = vmul.f32 %v4973_v28, %v4973_v28 }
 0x187   :  { %6809 = vst [vmem:[#allocation84_spill] sm:$0xff] %v4981_v62  ;;  %6810 = vst [vmem:[#allocation156_spill] sm:$0xff] %v4983_v26  ;;  %v1301_v37 = vmul.f32 %v4983_v26, %v4983_v26  ;;  %v4989_v40 = vpop.f32.mrb[70].mxu0  ;;  %v4991_v6 = vpop.f32.mrb[70].mxu1  ;;  %v1076_v9 = vadd.f32 %v1075_v32, %v4720_v42  ;;  %v1057_v33 = vsel %vm1056_vm2, %v4983_v26, 0.0 }
 0x188   :  { %6811 = vst [vmem:[#allocation157_spill] sm:$0xff] %v4989_v40  ;;  %6812 = vst [vmem:[#allocation158_spill] sm:$0xff] %v4991_v6  ;;  %v1172_v27 = vadd.f32 %v6813_v45, %v4989_v40  ;;  %v1322_v49 = vmul.f32 %v4991_v6, %v4991_v6  ;;  %v5002_v18 = vpop.f32.mrb[71].mxu1  ;;  %v5004_v51 = vpop.f32.mrb[71].mxu0  ;;  %v1058_v1 = vadd.f32 %v1057_v33, %v4656_v48  ;;  %v1084_v28 = vsel %vm1056_vm2, %v4991_v6, 0.0 }
 0x189   :  { %6814 = vst [vmem:[#allocation88_spill] sm:$0xff] %v5002_v18  ;;  %6815 = vst [vmem:[#allocation159_spill] sm:$0xff] %v5004_v51  ;;  %v1390_v42 = vmul.f32 %v4989_v40, %v4989_v40  ;;  %v1308_v32 = vmul.f32 %v5002_v18, %v5002_v18  ;;  %1077 = vadd.xlane.f32.xlu1 %v1076_v9  ;;  %v1066_v45 = vsel %vm1056_vm2, %v5002_v18, 0.0  ;;  %v1507_v48 = vsel %vm1056_vm2, %v1315_v41, 0.0 }
 0x18a   :  { %1059 = vadd.xlane.f32.xlu0 %v1058_v1  ;;  %v1085_v26 = vadd.f32 %v1084_v28, %v4723_v44  ;;  %v1067_v54 = vadd.f32 %v1066_v45, %v4659_v14  ;;  %v1516_v33 = vsel %vm1056_vm2, %v1322_v49, 0.0  ;;  %v1508_v40 = vadd.f32 %v1507_v48, %v4733_v12 }
 0x18b   :  { %v1517_v17 = vadd.f32 %v1516_v33, %v4735_v57  ;;  %v1489_v9 = vsel %vm1056_vm2, %v1301_v37, 0.0  ;;  %v1498_v6 = vsel %vm1056_vm2, %v1308_v32, 0.0  ;;  %v5026_v44 = vadd.f32 %v1163_v46, %v4981_v62 }
 0x18c   :  { %v1490_v3 = vadd.f32 %v1489_v9, %v4669_v31  ;;  %v1499_v1 = vadd.f32 %v1498_v6, %v4671_v19  ;;  %v5029_v14 = vadd.f32 %v1172_v27, %v5004_v51  ;;  %v1384_v28 = vmul.f32 %v4981_v62, %v4981_v62  ;;  %v6818_v31 = vld [vmem:[#allocation87_spill] sm:$0xff]  ;;  %v6819_v19 = vld [vmem:[#allocation89_spill] sm:$0xff]  ;;  %v6820_v6 = vld [vmem:[#allocation96_spill] sm:$0xff] }
 0x18d   :  { %v1391_v12 = vmul.f32 %v5004_v51, %v5004_v51  ;;  %v5035_v57 = vpop.f32.mrb[72].mxu1  ;;  %1086 = vadd.xlane.f32.xlu1 %v1085_v26  ;;  %v5037_v49 = vpop.f32.mrb[72].mxu0  ;;  %v1595_v41 = vadd.f32 %v6818_v31, %v1383_v56  ;;  %v1604_v37 = vadd.f32 %v6819_v19, %v1390_v42  ;;  %v6825_v19 = vld [vmem:[#allocation100_spill] sm:$0xff] }
 0x18e   :  { %6816 = vst [vmem:[#allocation160_spill] sm:$0xff] %v5035_v57  ;;  %6817 = vst [vmem:[#allocation161_spill] sm:$0xff] %v5037_v49  ;;  %v1343_v46 = vmul.f32 %v5035_v57, %v5035_v57  ;;  %v1181_v27 = vadd.f32 %v6820_v6, %v5037_v49  ;;  %v1397_v32 = vmul.f32 %v5037_v49, %v5037_v49  ;;  %v5047_v45 = vpop.f32.mrb[73].mxu1  ;;  %1068 = vadd.xlane.f32.xlu0 %v1067_v54  ;;  %v5049_v48 = vpop.f32.mrb[73].mxu0 }
 0x18f   :  { %6821 = vst [vmem:[#allocation87_spill] sm:$0xff] %v5047_v45  ;;  %6822 = vst [vmem:[#allocation89_spill] sm:$0xff] %v5049_v48  ;;  %v1111_v26 = vsel %vm1056_vm2, %v5035_v57, 0.0  ;;  %v1329_v56 = vmul.f32 %v5047_v45, %v5047_v45  ;;  %v5057_v42 = vmul.f32 %v5049_v48, %v5049_v48  ;;  %v5059_v33 = vpop.f32.mrb[74].mxu0  ;;  %v5061_v9 = vpop.f32.mrb[74].mxu1  ;;  %v1093_v54 = vsel %vm1056_vm2, %v5047_v45, 0.0 }
 0x190   :  { %6823 = vst [vmem:[#allocation96_spill] sm:$0xff] %v5059_v33  ;;  %6824 = vst [vmem:[#allocation162_spill] sm:$0xff] %v5061_v9  ;;  %v1112_v31 = vadd.f32 %v1111_v26, %v4848_v63  ;;  %v1190_v6 = vadd.f32 %v6825_v19, %v5059_v33  ;;  %v1404_v62 = vmul.f32 %v5059_v33, %v5059_v33  ;;  %v5072_v51 = vpop.f32.mrb[75].mxu1  ;;  %v5074_v57 = vpop.f32.mrb[75].mxu0  ;;  %v1120_v18 = vsel %vm1056_vm2, %v5061_v9, 0.0 }
 0x191   :  { %v1350_v49 = vmul.f32 %v5061_v9, %v5061_v9  ;;  %6826 = vst [vmem:[#allocation100_spill] sm:$0xff] %v5074_v57  ;;  %v1336_v63 = vmul.f32 %v5072_v51, %v5072_v51  ;;  %1509 = vadd.xlane.f32.xlu1 %v1508_v40  ;;  %v1405_v26 = vmul.f32 %v5074_v57, %v5074_v57  ;;  %v1543_v33 = vsel %vm1056_vm2, %v1343_v46, 0.0 }
 0x192   :  { %v1121_v19 = vadd.f32 %v1120_v18, %v4851_v30  ;;  %1518 = vadd.xlane.f32.xlu0 %v1517_v17  ;;  %v1544_v45 = vadd.f32 %v1543_v33, %v4861_v15  ;;  %v5086_v21 = vadd.f32 %v1093_v54, %v4784_v29  ;;  %v1102_v9 = vsel %vm1056_vm2, %v5072_v51, 0.0  ;;  %v6831_v54 = vld [vmem:[#allocation108_spill] sm:$0xff] }
 0x193   :  { %v1552_v34 = vsel %vm1056_vm2, %v1350_v49, 0.0  ;;  %v5092_v40 = vadd.f32 %v1102_v9, %v4787_v55  ;;  %v1525_v30 = vsel %vm1056_vm2, %v1329_v56, 0.0  ;;  %v1534_v18 = vsel %vm1056_vm2, %v1336_v63, 0.0  ;;  %v6830_v56 = vld [vmem:[#allocation101_spill] sm:$0xff] }
 0x194   :  { %v5095_v23 = vadd.f32 %v1552_v34, %v4863_v53  ;;  %v5100_v15 = vadd.f32 %v1525_v30, %v4797_v36  ;;  %v5103_v29 = vadd.f32 %v1534_v18, %v4799_v43  ;;  %v5106_v17 = vadd.f32 %v1190_v6, %v5074_v57  ;;  %v6829_v34 = vld [vmem:[#allocation99_spill] sm:$0xff] }
 0x195   :  { %v5109_v49 = vadd.f32 %v1181_v27, %v5049_v48  ;;  %v5111_v55 = vpop.f32.mrb[76].mxu1  ;;  %1491 = vadd.xlane.f32.xlu1 %v1490_v3  ;;  %v5113_v53 = vpop.f32.mrb[76].mxu0  ;;  %v1613_v46 = vadd.f32 %v6829_v34, %v1397_v32  ;;  %v1622_v33 = vadd.f32 %v6830_v56, %v1404_v62  ;;  %v5117_v36 = vadd.f32 %v1595_v41, %v1384_v28 }
 0x196   :  { %6827 = vst [vmem:[#allocation163_spill] sm:$0xff] %v5111_v55  ;;  %6828 = vst [vmem:[#allocation164_spill] sm:$0xff] %v5113_v53  ;;  %v5119_v9 = vadd.f32 %v1604_v37, %v1391_v12  ;;  %v1371_v43 = vmul.f32 %v5111_v55, %v5111_v55  ;;  %v1199_v27 = vadd.f32 %v6831_v54, %v5113_v53  ;;  %v5127_v3 = vpop.f32.mrb[77].mxu1  ;;  %1500 = vadd.xlane.f32.xlu0 %v1499_v1  ;;  %v5129_v63 = vpop.f32.mrb[77].mxu0 }
 0x197   :  { %v1411_v6 = vmul.f32 %v5113_v53, %v5113_v53  ;;  %6832 = vst [vmem:[#allocation99_spill] sm:$0xff] %v5127_v3  ;;  %6833 = vst [vmem:[#allocation101_spill] sm:$0xff] %v5129_v63  ;;  %v1147_v62 = vsel %vm1056_vm2, %v5111_v55, 0.0  ;;  %v1357_v28 = vmul.f32 %v5127_v3, %v5127_v3  ;;  %v5137_v12 = vmul.f32 %v5129_v63, %v5129_v63  ;;  %v5139_v41 = vpop.f32.mrb[78].mxu0  ;;  %v5141_v37 = vpop.f32.mrb[78].mxu1 }
 0x198   :  { %6834 = vst [vmem:[#allocation108_spill] sm:$0xff] %v5139_v41  ;;  %v5144_v32 = vadd.f32 %v1147_v62, %v4960_v47  ;;  %v1129_v1 = vsel %vm1056_vm2, %v5127_v3, 0.0  ;;  %v1208_v30 = vadd.f32 %v4653_v59, %v5139_v41  ;;  %v1418_v18 = vmul.f32 %v5139_v41, %v5139_v41  ;;  %v5154_v56 = vpop.f32.mrb[79].mxu1  ;;  %v5156_v54 = vpop.f32.mrb[79].mxu0 }
 0x199   :  { %v1378_v34 = vmul.f32 %v5141_v37, %v5141_v37  ;;  %6835 = vst [vmem:[#allocation165_spill] sm:$0xff] %v5156_v54  ;;  %v1156_v47 = vsel %vm1056_vm2, %v5141_v37, 0.0  ;;  %v1364_v62 = vmul.f32 %v5154_v56, %v5154_v56  ;;  %1122 = vadd.xlane.f32.xlu1 %v1121_v19  ;;  %v5164_v59 = vmul.f32 %v5156_v54, %v5156_v54 }
 0x19a   :  { %v5167_v53 = vadd.f32 %v1156_v47, %v4966_v0  ;;  %v1579_v41 = vsel %vm1056_vm2, %v1371_v43, 0.0  ;;  %1113 = vadd.xlane.f32.xlu0 %v1112_v31  ;;  %v5174_v57 = vadd.f32 %v1129_v1, %v4912_v8  ;;  %v1138_v3 = vsel %vm1056_vm2, %v5154_v56, 0.0 }
 0x19b   :  { %v5171_v48 = vadd.f32 %v1579_v41, %v4969_v13  ;;  %v1588_v19 = vsel %vm1056_vm2, %v1378_v34, 0.0  ;;  %v5180_v55 = vadd.f32 %v1138_v3, %v4915_v50  ;;  %v1561_v43 = vsel %vm1056_vm2, %v1357_v28, 0.0 }
 0x19c   :  { %v5183_v0 = vadd.f32 %v1588_v19, %v4971_v61  ;;  %v1570_v31 = vsel %vm1056_vm2, %v1364_v62, 0.0  ;;  %v5188_v13 = vadd.f32 %v1561_v43, %v4925_v39  ;;  %v1614_v41 = vadd.f32 %v1613_v46, %v5057_v42 }
 0x19d   :  { %v5191_v8 = vadd.f32 %v1570_v31, %v4927_v2  ;;  %v1623_v1 = vadd.f32 %v1622_v33, %v1405_v26  ;;  %v5194_v34 = vpop.f32.mrb[80].mxu1  ;;  %1545 = vadd.xlane.f32.xlu1 %v1544_v45  ;;  %v5196_v50 = vpop.f32.mrb[80].mxu0  ;;  %v5199_v61 = vadd.f32 %v1199_v27, %v5129_v63  ;;  %v5202_v3 = vadd.f32 %v1208_v30, %v5156_v54 }
 0x19e   :  { %6836 = vst [vmem:[#allocation166_spill] sm:$0xff] %v5196_v50  ;;  %v1631_v39 = vadd.f32 %v4649_v7, %v1411_v6  ;;  %v1640_v28 = vadd.f32 %v4663_v35, %v1418_v18  ;;  %v1399_v2 = vmul.f32 %v5194_v34, %v5194_v34  ;;  %v1217_v42 = vadd.f32 %v4695_v20, %v5196_v50  ;;  %v5212_v26 = vpop.f32.mrb[81].mxu1  ;;  %v5215_v46 = vpop.f32.mrb[81].mxu0 }
 0x19f   :  { %v1425_v45 = vmul.f32 %v5196_v50, %v5196_v50  ;;  %6837 = vst [vmem:[#allocation167_spill] sm:$0xff] %v5212_v26  ;;  %1095 = vadd.xlane.f32.xlu0 %v5086_v21  ;;  %6838 = vst [vmem:[#allocation168_spill] sm:$0xff] %v5215_v46  ;;  %v1183_v7 = vsel %vm1056_vm2, %v5194_v34, 0.0  ;;  %v1385_v35 = vmul.f32 %v5212_v26, %v5212_v26  ;;  %v5223_v27 = vpop.f32.mrb[82].mxu0  ;;  %v5225_v20 = vpop.f32.mrb[82].mxu1  ;;  %v1165_v21 = vsel %vm1056_vm2, %v5212_v26, 0.0 }
 0x1a0   :  { %v1426_v33 = vmul.f32 %v5215_v46, %v5215_v46  ;;  %6839 = vst [vmem:[#allocation169_spill] sm:$0xff] %v5223_v27  ;;  %v5228_v6 = vadd.f32 %v1183_v7, %v5109_v49  ;;  %v1226_v30 = vadd.f32 %v4717_v25, %v5223_v27  ;;  %v1432_v18 = vmul.f32 %v5223_v27, %v5223_v27  ;;  %v5238_v62 = vpop.f32.mrb[83].mxu1  ;;  %v5240_v19 = vpop.f32.mrb[83].mxu0 }
 0x1a1   :  { %v1406_v47 = vmul.f32 %v5225_v20, %v5225_v20  ;;  %v1192_v49 = vsel %vm1056_vm2, %v5225_v20, 0.0  ;;  %v1392_v43 = vmul.f32 %v5238_v62, %v5238_v62  ;;  %1104 = vadd.xlane.f32.xlu1 %v5092_v40  ;;  %v1433_v25 = vmul.f32 %v5240_v19, %v5240_v19 }
 0x1a2   :  { %v5250_v31 = vadd.f32 %v1192_v49, %v5106_v17  ;;  %v1615_v7 = vsel %vm1056_vm2, %v1399_v2, 0.0  ;;  %v5257_v50 = vadd.f32 %v1165_v21, %v5026_v44  ;;  %v1174_v54 = vsel %vm1056_vm2, %v5238_v62, 0.0 }
 0x1a3   :  { %1554 = vadd.xlane.f32.xlu0 %v5095_v23  ;;  %v5254_v63 = vadd.f32 %v1615_v7, %v1614_v41  ;;  %v1624_v40 = vsel %vm1056_vm2, %v1406_v47, 0.0  ;;  %v5263_v27 = vadd.f32 %v1174_v54, %v5029_v14  ;;  %v1597_v17 = vsel %vm1056_vm2, %v1385_v35, 0.0 }
 0x1a4   :  { %v5265_v26 = vadd.f32 %v1624_v40, %v1623_v1  ;;  %v1606_v2 = vsel %vm1056_vm2, %v1392_v43, 0.0  ;;  %v5270_v23 = vadd.f32 %v1597_v17, %v5117_v36  ;;  %v1227_v41 = vadd.f32 %v1226_v30, %v5240_v19 }
 0x1a5   :  { %v5273_v44 = vadd.f32 %v1606_v2, %v5119_v9  ;;  %v1218_v21 = vadd.f32 %v1217_v42, %v5215_v46  ;;  %v5277_v47 = vpop.f32.mrb[84].mxu1  ;;  %1527 = vadd.xlane.f32.xlu1 %v5100_v15  ;;  %v5280_v14 = vpop.f32.mrb[84].mxu0  ;;  %v1649_v54 = vadd.f32 %v4713_v4, %v1425_v45  ;;  %v1658_v1 = vadd.f32 %v4727_v5, %v1432_v18 }
 0x1a6   :  { %6840 = vst [vmem:[#allocation170_spill] sm:$0xff] %v5277_v47  ;;  %6841 = vst [vmem:[#allocation171_spill] sm:$0xff] %v5280_v14  ;;  %v1632_v36 = vadd.f32 %v1631_v39, %v5137_v12  ;;  %v1641_v35 = vadd.f32 %v1640_v28, %v5164_v59  ;;  %v1427_v9 = vmul.f32 %v5277_v47, %v5277_v47  ;;  %v5292_v15 = vpop.f32.mrb[85].mxu1  ;;  %v5295_v4 = vpop.f32.mrb[85].mxu0  ;;  %v1219_v5 = vsel %vm1056_vm2, %v5277_v47, 0.0 }
 0x1a7   :  { %v1235_v42 = vadd.f32 %v4759_v11, %v5280_v14  ;;  %v1439_v30 = vmul.f32 %v5280_v14, %v5280_v14  ;;  %6842 = vst [vmem:[#allocation172_spill] sm:$0xff] %v5292_v15  ;;  %1536 = vadd.xlane.f32.xlu0 %v5103_v29  ;;  %6843 = vst [vmem:[#allocation173_spill] sm:$0xff] %v5295_v4  ;;  %v1413_v12 = vmul.f32 %v5292_v15, %v5292_v15  ;;  %v5303_v39 = vpop.f32.mrb[86].mxu0  ;;  %v5305_v11 = vpop.f32.mrb[86].mxu1 }
 0x1a8   :  { %v1440_v59 = vmul.f32 %v5295_v4, %v5295_v4  ;;  %6844 = vst [vmem:[#allocation174_spill] sm:$0xff] %v5303_v39  ;;  %v5307_v28 = vadd.f32 %v1219_v5, %v1218_v21  ;;  %v1650_v45 = vadd.f32 %v1649_v54, %v1426_v33  ;;  %v1244_v29 = vadd.f32 %v4781_v22, %v5303_v39  ;;  %v5315_v43 = vpop.f32.mrb[87].mxu1  ;;  %v5317_v7 = vpop.f32.mrb[87].mxu0 }
 0x1a9   :  { %v1446_v18 = vmul.f32 %v5303_v39, %v5303_v39  ;;  %v1434_v49 = vmul.f32 %v5305_v11, %v5305_v11  ;;  %6845 = vst [vmem:[#allocation175_spill] sm:$0xff] %v5317_v7  ;;  %v1228_v40 = vsel %vm1056_vm2, %v5305_v11, 0.0  ;;  %v1420_v17 = vmul.f32 %v5315_v43, %v5315_v43  ;;  %1158 = vadd.xlane.f32.xlu1 %v5167_v53 }
 0x1aa   :  { %v1447_v22 = vmul.f32 %v5317_v7, %v5317_v7  ;;  %v5326_v33 = vadd.f32 %v1228_v40, %v1227_v41  ;;  %v1651_v2 = vsel %vm1056_vm2, %v1427_v9, 0.0  ;;  %v1201_v54 = vsel %vm1056_vm2, %v5292_v15, 0.0 }
 0x1ab   :  { %1149 = vadd.xlane.f32.xlu0 %v5144_v32  ;;  %v5330_v21 = vadd.f32 %v1651_v2, %v1650_v45  ;;  %v1210_v5 = vsel %vm1056_vm2, %v5315_v43, 0.0  ;;  %v1659_v14 = vadd.f32 %v1658_v1, %v1433_v25  ;;  %v5337_v53 = vadd.f32 %v1201_v54, %v5199_v61 }
 0x1ac   :  { %v5340_v39 = vadd.f32 %v1210_v5, %v5202_v3  ;;  %v1660_v41 = vsel %vm1056_vm2, %v1434_v49, 0.0  ;;  %v1633_v9 = vsel %vm1056_vm2, %v1413_v12, 0.0  ;;  %v1642_v40 = vsel %vm1056_vm2, %v1420_v17, 0.0 }
 0x1ad   :  { %v5344_v32 = vadd.f32 %v1660_v41, %v1659_v14  ;;  %v5346_v45 = vadd.f32 %v1633_v9, %v1632_v36  ;;  %v1245_v2 = vadd.f32 %v1244_v29, %v5317_v7  ;;  %v5350_v15 = vpop.f32.mrb[88].mxu1  ;;  %1581 = vadd.xlane.f32.xlu1 %v5171_v48  ;;  %v5353_v61 = vpop.f32.mrb[88].mxu0  ;;  %v5355_v3 = vadd.f32 %v1642_v40, %v1641_v35  ;;  %v2721_v7 = vld [vmem:[#allocation2 + $0xb0] sm:$0xff] }
 0x1ae   :  { %6846 = vst [vmem:[#allocation176_spill] sm:$0xff] %v5350_v15  ;;  %6847 = vst [vmem:[#allocation177_spill] sm:$0xff] %v5353_v61  ;;  %v1236_v25 = vadd.f32 %v1235_v42, %v5295_v4  ;;  %v1667_v1 = vadd.f32 %v4777_v58, %v1439_v30  ;;  %v1676_v14 = vadd.f32 %v4791_v38, %v1446_v18  ;;  %v5366_v48 = vpop.f32.mrb[89].mxu1  ;;  %v5369_v35 = vpop.f32.mrb[89].mxu0  ;;  %v1255_v58 = vsel %vm1056_vm2, %v5350_v15, 0.0 }
 0x1af   :  { %v1455_v36 = vmul.f32 %v5350_v15, %v5350_v15  ;;  %v1253_v12 = vadd.f32 %v4823_v16, %v5353_v61  ;;  %v1453_v29 = vmul.f32 %v5353_v61, %v5353_v61  ;;  %6848 = vst [vmem:[#allocation178_spill] sm:$0xff] %v5366_v48  ;;  %1131 = vadd.xlane.f32.xlu0 %v5174_v57  ;;  %6849 = vst [vmem:[#allocation179_spill] sm:$0xff] %v5369_v35  ;;  %v5377_v30 = vpop.f32.mrb[90].mxu0  ;;  %v5379_v16 = vpop.f32.mrb[90].mxu1 }
 0x1b0   :  { %v1441_v38 = vmul.f32 %v5366_v48, %v5366_v48  ;;  %v1454_v42 = vmul.f32 %v5369_v35, %v5369_v35  ;;  %6850 = vst [vmem:[#allocation180_spill] sm:$0xff] %v5377_v30  ;;  %6851 = vst [vmem:[#allocation181_spill] sm:$0xff] %v5379_v16  ;;  %v1237_v18 = vsel %vm1056_vm2, %v5366_v48, 0.0  ;;  %v1668_v49 = vadd.f32 %v1667_v1, %v1440_v59  ;;  %v5389_v5 = vpop.f32.mrb[91].mxu1  ;;  %v5391_v41 = vpop.f32.mrb[91].mxu0 }
 0x1b1   :  { %v1262_v57 = vadd.f32 %v4845_v24, %v5377_v30  ;;  %v1460_v17 = vmul.f32 %v5377_v30, %v5377_v30  ;;  %v1462_v54 = vmul.f32 %v5379_v16, %v5379_v16  ;;  %6852 = vst [vmem:[#allocation182_spill] sm:$0xff] %v5389_v5  ;;  %6853 = vst [vmem:[#allocation183_spill] sm:$0xff] %v5391_v41  ;;  %1140 = vadd.xlane.f32.xlu1 %v5180_v55 }
 0x1b2   :  { %v5393_v9 = vadd.f32 %v1237_v18, %v1236_v25  ;;  %v1448_v40 = vmul.f32 %v5389_v5, %v5389_v5  ;;  %v1461_v24 = vmul.f32 %v5391_v41, %v5391_v41  ;;  %v1246_v59 = vsel %vm1056_vm2, %v5389_v5, 0.0 }
 0x1b3   :  { %v1669_v1 = vsel %vm1056_vm2, %v1441_v38, 0.0  ;;  %1590 = vadd.xlane.f32.xlu0 %v5183_v0  ;;  %v5404_v15 = vadd.f32 %v1246_v59, %v1245_v2  ;;  %v1254_v25 = vadd.f32 %v1253_v12, %v5369_v35  ;;  %v1263_v18 = vadd.f32 %v1262_v57, %v5391_v41  ;;  %v2720_v41 = vld [vmem:[#allocation2 + $0xa8] sm:$0xff] }
 0x1b4   :  { %v5406_v61 = vadd.f32 %v1669_v1, %v1668_v49  ;;  %v1264_v55 = vsel %vm1056_vm2, %v5379_v16, 0.0  ;;  %v1677_v48 = vadd.f32 %v1676_v14, %v1447_v22  ;;  %v1678_v4 = vsel %vm1056_vm2, %v1448_v40, 0.0 }
 0x1b5   :  { %v1685_v30 = vadd.f32 %v4841_v10, %v1453_v29  ;;  %v5414_v5 = vadd.f32 %v1255_v58, %v1254_v25  ;;  %v5416_v38 = vadd.f32 %v1264_v55, %v1263_v18  ;;  %v1687_v0 = vsel %vm1056_vm2, %v1455_v36, 0.0  ;;  %1563 = vadd.xlane.f32.xlu1 %v5188_v13  ;;  %v5421_v12 = vpop.f32.mrb[92].mxu0  ;;  %v5423_v49 = vpop.f32.mrb[92].mxu1 }
 0x1b6   :  { %v1694_v2 = vadd.f32 %v4855_v52, %v1460_v17  ;;  %6854 = vst [vmem:[#allocation184_spill] sm:$0xff] %v5421_v12  ;;  %6855 = vst [vmem:[#allocation185_spill] sm:$0xff] %v5423_v49  ;;  %v5425_v57 = vadd.f32 %v1678_v4, %v1677_v48  ;;  %v1696_v14 = vsel %vm1056_vm2, %v1462_v54, 0.0  ;;  %v1271_v10 = vadd.f32 %v4887_v60, %v5421_v12  ;;  %v5433_v52 = vpop.f32.mrb[93].mxu0  ;;  %v5435_v13 = vpop.f32.mrb[93].mxu1 }
 0x1b7   :  { %v1686_v22 = vadd.f32 %v1685_v30, %v1454_v42  ;;  %v1467_v29 = vmul.f32 %v5421_v12, %v5421_v12  ;;  %1572 = vadd.xlane.f32.xlu0 %v5191_v8  ;;  %6856 = vst [vmem:[#allocation186_spill] sm:$0xff] %v5433_v52  ;;  %6857 = vst [vmem:[#allocation187_spill] sm:$0xff] %v5435_v13  ;;  %v1468_v4 = vmul.f32 %v5433_v52, %v5433_v52  ;;  %v5439_v48 = vpop.f32.mrb[94].mxu0  ;;  %v3447_v42 = vpop.f32.mrb[94].mxu1  ;;  %v6859_v8 = vld [vmem:[#allocation144_spill] sm:$0xff] }
 0x1b8   :  { %v1695_v36 = vadd.f32 %v1694_v2, %v1461_v24  ;;  %6858 = vst [vmem:[#allocation188_spill] sm:$0xff] %v5439_v48  ;;  %v1469_v58 = vmul.f32 %v5435_v13, %v5435_v13  ;;  %v1273_v30 = vsel %vm1056_vm2, %v5435_v13, 0.0  ;;  %v1280_v17 = vadd.f32 %v6859_v8, %v5439_v48  ;;  %v5449_v40 = vpop.f32.mrb[95].mxu0  ;;  %v5451_v24 = vpop.f32.mrb[95].mxu1 }
 0x1b9   :  { %v1688_v60 = vadd.f32 %v1687_v0, %v1686_v22  ;;  %v1474_v54 = vmul.f32 %v5439_v48, %v5439_v48  ;;  %6860 = vst [vmem:[#allocation144_spill] sm:$0xff] %v5449_v40  ;;  %6861 = vst [vmem:[#allocation189_spill] sm:$0xff] %v5451_v24  ;;  %v1272_v1 = vadd.f32 %v1271_v10, %v5433_v52  ;;  %1194 = vadd.xlane.f32.xlu1 %v5250_v31  ;;  %v6862_v0 = vld [vmem:[#allocation143_spill] sm:$0xff] }
 0x1ba   :  { %v1697_v59 = vadd.f32 %v1696_v14, %v1695_v36  ;;  %v1475_v25 = vmul.f32 %v5449_v40, %v5449_v40  ;;  %v1282_v18 = vsel %vm1056_vm2, %v5451_v24, 0.0  ;;  %v1476_v55 = vmul.f32 %v5451_v24, %v5451_v24  ;;  %v6863_v36 = vld [vmem:[#allocation145_spill] sm:$0xff] }
 0x1bb   :  { %v1703_v2 = vadd.f32 %v6862_v0, %v1467_v29  ;;  %1185 = vadd.xlane.f32.xlu0 %v5228_v6  ;;  %v1281_v22 = vadd.f32 %v1280_v17, %v5449_v40  ;;  %v1274_v14 = vadd.f32 %v1273_v30, %v1272_v1  ;;  %v1705_v10 = vsel %vm1056_vm2, %v1469_v58, 0.0  ;;  %v6865_v17 = vld [vmem:[#allocation151_spill] sm:$0xff]  ;;  %v6895_v40 = vld [vmem:[#allocation88_spill] sm:$0xff] }
 0x1bc   :  { %v1712_v31 = vadd.f32 %v6863_v36, %v1474_v54  ;;  %v1714_v8 = vsel %vm1056_vm2, %v1476_v55, 0.0  ;;  %v1483_v52 = vmul.f32 %v5423_v49, %v5423_v49 }
 0x1bd   :  { %v1704_v42 = vadd.f32 %v1703_v2, %v1468_v4  ;;  %v1283_v48 = vadd.f32 %v1282_v18, %v1281_v22  ;;  %1617 = vadd.xlane.f32.xlu1 %v5254_v63  ;;  %v5470_v29 = vpop.f32.mrb[96].mxu0  ;;  %v1291_v63 = vsel %vm1056_vm2, %v5423_v49, 0.0  ;;  %v6867_v18 = vld [vmem:[#allocation153_spill] sm:$0xff] }
 0x1be   :  { %v1713_v13 = vadd.f32 %v1712_v31, %v1475_v25  ;;  %6864 = vst [vmem:[#allocation143_spill] sm:$0xff] %v5470_v29  ;;  %v1289_v30 = vadd.f32 %v6865_v17, %v5470_v29  ;;  %v1481_v58 = vmul.f32 %v5470_v29, %v5470_v29  ;;  %v5477_v4 = vpop.f32.mrb[97].mxu0  ;;  %v1723_v22 = vsel %vm1056_vm2, %v1483_v52, 0.0 }
 0x1bf   :  { %v1706_v6 = vadd.f32 %v1705_v10, %v1704_v42  ;;  %1167 = vadd.xlane.f32.xlu0 %v5257_v50  ;;  %6866 = vst [vmem:[#allocation145_spill] sm:$0xff] %v5477_v4  ;;  %v1482_v1 = vmul.f32 %v5477_v4, %v5477_v4  ;;  %v904_v25 = vpop.f32.mrb[98].mxu0 }
 0x1c0   :  { %v1715_v54 = vadd.f32 %v1714_v8, %v1713_v13  ;;  %v1721_v55 = vadd.f32 %v6867_v18, %v1481_v58  ;;  %v1290_v0 = vadd.f32 %v1289_v30, %v5477_v4  ;;  %v905_v2 = vpop.f32.mrb[99].mxu0 }
 0x1c1   :  { %1176 = vadd.xlane.f32.xlu1 %v5263_v27 }
 0x1c2   :  { %v1722_v50 = vadd.f32 %v1721_v55, %v1482_v1  ;;  %v1292_v13 = vadd.f32 %v1291_v63, %v1290_v0 }
 0x1c3   :  { %1626 = vadd.xlane.f32.xlu0 %v5265_v26 }
 0x1c4   :  { %v1724_v10 = vadd.f32 %v1723_v22, %v1722_v50 }
 0x1c5   :  { %1599 = vadd.xlane.f32.xlu1 %v5270_v23 }
 0x1c7   :  { %1608 = vadd.xlane.f32.xlu0 %v5273_v44 }
 0x1c9   :  { %1230 = vadd.xlane.f32.xlu1 %v5326_v33 }
 0x1cb   :  { %1221 = vadd.xlane.f32.xlu0 %v5307_v28 }
 0x1cd   :  { %1653 = vadd.xlane.f32.xlu1 %v5330_v21 }
 0x1cf   :  { %1203 = vadd.xlane.f32.xlu0 %v5337_v53 }
 0x1d1   :  { %1212 = vadd.xlane.f32.xlu1 %v5340_v39 }
 0x1d3   :  { %1662 = vadd.xlane.f32.xlu0 %v5344_v32 }
 0x1d5   :  { %1635 = vadd.xlane.f32.xlu1 %v5346_v45 }
 0x1d7   :  { %1644 = vadd.xlane.f32.xlu0 %v5355_v3 }
 0x1d9   :  { %1248 = vadd.xlane.f32.xlu1 %v5404_v15 }
 0x1db   :  { %1239 = vadd.xlane.f32.xlu0 %v5393_v9 }
 0x1dd   :  { %1671 = vadd.xlane.f32.xlu1 %v5406_v61 }
 0x1df   :  { %1257 = vadd.xlane.f32.xlu0 %v5414_v5 }
 0x1e1   :  { %1266 = vadd.xlane.f32.xlu1 %v5416_v38 }
 0x1e3   :  { %1680 = vadd.xlane.f32.xlu0 %v5425_v57 }
 0x1e5   :  { %1689 = vadd.xlane.f32.xlu1 %v1688_v60 }
 0x1e7   :  { %1698 = vadd.xlane.f32.xlu0 %v1697_v59 }
 0x1e9   :  { %1284 = vadd.xlane.f32.xlu1 %v1283_v48 }
 0x1eb   :  { %1275 = vadd.xlane.f32.xlu0 %v1274_v14 }
 0x1ed   :  { %1707 = vadd.xlane.f32.xlu1 %v1706_v6 }
 0x1ef   :  { %1716 = vadd.xlane.f32.xlu0 %v1715_v54 }
 0x1f1   :  { %1725 = vadd.xlane.f32.xlu1 %v1724_v10 }
 0x1f3   :  { %1293 = vadd.xlane.f32.xlu0 %v1292_v13 }
 0x216   :  { %v1078_v26 = vpop.xlane.xlu1 %1077 }
 0x217   :  { %v1060_v27 = vpop.xlane.xlu0 %1059  ;;  %v5504_v44 = vmul.f32 0.0012755102, %v1078_v26 }
 0x218   :  { %v5510_v21 = vmul.f32 0.0012755102, %v1060_v27 }
 0x219   :  { %v1783_v33 = vmul.f32 %v5504_v44, %v5504_v44 }
 0x21a   :  { %v1087_v23 = vpop.xlane.xlu1 %1086  ;;  %v1781_v57 = vmul.f32 %v5510_v21, %v5510_v21 }
 0x21b   :  { %v1069_v15 = vpop.xlane.xlu0 %1068  ;;  %v5506_v39 = vmul.f32 0.0012755102, %v1087_v23  ;;  %v1918_v23 = vld [vmem:[%s6477_s3 + $0x10] sm:$0xff] }
 0x21c   :  { %v5514_v61 = vmul.f32 0.0012755102, %v1069_v15 }
 0x21d   :  { %v1784_v45 = vmul.f32 %v5506_v39, %v5506_v39 }
 0x21e   :  { %v1510_v28 = vpop.xlane.xlu1 %1509  ;;  %v1782_v59 = vmul.f32 %v5514_v61, %v5514_v61 }
 0x21f   :  { %v1756_v53 = vmul.f32 0.0012755102, %v1510_v28  ;;  %v1519_v32 = vpop.xlane.xlu0 %1518 }
 0x220   :  { %v1757_v3 = vmul.f32 0.0012755102, %v1519_v32 }
 0x221   :  { %v1810_v5 = vsub.f32 %v1756_v53, %v1783_v33 }
 0x222   :  { %v1811_v9 = vsub.f32 %v1757_v3, %v1784_v45  ;;  %v1492_v38 = vpop.xlane.xlu1 %1491 }
 0x223   :  { %v1837_v52 = vmax.f32 %v1810_v5, 0.0  ;;  %v1754_v48 = vmul.f32 0.0012755102, %v1492_v38  ;;  %v1501_v60 = vpop.xlane.xlu0 %1500 }
 0x224   :  { %v1838_v14 = vmax.f32 %v1811_v9, 0.0  ;;  %v1755_v36 = vmul.f32 0.0012755102, %v1501_v60  ;;  %v1919_v9 = vld [vmem:[%s6477_s3 + $0x18] sm:$0xff]  ;;  %v1916_v60 = vld [vmem:[%s6477_s3] sm:$0xff] }
 0x225   :  { %v1864_v31 = vadd.f32 1e-05, %v1837_v52  ;;  %v1808_v42 = vsub.f32 %v1754_v48, %v1781_v57 }
 0x226   :  { %v1865_v8 = vadd.f32 1e-05, %v1838_v14  ;;  %v1809_v6 = vsub.f32 %v1755_v36, %v1782_v59  ;;  %v1123_v17 = vpop.xlane.xlu1 %1122 }
 0x227   :  { %3527 = vrsqrt.f32 %v1864_v31  ;;  %v1835_v30 = vmax.f32 %v1808_v42, 0.0  ;;  %v1114_v58 = vpop.xlane.xlu0 %1113  ;;  %v5524_v22 = vmul.f32 0.0012755102, %v1123_v17 }
 0x228   :  { %3529 = vrsqrt.f32 %v1865_v8  ;;  %v1836_v54 = vmax.f32 %v1809_v6, 0.0  ;;  %v5520_v1 = vmul.f32 0.0012755102, %v1114_v58 }
 0x229   :  { %v1862_v63 = vadd.f32 1e-05, %v1835_v30  ;;  %v1788_v33 = vmul.f32 %v5524_v22, %v5524_v22 }
 0x22a   :  { %v1863_v25 = vadd.f32 1e-05, %v1836_v54  ;;  %v1787_v18 = vmul.f32 %v5520_v1, %v5520_v1  ;;  %v1546_v55 = vpop.xlane.xlu1 %1545 }
 0x22b   :  { %3531 = vrsqrt.f32 %v1862_v63  ;;  %v1760_v0 = vmul.f32 0.0012755102, %v1546_v55 }
 0x22c   :  { %v1096_v2 = vpop.xlane.xlu0 %1095  ;;  %3533 = vrsqrt.f32 %v1863_v25  ;;  %v1917_v25 = vld [vmem:[%s6477_s3 + $0x8] sm:$0xff] }
 0x22d   :  { %v1814_v50 = vsub.f32 %v1760_v0, %v1787_v18  ;;  %v5526_v13 = vmul.f32 0.0012755102, %v1096_v2  ;;  %v1972_v18 = vld [vmem:[%s6478_s4 + $0x10] sm:$0xff] }
 0x22e   :  { %v1105_v10 = vpop.xlane.xlu1 %1104 }
 0x22f   :  { %v1841_v26 = vmax.f32 %v1814_v50, 0.0  ;;  %v1785_v45 = vmul.f32 %v5526_v13, %v5526_v13  ;;  %v5538_v38 = vmul.f32 0.0012755102, %v1105_v10 }
 0x230   :  { %v1555_v27 = vpop.xlane.xlu0 %1554 }
 0x231   :  { %v1761_v15 = vmul.f32 0.0012755102, %v1555_v27  ;;  %v3528_v28 = vpop.eup %3527  ;;  %v1868_v53 = vadd.f32 1e-05, %v1841_v26  ;;  %v1786_v30 = vmul.f32 %v5538_v38, %v5538_v38 }
 0x232   :  { %v3530_v32 = vpop.eup %3529  ;;  %v1528_v3 = vpop.xlane.xlu1 %1527  ;;  %v1945_v5 = vmul.f32 %v3528_v28, %v1918_v23  ;;  %v1973_v23 = vld [vmem:[%s6478_s4 + $0x18] sm:$0xff] }
 0x233   :  { %3535 = vrsqrt.f32 %v1868_v53  ;;  %v1815_v57 = vsub.f32 %v1761_v15, %v1788_v33  ;;  %v1758_v52 = vmul.f32 0.0012755102, %v1528_v3  ;;  %v1946_v31 = vmul.f32 %v3530_v32, %v1919_v9  ;;  %v1922_v32 = vld [vmem:[%s6477_s3 + $0x30] sm:$0xff] }
 0x234   :  { %v1537_v48 = vpop.xlane.xlu0 %1536  ;;  %2063 = vperm.xlu1 %3464, %v1945_v5   ;;  %v1999_v6 = vmul.f32 %v1945_v5, %v5504_v44 }
 0x235   :  { %v3532_v59 = vpop.eup %3531  ;;  %v1812_v14 = vsub.f32 %v1758_v52, %v1785_v45  ;;  %v1759_v36 = vmul.f32 0.0012755102, %v1537_v48  ;;  %v1842_v58 = vmax.f32 %v1815_v57, 0.0  ;;  %v2000_v2 = vmul.f32 %v1946_v31, %v5506_v39  ;;  %v1970_v39 = vld [vmem:[%s6478_s4] sm:$0xff] }
 0x236   :  { %v1159_v42 = vpop.xlane.xlu1 %1158  ;;  %v1943_v8 = vmul.f32 %v3532_v59, %v1916_v60  ;;  %v3534_v17 = vpop.eup %3533  ;;  %v2026_v27 = vsub.f32 %v1972_v18, %v1999_v6 }
 0x237   :  { %v1839_v54 = vmax.f32 %v1812_v14, 0.0  ;;  %v1813_v0 = vsub.f32 %v1759_v36, %v1786_v30  ;;  %v1944_v26 = vmul.f32 %v3534_v17, %v1917_v25  ;;  %v1869_v28 = vadd.f32 1e-05, %v1842_v58 }
 0x238   :  { %v1150_v63 = vpop.xlane.xlu0 %1149  ;;  %2068 = vperm.xlu1 %3464, %v1946_v31   ;;  %2053 = vperm.xlu0 %3465, %v1943_v8   ;;  %v1997_v15 = vmul.f32 %v1943_v8, %v5510_v21  ;;  %v5567_v45 = vmul.f32 0.0012755102, %v1159_v42  ;;  %v2027_v57 = vsub.f32 %v1973_v23, %v2000_v2  ;;  %v1971_v31 = vld [vmem:[%s6478_s4 + $0x8] sm:$0xff]  ;;  %v1976_v42 = vld [vmem:[%s6478_s4 + $0x30] sm:$0xff] }
 0x239   :  { %v5552_v55 = vmul.f32 0.0012755102, %v1150_v63  ;;  %v1866_v44 = vadd.f32 1e-05, %v1839_v54  ;;  %v1840_v5 = vmax.f32 %v1813_v0, 0.0  ;;  %v1998_v48 = vmul.f32 %v1944_v26, %v5514_v61 }
 0x23a   :  { %v1582_v10 = vpop.xlane.xlu1 %1581  ;;  %v2024_v52 = vsub.f32 %v1970_v39, %v1997_v15  ;;  %v1792_v8 = vmul.f32 %v5567_v45, %v5567_v45 }
 0x23b   :  { %v1791_v50 = vmul.f32 %v5552_v55, %v5552_v55  ;;  %3537 = vrsqrt.f32 %v1866_v44  ;;  %v1764_v33 = vmul.f32 0.0012755102, %v1582_v10  ;;  %v1867_v30 = vadd.f32 1e-05, %v1840_v5 }
 0x23c   :  { %v1132_v53 = vpop.xlane.xlu0 %1131  ;;  %2058 = vperm.xlu1 %3464, %v1944_v26   ;;  %2387 = vperm.xlu0 %3465, %v2026_v27   ;;  %3539 = vrsqrt.f32 %v1869_v28  ;;  %v2025_v25 = vsub.f32 %v1971_v31, %v1998_v48 }
 0x23d   :  { %v3536_v3 = vpop.eup %3535  ;;  %v1818_v9 = vsub.f32 %v1764_v33, %v1791_v50  ;;  %v5570_v14 = vmul.f32 0.0012755102, %v1132_v53  ;;  %v1920_v50 = vld [vmem:[%s6477_s3 + $0x20] sm:$0xff]  ;;  %3541 = vrsqrt.f32 %v1867_v30 }
 0x23e   :  { %v1141_v21 = vpop.xlane.xlu1 %1140  ;;  %v1949_v60 = vmul.f32 %v3536_v3, %v1922_v32  ;;  %v1974_v3 = vld [vmem:[%s6478_s4 + $0x20] sm:$0xff] }
 0x23f   :  { %v1845_v59 = vmax.f32 %v1818_v9, 0.0  ;;  %v5580_v6 = vmul.f32 0.0012755102, %v1141_v21  ;;  %v1789_v44 = vmul.f32 %v5570_v14, %v5570_v14 }
 0x240   :  { %v1591_v36 = vpop.xlane.xlu0 %1590  ;;  %2392 = vperm.xlu1 %3464, %v2027_v57   ;;  %2377 = vperm.xlu0 %3465, %v2024_v52   ;;  %v2003_v17 = vmul.f32 %v1949_v60, %v5520_v1 }
 0x241   :  { %v1765_v61 = vmul.f32 0.0012755102, %v1591_v36  ;;  %v1872_v58 = vadd.f32 1e-05, %v1845_v59  ;;  %v1790_v10 = vmul.f32 %v5580_v6, %v5580_v6 }
 0x242   :  { %v1564_v63 = vpop.xlane.xlu1 %1563  ;;  %v2030_v18 = vsub.f32 %v1976_v42, %v2003_v17  ;;  %v1923_v42 = vld [vmem:[%s6477_s3 + $0x38] sm:$0xff] }
 0x243   :  { %v1819_v54 = vsub.f32 %v1765_v61, %v1792_v8  ;;  %v1762_v0 = vmul.f32 0.0012755102, %v1564_v63  ;;  %3543 = vrsqrt.f32 %v1872_v58 }
 0x244   :  { %v1573_v2 = vpop.xlane.xlu0 %1572  ;;  %2382 = vperm.xlu1 %3464, %v2025_v25   ;;  %2407 = vperm.xlu0 %3465, %v2030_v18   ;;  %v1921_v18 = vld [vmem:[%s6477_s3 + $0x28] sm:$0xff] }
 0x245   :  { %v1846_v26 = vmax.f32 %v1819_v54, 0.0  ;;  %v1763_v1 = vmul.f32 0.0012755102, %v1573_v2  ;;  %v3538_v27 = vpop.eup %3537  ;;  %v1816_v23 = vsub.f32 %v1762_v0, %v1789_v44 }
 0x246   :  { %v1195_v33 = vpop.xlane.xlu1 %1194  ;;  %v1947_v53 = vmul.f32 %v3538_v27, %v1920_v50  ;;  %v3540_v57 = vpop.eup %3539 }
 0x247   :  { %v1873_v15 = vadd.f32 1e-05, %v1846_v26  ;;  %v1817_v28 = vsub.f32 %v1763_v1, %v1790_v10  ;;  %v1843_v39 = vmax.f32 %v1816_v23, 0.0  ;;  %v5601_v17 = vmul.f32 0.0012755102, %v1195_v33  ;;  %v3542_v58 = vpop.eup %3541  ;;  %v1927_v10 = vld [vmem:[%s6477_s3 + $0x58] sm:$0xff] }
 0x248   :  { %v1186_v32 = vpop.xlane.xlu0 %1185  ;;  %2083 = vperm.xlu1 %3464, %v1949_v60   ;;  %v2001_v21 = vmul.f32 %v1947_v53, %v5526_v13  ;;  %v1950_v60 = vmul.f32 %v3540_v57, %v1923_v42  ;;  %v1926_v26 = vld [vmem:[%s6477_s3 + $0x50] sm:$0xff]  ;;  %v1948_v33 = vmul.f32 %v3542_v58, %v1921_v18  ;;  %v1975_v18 = vld [vmem:[%s6478_s4 + $0x28] sm:$0xff] }
 0x249   :  { %3545 = vrsqrt.f32 %v1873_v15  ;;  %v1844_v5 = vmax.f32 %v1817_v28, 0.0  ;;  %v5593_v9 = vmul.f32 0.0012755102, %v1186_v32  ;;  %v1870_v52 = vadd.f32 1e-05, %v1843_v39 }
 0x24a   :  { %v1618_v36 = vpop.xlane.xlu1 %1617  ;;  %v2028_v31 = vsub.f32 %v1974_v3, %v2001_v21  ;;  %v1796_v0 = vmul.f32 %v5601_v17, %v5601_v17  ;;  %v2004_v1 = vmul.f32 %v1950_v60, %v5524_v22 }
 0x24b   :  { %v1871_v48 = vadd.f32 1e-05, %v1844_v5  ;;  %v1795_v59 = vmul.f32 %v5593_v9, %v5593_v9  ;;  %3547 = vrsqrt.f32 %v1870_v52  ;;  %v1768_v8 = vmul.f32 0.0012755102, %v1618_v36 }
 0x24c   :  { %v1168_v61 = vpop.xlane.xlu0 %1167  ;;  %2073 = vperm.xlu1 %3464, %v1947_v53   ;;  %2397 = vperm.xlu0 %3465, %v2028_v31   ;;  %v1977_v53 = vld [vmem:[%s6478_s4 + $0x38] sm:$0xff] }
 0x24d   :  { %3549 = vrsqrt.f32 %v1871_v48  ;;  %v1822_v13 = vsub.f32 %v1768_v8, %v1795_v59  ;;  %v5603_v63 = vmul.f32 0.0012755102, %v1168_v61  ;;  %v3544_v44 = vpop.eup %3543  ;;  %v1925_v48 = vld [vmem:[%s6477_s3 + $0x48] sm:$0xff]  ;;  %v1924_v59 = vld [vmem:[%s6477_s3 + $0x40] sm:$0xff]  ;;  %v2031_v42 = vsub.f32 %v1977_v53, %v2004_v1 }
 0x24e   :  { %v1177_v30 = vpop.xlane.xlu1 %1176  ;;  %v1953_v21 = vmul.f32 %v3544_v44, %v1926_v26 }
 0x24f   :  { %v1849_v54 = vmax.f32 %v1822_v13, 0.0  ;;  %v5610_v2 = vmul.f32 0.0012755102, %v1177_v30  ;;  %v1793_v39 = vmul.f32 %v5603_v63, %v5603_v63  ;;  %v2002_v30 = vmul.f32 %v1948_v33, %v5538_v38  ;;  %v1980_v38 = vld [vmem:[%s6478_s4 + $0x50] sm:$0xff] }
 0x250   :  { %v1627_v25 = vpop.xlane.xlu0 %1626  ;;  %2088 = vperm.xlu1 %3464, %v1950_v60   ;;  %v2007_v44 = vmul.f32 %v1953_v21, %v5552_v55 }
 0x251   :  { %v1769_v50 = vmul.f32 0.0012755102, %v1627_v25  ;;  %v1876_v23 = vadd.f32 1e-05, %v1849_v54  ;;  %v1794_v57 = vmul.f32 %v5610_v2, %v5610_v2 }
 0x252   :  { %v1600_v28 = vpop.xlane.xlu1 %1599 }
 0x253   :  { %v3546_v27 = vpop.eup %3545  ;;  %v1823_v15 = vsub.f32 %v1769_v50, %v1796_v0  ;;  %v1766_v32 = vmul.f32 0.0012755102, %v1600_v28  ;;  %3551 = vrsqrt.f32 %v1876_v23 }
 0x254   :  { %v1609_v3 = vpop.xlane.xlu0 %1608  ;;  %v1954_v5 = vmul.f32 %v3546_v27, %v1927_v10  ;;  %2078 = vperm.xlu1 %3464, %v1948_v33   ;;  %v2034_v33 = vsub.f32 %v1980_v38, %v2007_v44 }
 0x255   :  { %v1850_v22 = vmax.f32 %v1823_v15, 0.0  ;;  %v1767_v52 = vmul.f32 0.0012755102, %v1609_v3  ;;  %v3548_v36 = vpop.eup %3547  ;;  %v1820_v31 = vsub.f32 %v1766_v32, %v1793_v39  ;;  %v2029_v15 = vsub.f32 %v1975_v18, %v2002_v30  ;;  %v1978_v32 = vld [vmem:[%s6478_s4 + $0x40] sm:$0xff]  ;;  %v1981_v18 = vld [vmem:[%s6478_s4 + $0x58] sm:$0xff] }
 0x256   :  { %2108 = vperm.xlu0 %3465, %v1954_v5   ;;  %v1231_v60 = vpop.xlane.xlu1 %1230  ;;  %v1951_v0 = vmul.f32 %v3548_v36, %v1924_v59 }
 0x257   :  { %v3550_v8 = vpop.eup %3549  ;;  %v1877_v61 = vadd.f32 1e-05, %v1850_v22  ;;  %v1821_v13 = vsub.f32 %v1767_v52, %v1794_v57  ;;  %v1847_v58 = vmax.f32 %v1820_v31, 0.0  ;;  %v5648_v39 = vmul.f32 0.0012755102, %v1231_v60 }
 0x258   :  { %v1222_v54 = vpop.xlane.xlu0 %1221  ;;  %v5633_v25 = vmul.f32 %v3550_v8, %v1925_v48  ;;  %2412 = vperm.xlu1 %3464, %v2031_v42   ;;  %v2005_v53 = vmul.f32 %v1951_v0, %v5570_v14  ;;  %v1931_v8 = vld [vmem:[%s6477_s3 + $0x78] sm:$0xff] }
 0x259   :  { %3553 = vrsqrt.f32 %v1877_v61  ;;  %v1848_v50 = vmax.f32 %v1821_v13, 0.0  ;;  %v5639_v10 = vmul.f32 0.0012755102, %v1222_v54  ;;  %v1874_v26 = vadd.f32 1e-05, %v1847_v58  ;;  %v1930_v61 = vld [vmem:[%s6477_s3 + $0x70] sm:$0xff] }
 0x25a   :  { %2098 = vperm.xlu0 %3465, %v5633_v25   ;;  %v1654_v23 = vpop.xlane.xlu1 %1653  ;;  %v2032_v59 = vsub.f32 %v1978_v32, %v2005_v53  ;;  %v1800_v14 = vmul.f32 %v5648_v39, %v5648_v39  ;;  %v2008_v13 = vmul.f32 %v1954_v5, %v5567_v45  ;;  %v1929_v5 = vld [vmem:[%s6477_s3 + $0x68] sm:$0xff] }
 0x25b   :  { %v1875_v1 = vadd.f32 1e-05, %v1848_v50  ;;  %v1799_v27 = vmul.f32 %v5639_v10, %v5639_v10  ;;  %3555 = vrsqrt.f32 %v1874_v26  ;;  %v1772_v55 = vmul.f32 0.0012755102, %v1654_v23  ;;  %v1928_v23 = vld [vmem:[%s6477_s3 + $0x60] sm:$0xff] }
 0x25c   :  { %v1204_v28 = vpop.xlane.xlu0 %1203  ;;  %2402 = vperm.xlu1 %3464, %v2029_v15  }
 0x25d   :  { %3557 = vrsqrt.f32 %v1875_v1  ;;  %v1826_v3 = vsub.f32 %v1772_v55, %v1799_v27  ;;  %v5653_v52 = vmul.f32 0.0012755102, %v1204_v28  ;;  %v3552_v36 = vpop.eup %3551  ;;  %v2035_v28 = vsub.f32 %v1981_v18, %v2008_v13 }
 0x25e   :  { %2427 = vperm.xlu0 %3465, %v2034_v33   ;;  %v1213_v57 = vpop.xlane.xlu1 %1212  ;;  %v1957_v26 = vmul.f32 %v3552_v36, %v1930_v61 }
 0x25f   :  { %v1853_v22 = vmax.f32 %v1826_v3, 0.0  ;;  %v5657_v31 = vmul.f32 0.0012755102, %v1213_v57 }
 0x260   :  { %v1663_v48 = vpop.xlane.xlu0 %1662  ;;  %2103 = vperm.xlu1 %3464, %v1953_v21   ;;  %v1797_v21 = vmul.f32 %v5653_v52, %v5653_v52  ;;  %v2011_v36 = vmul.f32 %v1957_v26, %v5593_v9 }
 0x261   :  { %v1773_v42 = vmul.f32 0.0012755102, %v1663_v48  ;;  %v1880_v30 = vadd.f32 1e-05, %v1853_v22  ;;  %v1798_v1 = vmul.f32 %v5657_v31, %v5657_v31 }
 0x262   :  { %2417 = vperm.xlu0 %3465, %v2032_v59   ;;  %v1636_v54 = vpop.xlane.xlu1 %1635  ;;  %v1979_v59 = vld [vmem:[%s6478_s4 + $0x48] sm:$0xff] }
 0x263   :  { %v3554_v60 = vpop.eup %3553  ;;  %v1827_v58 = vsub.f32 %v1773_v42, %v1800_v14  ;;  %v1770_v44 = vmul.f32 0.0012755102, %v1636_v54  ;;  %3559 = vrsqrt.f32 %v1880_v30 }
 0x264   :  { %v1645_v50 = vpop.xlane.xlu0 %1644  ;;  %v1958_v38 = vmul.f32 %v3554_v60, %v1931_v8  ;;  %2093 = vperm.xlu1 %3464, %v1951_v0   ;;  %v2006_v0 = vmul.f32 %v5633_v25, %v5580_v6  ;;  %v1984_v6 = vld [vmem:[%s6478_s4 + $0x70] sm:$0xff] }
 0x265   :  { %v1854_v27 = vmax.f32 %v1827_v58, 0.0  ;;  %v1771_v45 = vmul.f32 0.0012755102, %v1645_v50  ;;  %v3556_v15 = vpop.eup %3555  ;;  %v1824_v55 = vsub.f32 %v1770_v44, %v1797_v21  ;;  %v2038_v54 = vsub.f32 %v1984_v6, %v2011_v36  ;;  %v1982_v44 = vld [vmem:[%s6478_s4 + $0x60] sm:$0xff] }
 0x266   :  { %2128 = vperm.xlu0 %3465, %v1958_v38   ;;  %v1249_v3 = vpop.xlane.xlu1 %1248  ;;  %v1955_v14 = vmul.f32 %v3556_v15, %v1928_v23  ;;  %v2033_v30 = vsub.f32 %v1979_v59, %v2006_v0  ;;  %v1985_v59 = vld [vmem:[%s6478_s4 + $0x78] sm:$0xff] }
 0x267   :  { %v3558_v33 = vpop.eup %3557  ;;  %v1881_v53 = vadd.f32 1e-05, %v1854_v27  ;;  %v1825_v32 = vsub.f32 %v1771_v45, %v1798_v1  ;;  %v1851_v57 = vmax.f32 %v1824_v55, 0.0  ;;  %v5696_v21 = vmul.f32 0.0012755102, %v1249_v3 }
 0x268   :  { %v1240_v22 = vpop.xlane.xlu0 %1239  ;;  %v5681_v48 = vmul.f32 %v3558_v33, %v1929_v5  ;;  %2432 = vperm.xlu1 %3464, %v2035_v28   ;;  %v2009_v18 = vmul.f32 %v1955_v14, %v5603_v63  ;;  %v1935_v33 = vld [vmem:[%s6477_s3 + $0x98] sm:$0xff] }
 0x269   :  { %3561 = vrsqrt.f32 %v1881_v53  ;;  %v1852_v42 = vmax.f32 %v1825_v32, 0.0  ;;  %v5687_v8 = vmul.f32 0.0012755102, %v1240_v22  ;;  %v1878_v25 = vadd.f32 1e-05, %v1851_v57  ;;  %v1934_v53 = vld [vmem:[%s6477_s3 + $0x90] sm:$0xff] }
 0x26a   :  { %2118 = vperm.xlu0 %3465, %v5681_v48   ;;  %v1672_v60 = vpop.xlane.xlu1 %1671  ;;  %v2036_v23 = vsub.f32 %v1982_v44, %v2009_v18  ;;  %v1802_v63 = vmul.f32 %v5696_v21, %v5696_v21  ;;  %v2012_v32 = vmul.f32 %v1958_v38, %v5601_v17 }
 0x26b   :  { %v1879_v61 = vadd.f32 1e-05, %v1852_v42  ;;  %v1801_v13 = vmul.f32 %v5687_v8, %v5687_v8  ;;  %3563 = vrsqrt.f32 %v1878_v25  ;;  %v1774_v9 = vmul.f32 0.0012755102, %v1672_v60  ;;  %v1932_v60 = vld [vmem:[%s6477_s3 + $0x80] sm:$0xff] }
 0x26c   :  { %v1258_v58 = vpop.xlane.xlu0 %1257  ;;  %2422 = vperm.xlu1 %3464, %v2033_v30  }
 0x26d   :  { %3565 = vrsqrt.f32 %v1879_v61  ;;  %v1828_v50 = vsub.f32 %v1774_v9, %v1801_v13  ;;  %v5701_v45 = vmul.f32 0.0012755102, %v1258_v58  ;;  %v3560_v15 = vpop.eup %3559  ;;  %v1933_v13 = vld [vmem:[%s6477_s3 + $0x88] sm:$0xff]  ;;  %v2039_v58 = vsub.f32 %v1985_v59, %v2012_v32 }
 0x26e   :  { %2447 = vperm.xlu0 %3465, %v2038_v54   ;;  %v1267_v1 = vpop.xlane.xlu1 %1266  ;;  %v1961_v25 = vmul.f32 %v3560_v15, %v1934_v53 }
 0x26f   :  { %v1855_v27 = vmax.f32 %v1828_v50, 0.0  ;;  %v5705_v55 = vmul.f32 0.0012755102, %v1267_v1 }
 0x270   :  { %v1681_v5 = vpop.xlane.xlu0 %1680  ;;  %2123 = vperm.xlu1 %3464, %v1957_v26   ;;  %v1803_v26 = vmul.f32 %v5701_v45, %v5701_v45  ;;  %v2015_v15 = vmul.f32 %v1961_v25, %v5639_v10 }
 0x271   :  { %v1775_v28 = vmul.f32 0.0012755102, %v1681_v5  ;;  %v1882_v0 = vadd.f32 1e-05, %v1855_v27  ;;  %v1804_v61 = vmul.f32 %v5705_v55, %v5705_v55 }
 0x272   :  { %2437 = vperm.xlu0 %3465, %v2036_v23   ;;  %v1690_v22 = vpop.xlane.xlu1 %1689  ;;  %v1983_v23 = vld [vmem:[%s6478_s4 + $0x68] sm:$0xff] }
 0x273   :  { %v3562_v3 = vpop.eup %3561  ;;  %v1829_v57 = vsub.f32 %v1775_v28, %v1802_v63  ;;  %v1776_v36 = vmul.f32 0.0012755102, %v1690_v22  ;;  %3567 = vrsqrt.f32 %v1882_v0 }
 0x274   :  { %v1699_v42 = vpop.xlane.xlu0 %1698  ;;  %v5719_v6 = vmul.f32 %v3562_v3, %v1935_v33  ;;  %2113 = vperm.xlu1 %3464, %v1955_v14   ;;  %v2010_v14 = vmul.f32 %v5681_v48, %v5610_v2  ;;  %v1988_v2 = vld [vmem:[%s6478_s4 + $0x90] sm:$0xff] }
 0x275   :  { %v1856_v17 = vmax.f32 %v1829_v57, 0.0  ;;  %v1777_v38 = vmul.f32 0.0012755102, %v1699_v42  ;;  %v3564_v30 = vpop.eup %3563  ;;  %v1830_v9 = vsub.f32 %v1776_v36, %v1803_v26  ;;  %v2042_v59 = vsub.f32 %v1988_v2, %v2015_v15 }
 0x276   :  { %2148 = vperm.xlu0 %3465, %v5719_v6   ;;  %v1285_v50 = vpop.xlane.xlu1 %1284  ;;  %v1959_v63 = vmul.f32 %v3564_v30, %v1932_v60  ;;  %v2037_v10 = vsub.f32 %v1983_v23, %v2010_v14  ;;  %v2016_v15 = vmul.f32 %v5719_v6, %v5648_v39 }
 0x277   :  { %v3566_v54 = vpop.eup %3565  ;;  %v1883_v18 = vadd.f32 1e-05, %v1856_v17  ;;  %v1831_v44 = vsub.f32 %v1777_v38, %v1804_v61  ;;  %v1857_v1 = vmax.f32 %v1830_v9, 0.0  ;;  %v5736_v33 = vmul.f32 0.0012755102, %v1285_v50  ;;  %v1986_v61 = vld [vmem:[%s6478_s4 + $0x80] sm:$0xff] }
 0x278   :  { %v1276_v27 = vpop.xlane.xlu0 %1275  ;;  %v1960_v5 = vmul.f32 %v3566_v54, %v1933_v13  ;;  %2452 = vperm.xlu1 %3464, %v2039_v58   ;;  %v2013_v26 = vmul.f32 %v1959_v63, %v5653_v52 }
 0x279   :  { %3569 = vrsqrt.f32 %v1883_v18  ;;  %v1858_v28 = vmax.f32 %v1831_v44, 0.0  ;;  %v5738_v53 = vmul.f32 0.0012755102, %v1276_v27  ;;  %v1884_v48 = vadd.f32 1e-05, %v1857_v1  ;;  %v1937_v18 = vld [vmem:[%s6477_s3 + $0xa8] sm:$0xff] }
 0x27a   :  { %2138 = vperm.xlu0 %3465, %v1960_v5   ;;  %v1708_v0 = vpop.xlane.xlu1 %1707  ;;  %v1806_v36 = vmul.f32 %v5736_v33, %v5736_v33  ;;  %v2040_v9 = vsub.f32 %v1986_v61, %v2013_v26  ;;  %v1936_v44 = vld [vmem:[%s6477_s3 + $0xa0] sm:$0xff]  ;;  %v2014_v6 = vmul.f32 %v1960_v5, %v5657_v31 }
 0x27b   :  { %v1885_v32 = vadd.f32 1e-05, %v1858_v28  ;;  %v1805_v3 = vmul.f32 %v5738_v53, %v5738_v53  ;;  %3571 = vrsqrt.f32 %v1884_v48  ;;  %v1778_v57 = vmul.f32 0.0012755102, %v1708_v0 }
 0x27c   :  { %v1717_v22 = vpop.xlane.xlu0 %1716  ;;  %2442 = vperm.xlu1 %3464, %v2037_v10  }
 0x27d   :  { %3573 = vrsqrt.f32 %v1885_v32  ;;  %v1779_v42 = vmul.f32 0.0012755102, %v1717_v22  ;;  %v1832_v17 = vsub.f32 %v1778_v57, %v1805_v3  ;;  %v3568_v58 = vpop.eup %3567  ;;  %v1939_v32 = vld [vmem:[%s6477_s3 + $0xb8] sm:$0xff]  ;;  %v1938_v3 = vld [vmem:[%s6477_s3 + $0xb0] sm:$0xff] }
 0x27e   :  { %2467 = vperm.xlu0 %3465, %v2042_v59   ;;  %v1726_v60 = vpop.xlane.xlu1 %1725  ;;  %v1963_v2 = vmul.f32 %v3568_v58, %v1936_v44 }
 0x27f   :  { %v1833_v38 = vsub.f32 %v1779_v42, %v1806_v36  ;;  %v1859_v13 = vmax.f32 %v1832_v17, 0.0  ;;  %v1780_v27 = vmul.f32 0.0012755102, %v1726_v60  ;;  %v1990_v42 = vld [vmem:[%s6478_s4 + $0xa0] sm:$0xff]  ;;  %v1992_v17 = vld [vmem:[%s6478_s4 + $0xb0] sm:$0xff] }
 0x280   :  { %v1294_v30 = vpop.xlane.xlu0 %1293  ;;  %2143 = vperm.xlu1 %3464, %v1961_v25   ;;  %v1989_v25 = vld [vmem:[%s6478_s4 + $0x98] sm:$0xff]  ;;  %v2017_v59 = vmul.f32 %v1963_v2, %v5687_v8  ;;  %v1940_v8 = vld [vmem:[%s6477_s3 + $0xc0] sm:$0xff] }
 0x281   :  { %v1860_v54 = vmax.f32 %v1833_v38, 0.0  ;;  %v1753_v52 = vmul.f32 0.0012755102, %v1294_v30  ;;  %v1886_v50 = vadd.f32 1e-05, %v1859_v13  ;;  %v2043_v57 = vsub.f32 %v1989_v25, %v2016_v15 }
 0x282   :  { %2457 = vperm.xlu0 %3465, %v2040_v9   ;;  %v2044_v5 = vsub.f32 %v1990_v42, %v2017_v59  ;;  %v1941_v9 = vld [vmem:[%s6477_s3 + $0xc8] sm:$0xff]  ;;  %v6873_v42 = vld [vmem:[#allocation114_spill] sm:$0xff] }
 0x283   :  { %v3570_v14 = vpop.eup %3569  ;;  %v1887_v1 = vadd.f32 1e-05, %v1860_v54  ;;  %v1807_v23 = vmul.f32 %v1753_v52, %v1753_v52  ;;  %3575 = vrsqrt.f32 %v1886_v50 }
 0x284   :  { %v1964_v28 = vmul.f32 %v3570_v14, %v1937_v18  ;;  %2133 = vperm.xlu1 %3464, %v1959_v63   ;;  %v1987_v63 = vld [vmem:[%s6478_s4 + $0x88] sm:$0xff]  ;;  %v1994_v14 = vld [vmem:[%s6478_s4 + $0xc0] sm:$0xff] }
 0x285   :  { %v1834_v48 = vsub.f32 %v1780_v27, %v1807_v23  ;;  %v3572_v0 = vpop.eup %3571  ;;  %3577 = vrsqrt.f32 %v1887_v1  ;;  %v2041_v31 = vsub.f32 %v1987_v63, %v2014_v6  ;;  %v1991_v18 = vld [vmem:[%s6478_s4 + $0xa8] sm:$0xff] }
 0x286   :  { %2158 = vperm.xlu0 %3465, %v1964_v28   ;;  %v1965_v26 = vmul.f32 %v3572_v0, %v1938_v3  ;;  %v2018_v58 = vmul.f32 %v1964_v28, %v5696_v21  ;;  %v1993_v28 = vld [vmem:[%s6478_s4 + $0xb8] sm:$0xff] }
 0x287   :  { %v3574_v39 = vpop.eup %3573  ;;  %v1861_v10 = vmax.f32 %v1834_v48, 0.0  ;;  %v6868_v3 = vld [vmem:[#allocation17_spill] sm:$0xff] }
 0x288   :  { %v1966_v22 = vmul.f32 %v3574_v39, %v1939_v32  ;;  %2472 = vperm.xlu1 %3464, %v2043_v57   ;;  %v2019_v61 = vmul.f32 %v1965_v26, %v5701_v45  ;;  %v1942_v45 = vld [vmem:[%s6477_s3 + $0xd0] sm:$0xff]  ;;  %v2045_v23 = vsub.f32 %v1991_v18, %v2018_v58  ;;  %v6869_v39 = vld [vmem:[#allocation19_spill] sm:$0xff]  ;;  %v6880_v18 = vld [vmem:[#allocation118_spill] sm:$0xff] }
 0x289   :  { %v1888_v36 = vadd.f32 1e-05, %v1861_v10  ;;  %v6870_v10 = vld [vmem:[#allocation38_spill] sm:$0xff]  ;;  %v6879_v58 = vld [vmem:[#allocation116_spill] sm:$0xff] }
 0x28a   :  { %2168 = vperm.xlu0 %3465, %v1966_v22   ;;  %v2046_v13 = vsub.f32 %v1992_v17, %v2019_v61  ;;  %v2020_v27 = vmul.f32 %v1966_v22, %v5705_v55  ;;  %v6871_v22 = vld [vmem:[#allocation40_spill] sm:$0xff]  ;;  %v6875_v17 = vld [vmem:[#allocation21_spill] sm:$0xff] }
 0x28b   :  { %3579 = vrsqrt.f32 %v1888_v36  ;;  %v6872_v36 = vld [vmem:[#allocation112_spill] sm:$0xff] }
 0x28c   :  { %2462 = vperm.xlu1 %3464, %v2041_v31   ;;  %v2047_v25 = vsub.f32 %v1993_v28, %v2020_v27 }
 0x28d   :  { %v3576_v38 = vpop.eup %3575 }
 0x28e   :  { %2477 = vperm.xlu0 %3465, %v2044_v5   ;;  %v1967_v60 = vmul.f32 %v3576_v38, %v1940_v8  ;;  %v6874_v5 = vld [vmem:[#allocation155_spill] sm:$0xff] }
 0x28f   :  { %v3578_v30 = vpop.eup %3577  ;;  %v6876_v38 = vld [vmem:[#allocation23_spill] sm:$0xff] }
 0x290   :  { %2153 = vperm.xlu1 %3464, %v1963_v2   ;;  %v1968_v54 = vmul.f32 %v3578_v30, %v1941_v9  ;;  %v2021_v44 = vmul.f32 %v1967_v60, %v5738_v53  ;;  %v1996_v53 = vld [vmem:[%s6478_s4 + $0xd0] sm:$0xff] }
 0x291   :  { %v6878_v9 = vld [vmem:[#allocation44_spill] sm:$0xff] }
 0x292   :  { %2487 = vperm.xlu0 %3465, %v2046_v13   ;;  %v2048_v21 = vsub.f32 %v1994_v14, %v2021_v44  ;;  %v2022_v55 = vmul.f32 %v1968_v54, %v5736_v33 }
 0x294   :  { %2163 = vperm.xlu1 %3464, %v1965_v26  }
 0x295   :  { %v3580_v50 = vpop.eup %3579 }
 0x296   :  { %v1969_v1 = vmul.f32 %v3580_v50, %v1942_v45  ;;  %2178 = vperm.xlu0 %3465, %v1968_v54   ;;  %v6881_v50 = vld [vmem:[#allocation158_spill] sm:$0xff] }
 0x298   :  { %v2023_v15 = vmul.f32 %v1969_v1, %v1753_v52  ;;  %2482 = vperm.xlu1 %3464, %v2045_v23   ;;  %v1995_v52 = vld [vmem:[%s6478_s4 + $0xc8] sm:$0xff]  ;;  %s3633_s4 = smov [#allocation5]  }
 0x299   :  { %v2049_v48 = vsub.f32 %v1995_v52, %v2022_v55  ;;  %v6883_v23 = vld [vmem:[#allocation11_spill] sm:$0xff]  ;;  %v6887_v52 = vld [vmem:[#allocation105_spill] sm:$0xff]  ;;  %s3271_s27 = sshll.u32 %s3633_s4, 4  ;;  %s3272_s27 = int_to_ptr.vmem [resolvable:$true] %s3271_s27 }
 0x29a   :  { %2497 = vperm.xlu0 %3465, %v2048_v21   ;;  %v2050_v2 = vsub.f32 %v1996_v53, %v2023_v15  ;;  %v6884_v21 = vld [vmem:[#allocation30_spill] sm:$0xff]  ;;  %v6885_v53 = vld [vmem:[#allocation32_spill] sm:$0xff]  ;;  %s3603_s30 = scalar_lea.vmem %s3272_s27, 24192  ;;  %p3608_p9 = scmp.lt.s32.totalorder %s3272_s27, %s3272_s27 }
 0x29b   :  { %p3604_p8 = scmp.ne.s32.totalorder %s3272_s27, %s3603_s30  ;;  %p3609_p10 = scmp.lt.s32.totalorder %s3603_s30, %s3603_s30 }
 0x29c   :  { %2492 = vperm.xlu1 %3464, %v2047_v25  }
 0x29d   :  { %p3610_p11 = por %p3609_p10, %p3608_p9 }
 0x29e   :  { %2507 = vperm.xlu0 %3465, %v2050_v2   ;;  %v6886_v2 = vld [vmem:[#allocation103_spill] sm:$0xff] }
 0x29f   :  { %p3611_p12 = pnand %p3610_p11, %p3604_p8 }
 0x2a0   :  { %2173 = vperm.xlu1 %3464, %v1967_v60   ;;  %v6877_v60 = vld [vmem:[#allocation42_spill] sm:$0xff] }
 0x2a4   :  { %2183 = vperm.xlu1 %3464, %v1969_v1   ;;  %v6882_v1 = vld [vmem:[#allocation9_spill] sm:$0xff] }
 0x2a8   :  { %2502 = vperm.xlu1 %3464, %v2049_v48  }
 0x2b3   :  { %v2064_v32 = vpop.permute.xlu1 %2063 }
 0x2b4   :  { %v2200_v0 = vmul.f32 %v2064_v32, %v6868_v3  ;;  %v2201_v6 = vmul.f32 %v2064_v32, %v6869_v39  ;;  %v2202_v57 = vmul.f32 %v2064_v32, %v6870_v10  ;;  %v2203_v63 = vmul.f32 %v2064_v32, %v6871_v22  ;;  %v6888_v39 = vld [vmem:[#allocation156_spill] sm:$0xff]  ;;  %v6889_v22 = vld [vmem:[#allocation13_spill] sm:$0xff] }
 0x2b5   :  { %v2204_v33 = vmul.f32 %v2064_v32, %v6872_v36  ;;  %v2205_v31 = vmul.f32 %v2064_v32, %v6873_v42  ;;  %v2206_v61 = vmul.f32 %v6874_v5, %v2064_v32  ;;  %v6890_v36 = vld [vmem:[#allocation15_spill] sm:$0xff]  ;;  %v6891_v5 = vld [vmem:[#allocation34_spill] sm:$0xff] }
 0x2b7   :  { %v2069_v59 = vpop.permute.xlu1 %2068  ;;  %v2054_v26 = vpop.permute.xlu0 %2053 }
 0x2b8   :  { %v2207_v8 = vmul.f32 %v2069_v59, %v6875_v17  ;;  %v2208_v13 = vmul.f32 %v2069_v59, %v6876_v38  ;;  %v2209_v30 = vmul.f32 %v2069_v59, %v6877_v60  ;;  %v2210_v45 = vmul.f32 %v2069_v59, %v6878_v9  ;;  %v2713_v38 = vld [vmem:[#allocation2 + $0x70] sm:$0xff]  ;;  %v2714_v60 = vld [vmem:[#allocation2 + $0x78] sm:$0xff] }
 0x2b9   :  { %v2211_v54 = vmul.f32 %v2069_v59, %v6879_v58  ;;  %v2212_v44 = vmul.f32 %v2069_v59, %v6880_v18  ;;  %v2213_v14 = vmul.f32 %v6881_v50, %v2069_v59  ;;  %v5823_v27 = vmul.f32 %v2054_v26, %v6882_v1  ;;  %v6892_v9 = vld [vmem:[#allocation36_spill] sm:$0xff]  ;;  %v6893_v18 = vld [vmem:[#allocation107_spill] sm:$0xff]  ;;  %v6894_v1 = vld [vmem:[#allocation110_spill] sm:$0xff] }
 0x2ba   :  { %v5826_v15 = vmul.f32 %v2054_v26, %v6883_v23  ;;  %v5829_v28 = vmul.f32 %v2054_v26, %v6884_v21  ;;  %v5832_v25 = vmul.f32 %v2054_v26, %v6885_v53  ;;  %v5835_v55 = vmul.f32 %v2054_v26, %v6886_v2  ;;  %v2715_v23 = vld [vmem:[#allocation2 + $0x80] sm:$0xff]  ;;  %v2716_v21 = vld [vmem:[#allocation2 + $0x88] sm:$0xff]  ;;  %v2717_v53 = vld [vmem:[#allocation2 + $0x90] sm:$0xff] }
 0x2bb   :  { %v5838_v48 = vmul.f32 %v2054_v26, %v6887_v52  ;;  %v2059_v32 = vpop.permute.xlu1 %2058  ;;  %v2388_v3 = vpop.permute.xlu0 %2387  ;;  %v5841_v10 = vmul.f32 %v2054_v26, %v6888_v39  ;;  %v2718_v52 = vld [vmem:[#allocation2 + $0x98] sm:$0xff]  ;;  %v2719_v39 = vld [vmem:[#allocation2 + $0xa0] sm:$0xff] }
 0x2bc   :  { %v5844_v59 = vmul.f32 %v2059_v32, %v6889_v22  ;;  %v5847_v42 = vmul.f32 %v2059_v32, %v6890_v36  ;;  %v5850_v17 = vmul.f32 %v2059_v32, %v6891_v5  ;;  %v5853_v58 = vmul.f32 %v2059_v32, %v6892_v9 }
 0x2bd   :  { %v5856_v50 = vmul.f32 %v2059_v32, %v6893_v18  ;;  %v5859_v26 = vmul.f32 %v2059_v32, %v6894_v1  ;;  %v2524_v2 = vadd.f32 %v2388_v3, %v2200_v0  ;;  %v2525_v22 = vadd.f32 %v2388_v3, %v2201_v6  ;;  %v2722_v0 = vld [vmem:[#allocation2 + $0xb8] sm:$0xff] }
 0x2be   :  { %v2526_v36 = vadd.f32 %v2388_v3, %v2202_v57  ;;  %v2527_v5 = vadd.f32 %v2388_v3, %v2203_v63  ;;  %v2528_v24 = vadd.f32 %v2388_v3, %v2204_v33  ;;  %v5862_v49 = vmul.f32 %v2059_v32, %v6895_v40  ;;  %v2723_v57 = vld [vmem:[#allocation2 + $0xc0] sm:$0xff]  ;;  %v2724_v63 = vld [vmem:[#allocation2 + $0xc8] sm:$0xff]  ;;  %v2725_v33 = vld [vmem:[#allocation2 + $0xd0] sm:$0xff] }
 0x2bf   :  { %v2529_v9 = vadd.f32 %v2388_v3, %v2205_v31  ;;  %v2530_v4 = vadd.f32 %v2388_v3, %v2206_v61  ;;  %v2902_v18 = vadd.f32 %v2713_v38, %v2524_v2  ;;  %v2393_v29 = vpop.permute.xlu1 %2392  ;;  %v2903_v12 = vadd.f32 %v2714_v60, %v2525_v22  ;;  %v2378_v47 = vpop.permute.xlu0 %2377  ;;  %v2726_v31 = vld [vmem:[#allocation2 + $0xd8] sm:$0xff] }
 0x2c0   :  { %v2904_v1 = vadd.f32 %v2715_v23, %v2526_v36  ;;  %v2905_v35 = vadd.f32 %v2716_v21, %v2527_v5  ;;  %v2906_v16 = vadd.f32 %v2717_v53, %v2528_v24  ;;  %v2531_v40 = vadd.f32 %v2393_v29, %v2207_v8  ;;  %v2699_v21 = vld [vmem:[#allocation2] sm:$0xff] }
 0x2c1   :  { %v2907_v46 = vadd.f32 %v2718_v52, %v2529_v9  ;;  %v2908_v6 = vadd.f32 %v2719_v39, %v2530_v4  ;;  %3091 = vst [vmem:[#allocation5 + $0x70] sm:$0xff] %v2902_v18  ;;  %v2532_v32 = vadd.f32 %v2393_v29, %v2208_v13  ;;  %3092 = vst [vmem:[#allocation5 + $0x78] sm:$0xff] %v2903_v12  ;;  %v2701_v52 = vld [vmem:[#allocation2 + $0x10] sm:$0xff]  ;;  %v2706_v9 = vld [vmem:[#allocation2 + $0x38] sm:$0xff] }
 0x2c2   :  { %3093 = vst [vmem:[#allocation5 + $0x80] sm:$0xff] %v2904_v1  ;;  %3094 = vst [vmem:[#allocation5 + $0x88] sm:$0xff] %v2905_v35  ;;  %v2533_v61 = vadd.f32 %v2393_v29, %v2209_v30  ;;  %v2534_v3 = vadd.f32 %v2393_v29, %v2210_v45  ;;  %v2535_v24 = vadd.f32 %v2393_v29, %v2211_v54  ;;  %v2702_v30 = vld [vmem:[#allocation2 + $0x18] sm:$0xff]  ;;  %v2704_v54 = vld [vmem:[#allocation2 + $0x28] sm:$0xff] }
 0x2c3   :  { %3095 = vst [vmem:[#allocation5 + $0x90] sm:$0xff] %v2906_v16  ;;  %v2536_v38 = vadd.f32 %v2393_v29, %v2212_v44  ;;  %3096 = vst [vmem:[#allocation5 + $0x98] sm:$0xff] %v2907_v46  ;;  %v2537_v60 = vadd.f32 %v2393_v29, %v2213_v14  ;;  %v2909_v4 = vadd.f32 %v2720_v41, %v2531_v40  ;;  %v2383_v8 = vpop.permute.xlu1 %2382  ;;  %v2700_v16 = vld [vmem:[#allocation2 + $0x8] sm:$0xff]  ;;  %v2703_v46 = vld [vmem:[#allocation2 + $0x20] sm:$0xff] }
 0x2c4   :  { %3097 = vst.msk [vmem:[#allocation5 + $0xa0] sm:$0xff] %vm1056_vm2, %v2908_v6  ;;  %v2910_v23 = vadd.f32 %v2721_v7, %v2532_v32  ;;  %v2510_v53 = vadd.f32 %v2378_v47, %v5823_v27  ;;  %v2911_v13 = vadd.f32 %v2722_v0, %v2533_v61  ;;  %v2912_v12 = vadd.f32 %v2723_v57, %v2534_v3  ;;  %v2705_v44 = vld [vmem:[#allocation2 + $0x30] sm:$0xff]  ;;  %v2708_v18 = vld [vmem:[#allocation2 + $0x48] sm:$0xff] }
 0x2c5   :  { %v2913_v2 = vadd.f32 %v2724_v63, %v2535_v24  ;;  %v2914_v35 = vadd.f32 %v2725_v33, %v2536_v38  ;;  %v2915_v45 = vadd.f32 %v2726_v31, %v2537_v60  ;;  %3098 = vst [vmem:[#allocation5 + $0xa8] sm:$0xff] %v2909_v4  ;;  %v2511_v41 = vadd.f32 %v2378_v47, %v5826_v15  ;;  %v2711_v63 = vld [vmem:[#allocation2 + $0x60] sm:$0xff]  ;;  %v6896_v3 = vld [vmem:[#allocation31_spill] sm:$0xff] }
 0x2c6   :  { %3099 = vst [vmem:[#allocation5 + $0xb0] sm:$0xff] %v2910_v23  ;;  %v2512_v7 = vadd.f32 %v2378_v47, %v5829_v28  ;;  %v2513_v29 = vadd.f32 %v2378_v47, %v5832_v25  ;;  %3100 = vst [vmem:[#allocation5 + $0xb8] sm:$0xff] %v2911_v13  ;;  %v2514_v14 = vadd.f32 %v2378_v47, %v5835_v55  ;;  %v2707_v28 = vld [vmem:[#allocation2 + $0x40] sm:$0xff]  ;;  %v2709_v55 = vld [vmem:[#allocation2 + $0x50] sm:$0xff] }
 0x2c7   :  { %3101 = vst [vmem:[#allocation5 + $0xc0] sm:$0xff] %v2912_v12  ;;  %3102 = vst [vmem:[#allocation5 + $0xc8] sm:$0xff] %v2913_v2  ;;  %v2515_v27 = vadd.f32 %v2378_v47, %v5838_v48  ;;  %v2516_v39 = vadd.f32 %v2378_v47, %v5841_v10  ;;  %v2888_v22 = vadd.f32 %v2699_v21, %v2510_v53  ;;  %v2084_v1 = vpop.permute.xlu1 %2083  ;;  %v2710_v48 = vld [vmem:[#allocation2 + $0x58] sm:$0xff]  ;;  %v2712_v10 = vld [vmem:[#allocation2 + $0x68] sm:$0xff] }
 0x2c8   :  { %3103 = vst [vmem:[#allocation5 + $0xd0] sm:$0xff] %v2914_v35  ;;  %3104 = vst.msk [vmem:[#allocation5 + $0xd8] sm:$0xff] %vm1056_vm2, %v2915_v45  ;;  %v2889_v36 = vadd.f32 %v2700_v16, %v2511_v41  ;;  %v2890_v5 = vadd.f32 %v2701_v52, %v2512_v7  ;;  %v2891_v15 = vadd.f32 %v2702_v30, %v2513_v29  ;;  %v6897_v21 = vld [vmem:[#allocation33_spill] sm:$0xff]  ;;  %v6898_v13 = vld [vmem:[#allocation54_spill] sm:$0xff] }
 0x2c9   :  { %v2517_v25 = vadd.f32 %v2383_v8, %v5844_v59  ;;  %v2892_v0 = vadd.f32 %v2703_v46, %v2514_v14  ;;  %v2893_v6 = vadd.f32 %v2704_v54, %v2515_v27  ;;  %v2894_v57 = vadd.f32 %v2705_v44, %v2516_v39  ;;  %3077 = vst [vmem:[#allocation5] sm:$0xff] %v2888_v22  ;;  %v6899_v2 = vld [vmem:[#allocation56_spill] sm:$0xff]  ;;  %v2743_v35 = vld [vmem:[#allocation2 + $0x160] sm:$0xff]  ;;  %v2744_v16 = vld [vmem:[#allocation2 + $0x168] sm:$0xff] }
 0x2ca   :  { %v2518_v47 = vadd.f32 %v2383_v8, %v5847_v42  ;;  %3078 = vst [vmem:[#allocation5 + $0x8] sm:$0xff] %v2889_v36  ;;  %3079 = vst [vmem:[#allocation5 + $0x10] sm:$0xff] %v2890_v5  ;;  %v2519_v33 = vadd.f32 %v2383_v8, %v5850_v17  ;;  %v2520_v40 = vadd.f32 %v2383_v8, %v5853_v58  ;;  %v6900_v52 = vld [vmem:[#allocation128_spill] sm:$0xff]  ;;  %v6901_v45 = vld [vmem:[#allocation130_spill] sm:$0xff] }
 0x2cb   :  { %3080 = vst [vmem:[#allocation5 + $0x18] sm:$0xff] %v2891_v15  ;;  %v2521_v59 = vadd.f32 %v2383_v8, %v5856_v50  ;;  %v2522_v32 = vadd.f32 %v2383_v8, %v5859_v26  ;;  %3081 = vst [vmem:[#allocation5 + $0x20] sm:$0xff] %v2892_v0  ;;  %v2523_v31 = vadd.f32 %v2383_v8, %v5862_v49  ;;  %v2074_v23 = vpop.permute.xlu1 %2073  ;;  %v2408_v50 = vpop.permute.xlu0 %2407  ;;  %v2741_v26 = vld [vmem:[#allocation2 + $0x150] sm:$0xff]  ;;  %v2742_v8 = vld [vmem:[#allocation2 + $0x158] sm:$0xff] }
 0x2cc   :  { %3082 = vst [vmem:[#allocation5 + $0x28] sm:$0xff] %v2893_v6  ;;  %3083 = vst.msk [vmem:[#allocation5 + $0x30] sm:$0xff] %vm1056_vm2, %v2894_v57  ;;  %v2895_v61 = vadd.f32 %v2706_v9, %v2517_v25  ;;  %v2896_v42 = vadd.f32 %v2707_v28, %v2518_v47  ;;  %v2228_v24 = vmul.f32 %v2084_v1, %v6896_v3  ;;  %v6902_v54 = vld [vmem:[#allocation160_spill] sm:$0xff]  ;;  %v2746_v29 = vld [vmem:[#allocation2 + $0x178] sm:$0xff] }
 0x2cd   :  { %v2897_v38 = vadd.f32 %v2708_v18, %v2519_v33  ;;  %v2898_v60 = vadd.f32 %v2709_v55, %v2520_v40  ;;  %v2899_v4 = vadd.f32 %v2710_v48, %v2521_v59  ;;  %v2900_v17 = vadd.f32 %v2711_v63, %v2522_v32  ;;  %v2745_v7 = vld [vmem:[#allocation2 + $0x170] sm:$0xff]  ;;  %v2747_v14 = vld [vmem:[#allocation2 + $0x180] sm:$0xff]  ;;  %v6903_v36 = vld [vmem:[#allocation25_spill] sm:$0xff] }
 0x2ce   :  { %v2901_v58 = vadd.f32 %v2712_v10, %v2523_v31  ;;  %3084 = vst [vmem:[#allocation5 + $0x38] sm:$0xff] %v2895_v61  ;;  %3085 = vst [vmem:[#allocation5 + $0x40] sm:$0xff] %v2896_v42  ;;  %v2229_v53 = vmul.f32 %v2084_v1, %v6897_v21  ;;  %v2230_v12 = vmul.f32 %v2084_v1, %v6898_v13  ;;  %v6905_v33 = vld [vmem:[#allocation46_spill] sm:$0xff]  ;;  %v6906_v32 = vld [vmem:[#allocation48_spill] sm:$0xff] }
 0x2cf   :  { %v2231_v49 = vmul.f32 %v2084_v1, %v6899_v2  ;;  %3086 = vst [vmem:[#allocation5 + $0x48] sm:$0xff] %v2897_v38  ;;  %3087 = vst [vmem:[#allocation5 + $0x50] sm:$0xff] %v2898_v60  ;;  %v2232_v30 = vmul.f32 %v2084_v1, %v6900_v52  ;;  %v2233_v46 = vmul.f32 %v2084_v1, %v6901_v45  ;;  %v2089_v25 = vpop.permute.xlu1 %2088  ;;  %v2398_v48 = vpop.permute.xlu0 %2397  ;;  %v2727_v59 = vld [vmem:[#allocation2 + $0xe0] sm:$0xff]  ;;  %v6907_v61 = vld [vmem:[#allocation120_spill] sm:$0xff] }
 0x2d0   :  { %3088 = vst [vmem:[#allocation5 + $0x58] sm:$0xff] %v2899_v4  ;;  %3089 = vst [vmem:[#allocation5 + $0x60] sm:$0xff] %v2900_v17  ;;  %v2234_v44 = vmul.f32 %v6902_v54, %v2084_v1  ;;  %v2552_v41 = vadd.f32 %v2408_v50, %v2228_v24  ;;  %v2553_v27 = vadd.f32 %v2408_v50, %v2229_v53  ;;  %v6904_v1 = vld [vmem:[#allocation27_spill] sm:$0xff]  ;;  %v6908_v3 = vld [vmem:[#allocation122_spill] sm:$0xff] }
 0x2d1   :  { %3090 = vst.msk [vmem:[#allocation5 + $0x68] sm:$0xff] %vm1056_vm2, %v2901_v58  ;;  %v2554_v39 = vadd.f32 %v2408_v50, %v2230_v12  ;;  %v2555_v22 = vadd.f32 %v2408_v50, %v2231_v49  ;;  %v2214_v5 = vmul.f32 %v2074_v23, %v6903_v36  ;;  %v2556_v15 = vadd.f32 %v2408_v50, %v2232_v30  ;;  %v6909_v38 = vld [vmem:[#allocation87_spill] sm:$0xff]  ;;  %v2729_v17 = vld [vmem:[#allocation2 + $0xf0] sm:$0xff]  ;;  %v2730_v58 = vld [vmem:[#allocation2 + $0xf8] sm:$0xff] }
 0x2d2   :  { %v2557_v9 = vadd.f32 %v2408_v50, %v2233_v46  ;;  %v2558_v28 = vadd.f32 %v2408_v50, %v2234_v44  ;;  %v2930_v18 = vadd.f32 %v2741_v26, %v2552_v41  ;;  %v2931_v0 = vadd.f32 %v2742_v8, %v2553_v27  ;;  %v2728_v4 = vld [vmem:[#allocation2 + $0xe8] sm:$0xff]  ;;  %v2731_v50 = vld [vmem:[#allocation2 + $0x100] sm:$0xff]  ;;  %v2733_v21 = vld [vmem:[#allocation2 + $0x110] sm:$0xff] }
 0x2d3   :  { %v2932_v6 = vadd.f32 %v2743_v35, %v2554_v39  ;;  %v2933_v57 = vadd.f32 %v2744_v16, %v2555_v22  ;;  %v2215_v55 = vmul.f32 %v2074_v23, %v6904_v1  ;;  %v2934_v63 = vadd.f32 %v2745_v7, %v2556_v15  ;;  %v2732_v26 = vld [vmem:[#allocation2 + $0x108] sm:$0xff]  ;;  %v2079_v8 = vpop.permute.xlu1 %2078  ;;  %v6911_v44 = vld [vmem:[#allocation37_spill] sm:$0xff]  ;;  %v6912_v39 = vld [vmem:[#allocation58_spill] sm:$0xff] }
 0x2d4   :  { %v2935_v47 = vadd.f32 %v2746_v29, %v2557_v9  ;;  %v2936_v10 = vadd.f32 %v2747_v14, %v2558_v28  ;;  %3119 = vst [vmem:[#allocation5 + $0x150] sm:$0xff] %v2930_v18  ;;  %v2216_v40 = vmul.f32 %v2074_v23, %v6905_v33  ;;  %3120 = vst [vmem:[#allocation5 + $0x158] sm:$0xff] %v2931_v0  ;;  %v6910_v2 = vld [vmem:[#allocation35_spill] sm:$0xff]  ;;  %v6913_v36 = vld [vmem:[#allocation60_spill] sm:$0xff] }
 0x2d5   :  { %3121 = vst [vmem:[#allocation5 + $0x160] sm:$0xff] %v2932_v6  ;;  %3122 = vst [vmem:[#allocation5 + $0x168] sm:$0xff] %v2933_v57  ;;  %v2217_v31 = vmul.f32 %v2074_v23, %v6906_v32  ;;  %v2218_v42 = vmul.f32 %v2074_v23, %v6907_v61  ;;  %v2219_v24 = vmul.f32 %v2074_v23, %v6908_v3  ;;  %v2109_v30 = vpop.permute.xlu0 %2108  ;;  %v6914_v15 = vld [vmem:[#allocation132_spill] sm:$0xff]  ;;  %v6915_v28 = vld [vmem:[#allocation134_spill] sm:$0xff] }
 0x2d6   :  { %v2220_v60 = vmul.f32 %v2074_v23, %v6909_v38  ;;  %3123 = vst [vmem:[#allocation5 + $0x170] sm:$0xff] %v2934_v63  ;;  %3124 = vst [vmem:[#allocation5 + $0x178] sm:$0xff] %v2935_v47  ;;  %v2538_v53 = vadd.f32 %v2398_v48, %v2214_v5  ;;  %v2539_v13 = vadd.f32 %v2398_v48, %v2215_v55  ;;  %v6916_v6 = vld [vmem:[#allocation162_spill] sm:$0xff]  ;;  %v6917_v1 = vld [vmem:[#allocation28_spill] sm:$0xff] }
 0x2d7   :  { %3125 = vst.msk [vmem:[#allocation5 + $0x180] sm:$0xff] %vm1056_vm2, %v2936_v10  ;;  %v2540_v12 = vadd.f32 %v2398_v48, %v2216_v40  ;;  %v2235_v49 = vmul.f32 %v2089_v25, %v6910_v2  ;;  %v2541_v35 = vadd.f32 %v2398_v48, %v2217_v31  ;;  %v2542_v16 = vadd.f32 %v2398_v48, %v2218_v42  ;;  %v2413_v0 = vpop.permute.xlu1 %2412  ;;  %v6919_v47 = vld [vmem:[#allocation50_spill] sm:$0xff]  ;;  %v6920_v40 = vld [vmem:[#allocation52_spill] sm:$0xff] }
 0x2d8   :  { %v2543_v52 = vadd.f32 %v2398_v48, %v2219_v24  ;;  %v2544_v23 = vadd.f32 %v2398_v48, %v2220_v60  ;;  %v2916_v45 = vadd.f32 %v2727_v59, %v2538_v53  ;;  %v2917_v46 = vadd.f32 %v2728_v4, %v2539_v13  ;;  %v6918_v48 = vld [vmem:[#allocation29_spill] sm:$0xff]  ;;  %v6921_v32 = vld [vmem:[#allocation124_spill] sm:$0xff]  ;;  %v6922_v61 = vld [vmem:[#allocation126_spill] sm:$0xff] }
 0x2d9   :  { %v2918_v54 = vadd.f32 %v2729_v17, %v2540_v12  ;;  %v2236_v41 = vmul.f32 %v2089_v25, %v6911_v44  ;;  %v2919_v7 = vadd.f32 %v2730_v58, %v2541_v35  ;;  %v2920_v29 = vadd.f32 %v2731_v50, %v2542_v16  ;;  %v2099_v33 = vpop.permute.xlu0 %2098  ;;  %v6923_v24 = vld [vmem:[#allocation51_spill] sm:$0xff]  ;;  %v6924_v60 = vld [vmem:[#allocation53_spill] sm:$0xff]  ;;  %v6925_v4 = vld [vmem:[#allocation74_spill] sm:$0xff] }
 0x2da   :  { %v2921_v14 = vadd.f32 %v2732_v26, %v2543_v52  ;;  %v2922_v27 = vadd.f32 %v2733_v21, %v2544_v23  ;;  %3105 = vst [vmem:[#allocation5 + $0xe0] sm:$0xff] %v2916_v45  ;;  %3106 = vst [vmem:[#allocation5 + $0xe8] sm:$0xff] %v2917_v46  ;;  %v2237_v22 = vmul.f32 %v2089_v25, %v6912_v39  ;;  %v6926_v58 = vld [vmem:[#allocation76_spill] sm:$0xff]  ;;  %v2748_v26 = vld [vmem:[#allocation2 + $0x188] sm:$0xff] }
 0x2db   :  { %3107 = vst [vmem:[#allocation5 + $0xf0] sm:$0xff] %v2918_v54  ;;  %v2238_v5 = vmul.f32 %v2089_v25, %v6913_v36  ;;  %v2239_v9 = vmul.f32 %v2089_v25, %v6914_v15  ;;  %v2240_v18 = vmul.f32 %v2089_v25, %v6915_v28  ;;  %3108 = vst [vmem:[#allocation5 + $0xf8] sm:$0xff] %v2919_v7  ;;  %v2749_v21 = vld [vmem:[#allocation2 + $0x190] sm:$0xff]  ;;  %v6927_v53 = vld [vmem:[#allocation150_spill] sm:$0xff]  ;;  %v2403_v23 = vpop.permute.xlu1 %2402 }
 0x2dc   :  { %3109 = vst [vmem:[#allocation5 + $0x100] sm:$0xff] %v2920_v29  ;;  %3110 = vst [vmem:[#allocation5 + $0x108] sm:$0xff] %v2921_v14  ;;  %v2241_v57 = vmul.f32 %v6916_v6, %v2089_v25  ;;  %v2221_v55 = vmul.f32 %v2079_v8, %v6917_v1  ;;  %v2222_v63 = vmul.f32 %v2079_v8, %v6918_v48  ;;  %v6928_v12 = vld [vmem:[#allocation152_spill] sm:$0xff]  ;;  %v2751_v35 = vld [vmem:[#allocation2 + $0x1a0] sm:$0xff] }
 0x2dd   :  { %3111 = vst.msk [vmem:[#allocation5 + $0x110] sm:$0xff] %vm1056_vm2, %v2922_v27  ;;  %v2223_v10 = vmul.f32 %v2079_v8, %v6919_v47  ;;  %v2224_v59 = vmul.f32 %v2079_v8, %v6920_v40  ;;  %v2225_v31 = vmul.f32 %v2079_v8, %v6921_v32  ;;  %v2226_v42 = vmul.f32 %v2079_v8, %v6922_v61  ;;  %v2752_v16 = vld [vmem:[#allocation2 + $0x1a8] sm:$0xff]  ;;  %v2753_v45 = vld [vmem:[#allocation2 + $0x1b0] sm:$0xff]  ;;  %v2754_v46 = vld [vmem:[#allocation2 + $0x1b8] sm:$0xff]  ;;  %v5933_v14 = vpop.permute.xlu0 %2427 }
 0x2de   :  { %v2227_v3 = vmul.f32 %v2079_v8, %v5072_v51  ;;  %v5913_v38 = vmul.f32 %v2109_v30, %v6923_v24  ;;  %v5916_v25 = vmul.f32 %v2109_v30, %v6924_v60  ;;  %v5919_v17 = vmul.f32 %v2109_v30, %v6925_v4  ;;  %v2750_v8 = vld [vmem:[#allocation2 + $0x198] sm:$0xff]  ;;  %v6929_v15 = vld [vmem:[#allocation43_spill] sm:$0xff]  ;;  %v6933_v40 = vld [vmem:[#allocation140_spill] sm:$0xff] }
 0x2df   :  { %v5922_v50 = vmul.f32 %v2109_v30, %v6926_v58  ;;  %v5925_v13 = vmul.f32 %v2109_v30, %v6927_v53  ;;  %v5928_v2 = vmul.f32 %v2109_v30, %v6928_v12  ;;  %v5931_v51 = vmul.f32 %v5141_v37, %v2109_v30  ;;  %v6930_v47 = vld [vmem:[#allocation45_spill] sm:$0xff]  ;;  %v6934_v61 = vld [vmem:[#allocation142_spill] sm:$0xff]  ;;  %v2736_v58 = vld [vmem:[#allocation2 + $0x128] sm:$0xff] }
 0x2e0   :  { %v2559_v52 = vadd.f32 %v2413_v0, %v2235_v49  ;;  %v2560_v54 = vadd.f32 %v2413_v0, %v2236_v41  ;;  %v2561_v44 = vadd.f32 %v2413_v0, %v2237_v22  ;;  %v2562_v7 = vadd.f32 %v2413_v0, %v2238_v5  ;;  %v6931_v22 = vld [vmem:[#allocation66_spill] sm:$0xff]  ;;  %v2738_v53 = vld [vmem:[#allocation2 + $0x138] sm:$0xff] }
 0x2e1   :  { %v2563_v29 = vadd.f32 %v2413_v0, %v2239_v9  ;;  %v2564_v27 = vadd.f32 %v2413_v0, %v2240_v18  ;;  %v2565_v39 = vadd.f32 %v2413_v0, %v2241_v57  ;;  %v5936_v28 = vmul.f32 %v2099_v33, %v6929_v15  ;;  %v2734_v9 = vld [vmem:[#allocation2 + $0x118] sm:$0xff]  ;;  %v2104_v18 = vpop.permute.xlu1 %2103  ;;  %v6932_v0 = vld [vmem:[#allocation68_spill] sm:$0xff]  ;;  %v2735_v4 = vld [vmem:[#allocation2 + $0x120] sm:$0xff] }
 0x2e2   :  { %v2937_v36 = vadd.f32 %v2748_v26, %v2559_v52  ;;  %v2938_v37 = vadd.f32 %v2749_v21, %v2560_v54  ;;  %v2939_v30 = vadd.f32 %v2750_v8, %v2561_v44  ;;  %v2940_v6 = vadd.f32 %v2751_v35, %v2562_v7  ;;  %v2737_v26 = vld [vmem:[#allocation2 + $0x130] sm:$0xff]  ;;  %v5956_v21 = vpop.permute.xlu0 %2417  ;;  %v2739_v12 = vld [vmem:[#allocation2 + $0x140] sm:$0xff]  ;;  %v2740_v8 = vld [vmem:[#allocation2 + $0x148] sm:$0xff] }
 0x2e3   :  { %v2941_v1 = vadd.f32 %v2752_v16, %v2563_v29  ;;  %v2942_v49 = vadd.f32 %v2753_v45, %v2564_v27  ;;  %v2943_v48 = vadd.f32 %v2754_v46, %v2565_v39  ;;  %v5939_v41 = vmul.f32 %v2099_v33, %v6930_v47  ;;  %v6940_v47 = vld [vmem:[#allocation149_spill] sm:$0xff] }
 0x2e4   :  { %3126 = vst [vmem:[#allocation5 + $0x188] sm:$0xff] %v2937_v36  ;;  %v5942_v5 = vmul.f32 %v2099_v33, %v6931_v22  ;;  %3127 = vst [vmem:[#allocation5 + $0x190] sm:$0xff] %v2938_v37  ;;  %v5945_v57 = vmul.f32 %v2099_v33, %v6932_v0  ;;  %v5948_v32 = vmul.f32 %v2099_v33, %v6933_v40  ;;  %v2773_v0 = vld [vmem:[#allocation2 + $0x250] sm:$0xff]  ;;  %v2774_v40 = vld [vmem:[#allocation2 + $0x258] sm:$0xff] }
 0x2e5   :  { %3128 = vst [vmem:[#allocation5 + $0x198] sm:$0xff] %v2939_v30  ;;  %3129 = vst [vmem:[#allocation5 + $0x1a0] sm:$0xff] %v2940_v6  ;;  %v5951_v24 = vmul.f32 %v2099_v33, %v6934_v61  ;;  %v5954_v60 = vmul.f32 %v2099_v33, %v5154_v56  ;;  %v2545_v35 = vadd.f32 %v2403_v23, %v2221_v55  ;;  %v6935_v56 = vld [vmem:[#allocation47_spill] sm:$0xff]  ;;  %v2094_v36 = vpop.permute.xlu1 %2093  ;;  %v6936_v6 = vld [vmem:[#allocation49_spill] sm:$0xff] }
 0x2e6   :  { %3130 = vst [vmem:[#allocation5 + $0x1a8] sm:$0xff] %v2941_v1  ;;  %3131 = vst [vmem:[#allocation5 + $0x1b0] sm:$0xff] %v2942_v49  ;;  %v2546_v16 = vadd.f32 %v2403_v23, %v2222_v63  ;;  %v2547_v52 = vadd.f32 %v2403_v23, %v2223_v10  ;;  %v2548_v45 = vadd.f32 %v2403_v23, %v2224_v59  ;;  %v5961_v49 = vpop.permute.xlu0 %2128  ;;  %v2769_v55 = vld [vmem:[#allocation2 + $0x230] sm:$0xff]  ;;  %v2770_v63 = vld [vmem:[#allocation2 + $0x238] sm:$0xff] }
 0x2e7   :  { %3132 = vst.msk [vmem:[#allocation5 + $0x1b8] sm:$0xff] %vm1056_vm2, %v2943_v48  ;;  %v2549_v46 = vadd.f32 %v2403_v23, %v2225_v31  ;;  %v2550_v54 = vadd.f32 %v2403_v23, %v2226_v42  ;;  %v2551_v44 = vadd.f32 %v2403_v23, %v2227_v3  ;;  %v2256_v33 = vmul.f32 %v2104_v18, %v6935_v56  ;;  %v2771_v10 = vld [vmem:[#allocation2 + $0x240] sm:$0xff]  ;;  %v6938_v42 = vld [vmem:[#allocation72_spill] sm:$0xff]  ;;  %v6939_v23 = vld [vmem:[#allocation147_spill] sm:$0xff] }
 0x2e8   :  { %v2923_v7 = vadd.f32 %v2734_v9, %v2545_v35  ;;  %v2924_v29 = vadd.f32 %v2735_v4, %v2546_v16  ;;  %v2925_v27 = vadd.f32 %v2736_v58, %v2547_v52  ;;  %v2926_v39 = vadd.f32 %v2737_v26, %v2548_v45  ;;  %v6937_v59 = vld [vmem:[#allocation70_spill] sm:$0xff]  ;;  %v2772_v9 = vld [vmem:[#allocation2 + $0x248] sm:$0xff]  ;;  %v6943_v56 = vld [vmem:[#allocation41_spill] sm:$0xff] }
 0x2e9   :  { %v2927_v15 = vadd.f32 %v2738_v53, %v2549_v46  ;;  %v2928_v37 = vadd.f32 %v2739_v12, %v2550_v54  ;;  %v2929_v30 = vadd.f32 %v2740_v8, %v2551_v44  ;;  %v2257_v1 = vmul.f32 %v2104_v18, %v6936_v6  ;;  %v6941_v61 = vld [vmem:[#allocation163_spill] sm:$0xff]  ;;  %v2775_v8 = vld [vmem:[#allocation2 + $0x260] sm:$0xff]  ;;  %v5976_v46 = vpop.permute.xlu1 %2432 }
 0x2ea   :  { %3112 = vst [vmem:[#allocation5 + $0x118] sm:$0xff] %v2923_v7  ;;  %3113 = vst [vmem:[#allocation5 + $0x120] sm:$0xff] %v2924_v29  ;;  %v2258_v31 = vmul.f32 %v2104_v18, %v6937_v59  ;;  %v2259_v3 = vmul.f32 %v2104_v18, %v6938_v42  ;;  %v2260_v48 = vmul.f32 %v2104_v18, %v6939_v23  ;;  %v6942_v53 = vld [vmem:[#allocation39_spill] sm:$0xff]  ;;  %v6947_v23 = vld [vmem:[#allocation138_spill] sm:$0xff] }
 0x2eb   :  { %3114 = vst [vmem:[#allocation5 + $0x128] sm:$0xff] %v2925_v27  ;;  %3115 = vst [vmem:[#allocation5 + $0x130] sm:$0xff] %v2926_v39  ;;  %v2261_v22 = vmul.f32 %v2104_v18, %v6940_v47  ;;  %v2262_v4 = vmul.f32 %v6941_v61, %v2104_v18  ;;  %v2580_v58 = vadd.f32 %v5933_v14, %v2256_v33  ;;  %v2756_v6 = vld [vmem:[#allocation2 + $0x1c8] sm:$0xff] }
 0x2ec   :  { %3116 = vst [vmem:[#allocation5 + $0x138] sm:$0xff] %v2927_v15  ;;  %3117 = vst [vmem:[#allocation5 + $0x140] sm:$0xff] %v2928_v37  ;;  %v2581_v26 = vadd.f32 %v5933_v14, %v2257_v1  ;;  %v2242_v12 = vmul.f32 %v2094_v36, %v6942_v53  ;;  %v2582_v35 = vadd.f32 %v5933_v14, %v2258_v31  ;;  %v5980_v15 = vpop.permute.xlu0 %2118  ;;  %v6944_v1 = vld [vmem:[#allocation62_spill] sm:$0xff]  ;;  %v6945_v31 = vld [vmem:[#allocation64_spill] sm:$0xff] }
 0x2ed   :  { %3118 = vst.msk [vmem:[#allocation5 + $0x148] sm:$0xff] %vm1056_vm2, %v2929_v30  ;;  %v2583_v16 = vadd.f32 %v5933_v14, %v2259_v3  ;;  %v2584_v52 = vadd.f32 %v5933_v14, %v2260_v48  ;;  %v2585_v45 = vadd.f32 %v5933_v14, %v2261_v22  ;;  %v2586_v54 = vadd.f32 %v5933_v14, %v2262_v4  ;;  %v2755_v30 = vld [vmem:[#allocation2 + $0x1c0] sm:$0xff]  ;;  %v6946_v14 = vld [vmem:[#allocation136_spill] sm:$0xff]  ;;  %v6948_v47 = vld [vmem:[#allocation99_spill] sm:$0xff] }
 0x2ee   :  { %v2958_v18 = vadd.f32 %v2769_v55, %v2580_v58  ;;  %v2959_v44 = vadd.f32 %v2770_v63, %v2581_v26  ;;  %v2243_v33 = vmul.f32 %v2094_v36, %v6943_v56  ;;  %v2960_v7 = vadd.f32 %v2771_v10, %v2582_v35  ;;  %v2757_v63 = vld [vmem:[#allocation2 + $0x1d0] sm:$0xff]  ;;  %v2758_v10 = vld [vmem:[#allocation2 + $0x1d8] sm:$0xff]  ;;  %v2759_v3 = vld [vmem:[#allocation2 + $0x1e0] sm:$0xff] }
 0x2ef   :  { %v2961_v29 = vadd.f32 %v2772_v9, %v2583_v16  ;;  %v2962_v27 = vadd.f32 %v2773_v0, %v2584_v52  ;;  %v2963_v39 = vadd.f32 %v2774_v40, %v2585_v45  ;;  %v2964_v37 = vadd.f32 %v2775_v8, %v2586_v54  ;;  %v5989_v40 = vpop.permute.xlu1 %2422  ;;  %v2760_v61 = vld [vmem:[#allocation2 + $0x1e8] sm:$0xff]  ;;  %v2761_v4 = vld [vmem:[#allocation2 + $0x1f0] sm:$0xff] }
 0x2f0   :  { %3147 = vst [vmem:[#allocation5 + $0x230] sm:$0xff] %v2958_v18  ;;  %3148 = vst [vmem:[#allocation5 + $0x238] sm:$0xff] %v2959_v44  ;;  %v2244_v59 = vmul.f32 %v2094_v36, %v6944_v1  ;;  %v2245_v42 = vmul.f32 %v2094_v36, %v6945_v31  ;;  %v2246_v55 = vmul.f32 %v2094_v36, %v6946_v14  ;;  %v6949_v8 = vld [vmem:[#allocation67_spill] sm:$0xff]  ;;  %v6950_v44 = vld [vmem:[#allocation69_spill] sm:$0xff] }
 0x2f1   :  { %3149 = vst [vmem:[#allocation5 + $0x240] sm:$0xff] %v2960_v7  ;;  %3150 = vst [vmem:[#allocation5 + $0x248] sm:$0xff] %v2961_v29  ;;  %v2247_v48 = vmul.f32 %v2094_v36, %v6947_v23  ;;  %v2248_v22 = vmul.f32 %v2094_v36, %v6948_v47  ;;  %v2566_v9 = vadd.f32 %v5956_v21, %v2242_v12  ;;  %v6951_v29 = vld [vmem:[#allocation94_spill] sm:$0xff]  ;;  %v2782_v47 = vld [vmem:[#allocation2 + $0x298] sm:$0xff] }
 0x2f2   :  { %3151 = vst [vmem:[#allocation5 + $0x250] sm:$0xff] %v2962_v27  ;;  %3152 = vst [vmem:[#allocation5 + $0x258] sm:$0xff] %v2963_v39  ;;  %v2567_v0 = vadd.f32 %v5956_v21, %v2243_v33  ;;  %v2568_v58 = vadd.f32 %v5956_v21, %v2244_v59  ;;  %v2569_v26 = vadd.f32 %v5956_v21, %v2245_v42  ;;  %v6952_v39 = vld [vmem:[#allocation97_spill] sm:$0xff]  ;;  %v6953_v59 = vld [vmem:[#allocation96_spill] sm:$0xff] }
 0x2f3   :  { %3153 = vst.msk [vmem:[#allocation5 + $0x260] sm:$0xff] %vm1056_vm2, %v2964_v37  ;;  %v2570_v53 = vadd.f32 %v5956_v21, %v2246_v55  ;;  %v5997_v35 = vmul.f32 %v5961_v49, %v6949_v8  ;;  %v2571_v36 = vadd.f32 %v5956_v21, %v2247_v48  ;;  %v2572_v12 = vadd.f32 %v5956_v21, %v2248_v22  ;;  %v2776_v37 = vld [vmem:[#allocation2 + $0x268] sm:$0xff]  ;;  %v6015_v1 = vpop.permute.xlu1 %2123  ;;  %v6954_v42 = vld [vmem:[#allocation100_spill] sm:$0xff] }
 0x2f4   :  { %v2944_v16 = vadd.f32 %v2755_v30, %v2566_v9  ;;  %v2945_v52 = vadd.f32 %v2756_v6, %v2567_v0  ;;  %v2946_v45 = vadd.f32 %v2757_v63, %v2568_v58  ;;  %v2947_v54 = vadd.f32 %v2758_v10, %v2569_v26  ;;  %v2777_v30 = vld [vmem:[#allocation2 + $0x270] sm:$0xff]  ;;  %v6013_v6 = vpop.permute.xlu0 %2447  ;;  %v2778_v63 = vld [vmem:[#allocation2 + $0x278] sm:$0xff]  ;;  %v2779_v10 = vld [vmem:[#allocation2 + $0x280] sm:$0xff] }
 0x2f5   :  { %v2948_v18 = vadd.f32 %v2759_v3, %v2570_v53  ;;  %v6003_v56 = vmul.f32 %v5961_v49, %v6950_v44  ;;  %v2949_v33 = vadd.f32 %v2760_v61, %v2571_v36  ;;  %v2950_v7 = vadd.f32 %v2761_v4, %v2572_v12  ;;  %v2780_v3 = vld [vmem:[#allocation2 + $0x288] sm:$0xff]  ;;  %v2781_v48 = vld [vmem:[#allocation2 + $0x290] sm:$0xff]  ;;  %v6957_v12 = vld [vmem:[#allocation82_spill] sm:$0xff] }
 0x2f6   :  { %3133 = vst [vmem:[#allocation5 + $0x1c0] sm:$0xff] %v2944_v16  ;;  %3134 = vst [vmem:[#allocation5 + $0x1c8] sm:$0xff] %v2945_v52  ;;  %v6007_v27 = vmul.f32 %v5961_v49, %v6951_v29  ;;  %v6011_v21 = vmul.f32 %v5961_v49, %v6952_v39  ;;  %v6019_v31 = vmul.f32 %v5961_v49, %v6953_v59  ;;  %v6955_v4 = vld [vmem:[#allocation59_spill] sm:$0xff]  ;;  %v6958_v16 = vld [vmem:[#allocation85_spill] sm:$0xff] }
 0x2f7   :  { %3135 = vst [vmem:[#allocation5 + $0x1d0] sm:$0xff] %v2946_v45  ;;  %3136 = vst [vmem:[#allocation5 + $0x1d8] sm:$0xff] %v2947_v54  ;;  %v6023_v14 = vmul.f32 %v5961_v49, %v6954_v42  ;;  %v6027_v55 = vmul.f32 %v5225_v20, %v5961_v49  ;;  %v2587_v23 = vadd.f32 %v5976_v46, %v5913_v38  ;;  %v6048_v8 = vpop.permute.xlu1 %2113  ;;  %v6959_v45 = vld [vmem:[#allocation157_spill] sm:$0xff]  ;;  %v2764_v29 = vld [vmem:[#allocation2 + $0x208] sm:$0xff] }
 0x2f8   :  { %3137 = vst [vmem:[#allocation5 + $0x1e0] sm:$0xff] %v2948_v18  ;;  %3138 = vst [vmem:[#allocation5 + $0x1e8] sm:$0xff] %v2949_v33  ;;  %v2588_v22 = vadd.f32 %v5976_v46, %v5916_v25  ;;  %v2589_v9 = vadd.f32 %v5976_v46, %v5919_v17  ;;  %v2590_v20 = vadd.f32 %v5976_v46, %v5922_v50  ;;  %v6960_v18 = vld [vmem:[#allocation159_spill] sm:$0xff]  ;;  %v2765_v39 = vld [vmem:[#allocation2 + $0x210] sm:$0xff] }
 0x2f9   :  { %3139 = vst.msk [vmem:[#allocation5 + $0x1f0] sm:$0xff] %vm1056_vm2, %v2950_v7  ;;  %v2591_v49 = vadd.f32 %v5976_v46, %v5925_v13  ;;  %v2592_v38 = vadd.f32 %v5976_v46, %v5928_v2  ;;  %v2593_v0 = vadd.f32 %v5976_v46, %v5931_v51  ;;  %v2965_v61 = vadd.f32 %v2776_v37, %v2587_v23  ;;  %v6956_v13 = vld [vmem:[#allocation61_spill] sm:$0xff]  ;;  %v2763_v7 = vld [vmem:[#allocation2 + $0x200] sm:$0xff]  ;;  %v6074_v37 = vpop.permute.xlu0 %2437  ;;  %v2768_v42 = vld [vmem:[#allocation2 + $0x228] sm:$0xff] }
 0x2fa   :  { %v6046_v58 = vmul.f32 %v5980_v15, %v6955_v4  ;;  %v2966_v25 = vadd.f32 %v2777_v30, %v2588_v22  ;;  %v2967_v26 = vadd.f32 %v2778_v63, %v2589_v9  ;;  %v2968_v17 = vadd.f32 %v2779_v10, %v2590_v20  ;;  %v2762_v46 = vld [vmem:[#allocation2 + $0x1f8] sm:$0xff]  ;;  %v2767_v59 = vld [vmem:[#allocation2 + $0x220] sm:$0xff] }
 0x2fb   :  { %v2969_v53 = vadd.f32 %v2780_v3, %v2591_v49  ;;  %v2970_v50 = vadd.f32 %v2781_v48, %v2592_v38  ;;  %v2971_v36 = vadd.f32 %v2782_v47, %v2593_v0  ;;  %3154 = vst [vmem:[#allocation5 + $0x268] sm:$0xff] %v2965_v61  ;;  %v6052_v2 = vmul.f32 %v5980_v15, %v6956_v13  ;;  %v2766_v30 = vld [vmem:[#allocation2 + $0x218] sm:$0xff]  ;;  %v6961_v47 = vld [vmem:[#allocation63_spill] sm:$0xff]  ;;  %v6093_v22 = vpop.permute.xlu1 %2452  ;;  %v6963_v61 = vld [vmem:[#allocation90_spill] sm:$0xff] }
 0x2fc   :  { %v6056_v51 = vmul.f32 %v5980_v15, %v6957_v12  ;;  %3155 = vst [vmem:[#allocation5 + $0x270] sm:$0xff] %v2966_v25  ;;  %3156 = vst [vmem:[#allocation5 + $0x278] sm:$0xff] %v2967_v26  ;;  %v6060_v52 = vmul.f32 %v5980_v15, %v6958_v16  ;;  %v6064_v54 = vmul.f32 %v5980_v15, %v6959_v45  ;;  %v6962_v0 = vld [vmem:[#allocation65_spill] sm:$0xff]  ;;  %v6964_v25 = vld [vmem:[#allocation92_spill] sm:$0xff] }
 0x2fd   :  { %3157 = vst [vmem:[#allocation5 + $0x280] sm:$0xff] %v2968_v17  ;;  %3158 = vst [vmem:[#allocation5 + $0x288] sm:$0xff] %v2969_v53  ;;  %v6068_v44 = vmul.f32 %v5980_v15, %v6960_v18  ;;  %v6072_v33 = vmul.f32 %v5980_v15, %v5238_v62  ;;  %v2573_v63 = vadd.f32 %v5989_v40, %v5936_v28  ;;  %v6965_v17 = vld [vmem:[#allocation161_spill] sm:$0xff]  ;;  %v2800_v13 = vld [vmem:[#allocation2 + $0x328] sm:$0xff] }
 0x2fe   :  { %3159 = vst [vmem:[#allocation5 + $0x290] sm:$0xff] %v2970_v50  ;;  %3160 = vst.msk [vmem:[#allocation5 + $0x298] sm:$0xff] %vm1056_vm2, %v2971_v36  ;;  %v2574_v10 = vadd.f32 %v5989_v40, %v5939_v41  ;;  %v2575_v62 = vadd.f32 %v5989_v40, %v5942_v5  ;;  %v2576_v15 = vadd.f32 %v5989_v40, %v5945_v57  ;;  %v6966_v50 = vld [vmem:[#allocation89_spill] sm:$0xff]  ;;  %v2801_v12 = vld [vmem:[#allocation2 + $0x330] sm:$0xff] }
 0x2ff   :  { %v2577_v3 = vadd.f32 %v5989_v40, %v5948_v32  ;;  %v2578_v23 = vadd.f32 %v5989_v40, %v5951_v24  ;;  %v2579_v48 = vadd.f32 %v5989_v40, %v5954_v60  ;;  %v2284_v28 = vmul.f32 %v6015_v1, %v6961_v47  ;;  %v2797_v24 = vld [vmem:[#allocation2 + $0x310] sm:$0xff]  ;;  %v2798_v60 = vld [vmem:[#allocation2 + $0x318] sm:$0xff]  ;;  %v2799_v40 = vld [vmem:[#allocation2 + $0x320] sm:$0xff] }
 0x300   :  { %v2951_v41 = vadd.f32 %v2762_v46, %v2573_v63  ;;  %v2952_v9 = vadd.f32 %v2763_v7, %v2574_v10  ;;  %v2953_v5 = vadd.f32 %v2764_v29, %v2575_v62  ;;  %v2954_v20 = vadd.f32 %v2765_v39, %v2576_v15  ;;  %v2802_v46 = vld [vmem:[#allocation2 + $0x338] sm:$0xff]  ;;  %v6967_v7 = vld [vmem:[#allocation55_spill] sm:$0xff]  ;;  %v6112_v39 = vpop.permute.xlu0 %2148 }
 0x301   :  { %v2955_v49 = vadd.f32 %v2766_v30, %v2577_v3  ;;  %v2956_v57 = vadd.f32 %v2767_v59, %v2578_v23  ;;  %v2957_v38 = vadd.f32 %v2768_v42, %v2579_v48  ;;  %v2285_v32 = vmul.f32 %v6015_v1, %v6962_v0  ;;  %v6114_v30 = vpop.permute.xlu1 %2442  ;;  %v2803_v59 = vld [vmem:[#allocation2 + $0x340] sm:$0xff]  ;;  %v6968_v3 = vld [vmem:[#allocation57_spill] sm:$0xff] }
 0x302   :  { %3140 = vst [vmem:[#allocation5 + $0x1f8] sm:$0xff] %v2951_v41  ;;  %3141 = vst [vmem:[#allocation5 + $0x200] sm:$0xff] %v2952_v9  ;;  %v2286_v4 = vmul.f32 %v6015_v1, %v6963_v61  ;;  %v2287_v26 = vmul.f32 %v6015_v1, %v6964_v25  ;;  %v2288_v53 = vmul.f32 %v6015_v1, %v6965_v17  ;;  %v6971_v0 = vld [vmem:[#allocation154_spill] sm:$0xff] }
 0x303   :  { %3142 = vst [vmem:[#allocation5 + $0x208] sm:$0xff] %v2953_v5  ;;  %3143 = vst [vmem:[#allocation5 + $0x210] sm:$0xff] %v2954_v20  ;;  %v2289_v36 = vmul.f32 %v6015_v1, %v6966_v50  ;;  %v2290_v16 = vmul.f32 %v5194_v34, %v6015_v1  ;;  %v2608_v45 = vadd.f32 %v6013_v6, %v2284_v28  ;;  %v2783_v5 = vld [vmem:[#allocation2 + $0x2a0] sm:$0xff]  ;;  %v2784_v20 = vld [vmem:[#allocation2 + $0x2a8] sm:$0xff] }
 0x304   :  { %3144 = vst [vmem:[#allocation5 + $0x218] sm:$0xff] %v2955_v49  ;;  %3145 = vst [vmem:[#allocation5 + $0x220] sm:$0xff] %v2956_v57  ;;  %v2609_v18 = vadd.f32 %v6013_v6, %v2285_v32  ;;  %v2270_v29 = vmul.f32 %v6048_v8, %v6967_v7  ;;  %v2610_v42 = vadd.f32 %v6013_v6, %v2286_v4  ;;  %v6969_v49 = vld [vmem:[#allocation78_spill] sm:$0xff]  ;;  %v6972_v4 = vld [vmem:[#allocation84_spill] sm:$0xff]  ;;  %v2139_v7 = vpop.permute.xlu0 %2138 }
 0x305   :  { %3146 = vst.msk [vmem:[#allocation5 + $0x228] sm:$0xff] %vm1056_vm2, %v2957_v38  ;;  %v2611_v63 = vadd.f32 %v6013_v6, %v2287_v26  ;;  %v2612_v10 = vadd.f32 %v6013_v6, %v2288_v53  ;;  %v2613_v34 = vadd.f32 %v6013_v6, %v2289_v36  ;;  %v2614_v1 = vadd.f32 %v6013_v6, %v2290_v16  ;;  %v6970_v38 = vld [vmem:[#allocation80_spill] sm:$0xff]  ;;  %v2787_v61 = vld [vmem:[#allocation2 + $0x2c0] sm:$0xff]  ;;  %v6973_v26 = vld [vmem:[#allocation167_spill] sm:$0xff] }
 0x306   :  { %v2986_v62 = vadd.f32 %v2797_v24, %v2608_v45  ;;  %v2987_v15 = vadd.f32 %v2798_v60, %v2609_v18  ;;  %v2271_v23 = vmul.f32 %v6048_v8, %v6968_v3  ;;  %v2988_v48 = vadd.f32 %v2799_v40, %v2610_v42  ;;  %v6129_v24 = vpop.permute.xlu1 %2143  ;;  %v2785_v60 = vld [vmem:[#allocation2 + $0x2b0] sm:$0xff]  ;;  %v2786_v40 = vld [vmem:[#allocation2 + $0x2b8] sm:$0xff]  ;;  %v2788_v36 = vld [vmem:[#allocation2 + $0x2c8] sm:$0xff] }
 0x307   :  { %v2989_v47 = vadd.f32 %v2800_v13, %v2611_v63  ;;  %v2990_v28 = vadd.f32 %v2801_v12, %v2612_v10  ;;  %v2991_v41 = vadd.f32 %v2802_v46, %v2613_v34  ;;  %v2992_v9 = vadd.f32 %v2803_v59, %v2614_v1  ;;  %v2789_v13 = vld [vmem:[#allocation2 + $0x2d0] sm:$0xff]  ;;  %v6974_v45 = vld [vmem:[#allocation83_spill] sm:$0xff]  ;;  %v6975_v1 = vld [vmem:[#allocation86_spill] sm:$0xff] }
 0x308   :  { %3175 = vst [vmem:[#allocation5 + $0x310] sm:$0xff] %v2986_v62  ;;  %3176 = vst [vmem:[#allocation5 + $0x318] sm:$0xff] %v2987_v15  ;;  %v2272_v57 = vmul.f32 %v6048_v8, %v6969_v49  ;;  %v2273_v6 = vmul.f32 %v6048_v8, %v6970_v38  ;;  %v2274_v32 = vmul.f32 %v6048_v8, %v6971_v0  ;;  %v2806_v38 = vld [vmem:[#allocation2 + $0x358] sm:$0xff]  ;;  %v2808_v0 = vld [vmem:[#allocation2 + $0x368] sm:$0xff] }
 0x309   :  { %3177 = vst [vmem:[#allocation5 + $0x320] sm:$0xff] %v2988_v48  ;;  %3178 = vst [vmem:[#allocation5 + $0x328] sm:$0xff] %v2989_v47  ;;  %v2275_v25 = vmul.f32 %v6048_v8, %v6972_v4  ;;  %v2276_v17 = vmul.f32 %v6048_v8, %v6973_v26  ;;  %v2594_v53 = vadd.f32 %v6074_v37, %v2270_v29  ;;  %v6977_v47 = vld [vmem:[#allocation117_spill] sm:$0xff]  ;;  %v6979_v26 = vld [vmem:[#allocation75_spill] sm:$0xff] }
 0x30a   :  { %3179 = vst [vmem:[#allocation5 + $0x330] sm:$0xff] %v2990_v28  ;;  %3180 = vst [vmem:[#allocation5 + $0x338] sm:$0xff] %v2991_v41  ;;  %v2595_v50 = vadd.f32 %v6074_v37, %v2271_v23  ;;  %v2596_v12 = vadd.f32 %v6074_v37, %v2272_v57  ;;  %v2597_v46 = vadd.f32 %v6074_v37, %v2273_v6  ;;  %v6976_v23 = vld [vmem:[#allocation115_spill] sm:$0xff]  ;;  %v2805_v41 = vld [vmem:[#allocation2 + $0x350] sm:$0xff] }
 0x30b   :  { %3181 = vst.msk [vmem:[#allocation5 + $0x340] sm:$0xff] %vm1056_vm2, %v2992_v9  ;;  %v2598_v16 = vadd.f32 %v6074_v37, %v2274_v32  ;;  %v6143_v18 = vmul.f32 %v6112_v39, %v6974_v45  ;;  %v2599_v8 = vadd.f32 %v6074_v37, %v2275_v25  ;;  %v2600_v29 = vadd.f32 %v6074_v37, %v2276_v17  ;;  %v2804_v28 = vld [vmem:[#allocation2 + $0x348] sm:$0xff]  ;;  %v6159_v9 = vpop.permute.xlu1 %2133  ;;  %v2807_v6 = vld [vmem:[#allocation2 + $0x360] sm:$0xff]  ;;  %v6983_v45 = vld [vmem:[#allocation108_spill] sm:$0xff] }
 0x30c   :  { %v2972_v59 = vadd.f32 %v2783_v5, %v2594_v53  ;;  %v2973_v42 = vadd.f32 %v2784_v20, %v2595_v50  ;;  %v2974_v63 = vadd.f32 %v2785_v60, %v2596_v12  ;;  %v2975_v10 = vadd.f32 %v2786_v40, %v2597_v46  ;;  %v6978_v5 = vld [vmem:[#allocation169_spill] sm:$0xff]  ;;  %v2809_v60 = vld [vmem:[#allocation2 + $0x370] sm:$0xff] }
 0x30d   :  { %v2976_v34 = vadd.f32 %v2787_v61, %v2598_v16  ;;  %v6149_v62 = vmul.f32 %v6112_v39, %v6975_v1  ;;  %v2977_v15 = vadd.f32 %v2788_v36, %v2599_v8  ;;  %v2978_v3 = vadd.f32 %v2789_v13, %v2600_v29  ;;  %v2810_v40 = vld [vmem:[#allocation2 + $0x378] sm:$0xff] }
 0x30e   :  { %3161 = vst [vmem:[#allocation5 + $0x2a0] sm:$0xff] %v2972_v59  ;;  %3162 = vst [vmem:[#allocation5 + $0x2a8] sm:$0xff] %v2973_v42  ;;  %v6153_v48 = vmul.f32 %v6112_v39, %v6976_v23  ;;  %v6157_v37 = vmul.f32 %v6112_v39, %v6977_v47  ;;  %v6163_v20 = vmul.f32 %v6112_v39, %v6978_v5  ;;  %v6984_v29 = vld [vmem:[#allocation165_spill] sm:$0xff]  ;;  %v2796_v23 = vld [vmem:[#allocation2 + $0x308] sm:$0xff] }
 0x30f   :  { %3163 = vst [vmem:[#allocation5 + $0x2b0] sm:$0xff] %v2974_v63  ;;  %3164 = vst [vmem:[#allocation5 + $0x2b8] sm:$0xff] %v2975_v10  ;;  %v6167_v49 = vmul.f32 %v6112_v39, %v5240_v19  ;;  %v6171_v57 = vmul.f32 %v5305_v11, %v6112_v39  ;;  %v2615_v32 = vadd.f32 %v6093_v22, %v5997_v35  ;;  %v2791_v63 = vld [vmem:[#allocation2 + $0x2e0] sm:$0xff]  ;;  %v2792_v10 = vld [vmem:[#allocation2 + $0x2e8] sm:$0xff]  ;;  %v6211_v1 = vpop.permute.xlu1 %2472 }
 0x310   :  { %3165 = vst [vmem:[#allocation5 + $0x2c0] sm:$0xff] %v2976_v34  ;;  %3166 = vst [vmem:[#allocation5 + $0x2c8] sm:$0xff] %v2977_v15  ;;  %v2616_v61 = vadd.f32 %v6093_v22, %v6003_v56  ;;  %v2617_v19 = vadd.f32 %v6093_v22, %v6007_v27  ;;  %v2618_v11 = vadd.f32 %v6093_v22, %v6011_v21  ;;  %v6191_v56 = vpop.permute.xlu0 %2467  ;;  %v2793_v34 = vld [vmem:[#allocation2 + $0x2f0] sm:$0xff]  ;;  %v2794_v15 = vld [vmem:[#allocation2 + $0x2f8] sm:$0xff] }
 0x311   :  { %3167 = vst.msk [vmem:[#allocation5 + $0x2d0] sm:$0xff] %vm1056_vm2, %v2978_v3  ;;  %v2619_v39 = vadd.f32 %v6093_v22, %v6019_v31  ;;  %v2620_v35 = vadd.f32 %v6093_v22, %v6023_v14  ;;  %v2621_v4 = vadd.f32 %v6093_v22, %v6027_v55  ;;  %v2993_v25 = vadd.f32 %v2804_v28, %v2615_v32  ;;  %v6980_v31 = vld [vmem:[#allocation77_spill] sm:$0xff]  ;;  %v6981_v14 = vld [vmem:[#allocation106_spill] sm:$0xff] }
 0x312   :  { %v6189_v17 = vmul.f32 %v2139_v7, %v6979_v26  ;;  %v2994_v53 = vadd.f32 %v2805_v41, %v2616_v61  ;;  %v2995_v27 = vadd.f32 %v2806_v38, %v2617_v19  ;;  %v2996_v50 = vadd.f32 %v2807_v6, %v2618_v11  ;;  %v2790_v55 = vld [vmem:[#allocation2 + $0x2d8] sm:$0xff]  ;;  %v2795_v3 = vld [vmem:[#allocation2 + $0x300] sm:$0xff]  ;;  %v6985_v6 = vld [vmem:[#allocation79_spill] sm:$0xff] }
 0x313   :  { %v2997_v36 = vadd.f32 %v2808_v0, %v2619_v39  ;;  %v2998_v21 = vadd.f32 %v2809_v60, %v2620_v35  ;;  %v2999_v13 = vadd.f32 %v2810_v40, %v2621_v4  ;;  %3182 = vst [vmem:[#allocation5 + $0x348] sm:$0xff] %v2993_v25  ;;  %v6194_v12 = vmul.f32 %v2139_v7, %v6980_v31  ;;  %v6982_v22 = vld [vmem:[#allocation109_spill] sm:$0xff]  ;;  %v6987_v11 = vld [vmem:[#allocation111_spill] sm:$0xff]  ;;  %v6989_v25 = vld [vmem:[#allocation166_spill] sm:$0xff] }
 0x314   :  { %v6197_v46 = vmul.f32 %v2139_v7, %v6981_v14  ;;  %3183 = vst [vmem:[#allocation5 + $0x350] sm:$0xff] %v2994_v53  ;;  %3184 = vst [vmem:[#allocation5 + $0x358] sm:$0xff] %v2995_v27  ;;  %v6200_v16 = vmul.f32 %v2139_v7, %v6982_v22  ;;  %v6203_v8 = vmul.f32 %v2139_v7, %v6983_v45  ;;  %v6986_v19 = vld [vmem:[#allocation81_spill] sm:$0xff]  ;;  %v6990_v53 = vld [vmem:[#allocation168_spill] sm:$0xff] }
 0x315   :  { %3185 = vst [vmem:[#allocation5 + $0x360] sm:$0xff] %v2996_v50  ;;  %3186 = vst [vmem:[#allocation5 + $0x368] sm:$0xff] %v2997_v36  ;;  %v6206_v59 = vmul.f32 %v2139_v7, %v6984_v29  ;;  %v6209_v42 = vmul.f32 %v2139_v7, %v5315_v43  ;;  %v2601_v47 = vadd.f32 %v6114_v30, %v6046_v58  ;;  %v6988_v35 = vld [vmem:[#allocation113_spill] sm:$0xff]  ;;  %v2828_v50 = vld [vmem:[#allocation2 + $0x408] sm:$0xff]  ;;  %v6249_v29 = vpop.permute.xlu1 %2462 }
 0x316   :  { %3187 = vst [vmem:[#allocation5 + $0x370] sm:$0xff] %v2998_v21  ;;  %3188 = vst.msk [vmem:[#allocation5 + $0x378] sm:$0xff] %vm1056_vm2, %v2999_v13  ;;  %v2602_v28 = vadd.f32 %v6114_v30, %v6052_v2  ;;  %v2603_v43 = vadd.f32 %v6114_v30, %v6056_v51  ;;  %v2604_v7 = vadd.f32 %v6114_v30, %v6060_v52  ;;  %v6230_v51 = vpop.permute.xlu0 %2457  ;;  %v2829_v36 = vld [vmem:[#allocation2 + $0x410] sm:$0xff]  ;;  %v2830_v21 = vld [vmem:[#allocation2 + $0x418] sm:$0xff] }
 0x317   :  { %v2605_v41 = vadd.f32 %v6114_v30, %v6064_v54  ;;  %v2606_v5 = vadd.f32 %v6114_v30, %v6068_v44  ;;  %v2607_v38 = vadd.f32 %v6114_v30, %v6072_v33  ;;  %v2312_v58 = vmul.f32 %v6129_v24, %v6985_v6  ;;  %v2825_v44 = vld [vmem:[#allocation2 + $0x3f0] sm:$0xff]  ;;  %v2826_v33 = vld [vmem:[#allocation2 + $0x3f8] sm:$0xff]  ;;  %v2827_v30 = vld [vmem:[#allocation2 + $0x400] sm:$0xff] }
 0x318   :  { %v2979_v0 = vadd.f32 %v2790_v55, %v2601_v47  ;;  %v2980_v2 = vadd.f32 %v2791_v63, %v2602_v28  ;;  %v2981_v32 = vadd.f32 %v2792_v10, %v2603_v43  ;;  %v2982_v60 = vadd.f32 %v2793_v34, %v2604_v7  ;;  %v6991_v13 = vld [vmem:[#allocation170_spill] sm:$0xff]  ;;  %v6992_v22 = vld [vmem:[#allocation71_spill] sm:$0xff]  ;;  %v6993_v28 = vld [vmem:[#allocation73_spill] sm:$0xff] }
 0x319   :  { %v2983_v40 = vadd.f32 %v2794_v15, %v2605_v41  ;;  %v2984_v52 = vadd.f32 %v2795_v3, %v2606_v5  ;;  %v2985_v61 = vadd.f32 %v2796_v23, %v2607_v38  ;;  %v2313_v54 = vmul.f32 %v6129_v24, %v6986_v19  ;;  %v2831_v63 = vld [vmem:[#allocation2 + $0x420] sm:$0xff]  ;;  %v2813_v19 = vld [vmem:[#allocation2 + $0x390] sm:$0xff] }
 0x31a   :  { %3168 = vst [vmem:[#allocation5 + $0x2d8] sm:$0xff] %v2979_v0  ;;  %3169 = vst [vmem:[#allocation5 + $0x2e0] sm:$0xff] %v2980_v2  ;;  %v2314_v39 = vmul.f32 %v6129_v24, %v6987_v11  ;;  %v2315_v4 = vmul.f32 %v6129_v24, %v6988_v35  ;;  %v2316_v26 = vmul.f32 %v6129_v24, %v6989_v25  ;;  %v2159_v6 = vpop.permute.xlu0 %2158  ;;  %v2811_v0 = vld [vmem:[#allocation2 + $0x380] sm:$0xff]  ;;  %v2812_v2 = vld [vmem:[#allocation2 + $0x388] sm:$0xff] }
 0x31b   :  { %3170 = vst [vmem:[#allocation5 + $0x2e8] sm:$0xff] %v2981_v32  ;;  %3171 = vst [vmem:[#allocation5 + $0x2f0] sm:$0xff] %v2982_v60  ;;  %v2317_v27 = vmul.f32 %v6129_v24, %v6990_v53  ;;  %v2318_v31 = vmul.f32 %v6991_v13, %v6129_v24  ;;  %v2636_v14 = vadd.f32 %v6191_v56, %v2312_v58  ;;  %v6994_v32 = vld [vmem:[#allocation102_spill] sm:$0xff]  ;;  %v6998_v11 = vld [vmem:[#allocation172_spill] sm:$0xff]  ;;  %v6277_v13 = vpop.permute.xlu1 %2153 }
 0x31c   :  { %3172 = vst [vmem:[#allocation5 + $0x2f8] sm:$0xff] %v2983_v40  ;;  %3173 = vst [vmem:[#allocation5 + $0x300] sm:$0xff] %v2984_v52  ;;  %v2637_v55 = vadd.f32 %v6191_v56, %v2313_v54  ;;  %v2298_v45 = vmul.f32 %v6159_v9, %v6992_v22  ;;  %v2638_v10 = vadd.f32 %v6191_v56, %v2314_v39  ;;  %v6995_v40 = vld [vmem:[#allocation104_spill] sm:$0xff]  ;;  %v2814_v54 = vld [vmem:[#allocation2 + $0x398] sm:$0xff] }
 0x31d   :  { %3174 = vst.msk [vmem:[#allocation5 + $0x308] sm:$0xff] %vm1056_vm2, %v2985_v61  ;;  %v2639_v34 = vadd.f32 %v6191_v56, %v2315_v4  ;;  %v2640_v15 = vadd.f32 %v6191_v56, %v2316_v26  ;;  %v2641_v3 = vadd.f32 %v6191_v56, %v2317_v27  ;;  %v2642_v24 = vadd.f32 %v6191_v56, %v2318_v31  ;;  %v6996_v52 = vld [vmem:[#allocation164_spill] sm:$0xff]  ;;  %v2816_v25 = vld [vmem:[#allocation2 + $0x3a8] sm:$0xff] }
 0x31e   :  { %v3014_v23 = vadd.f32 %v2825_v44, %v2636_v14  ;;  %v3015_v47 = vadd.f32 %v2826_v33, %v2637_v55  ;;  %v2299_v43 = vmul.f32 %v6159_v9, %v6993_v28  ;;  %v3016_v7 = vadd.f32 %v2827_v30, %v2638_v10  ;;  %v2815_v44 = vld [vmem:[#allocation2 + $0x3a0] sm:$0xff]  ;;  %v6997_v33 = vld [vmem:[#allocation101_spill] sm:$0xff]  ;;  %v2817_v26 = vld [vmem:[#allocation2 + $0x3b0] sm:$0xff] }
 0x31f   :  { %v3017_v41 = vadd.f32 %v2828_v50, %v2639_v34  ;;  %v3018_v5 = vadd.f32 %v2829_v36, %v2640_v15  ;;  %v3019_v38 = vadd.f32 %v2830_v21, %v2641_v3  ;;  %v3020_v58 = vadd.f32 %v2831_v63, %v2642_v24  ;;  %v6999_v36 = vld [vmem:[#allocation95_spill] sm:$0xff]  ;;  %v7000_v10 = vld [vmem:[#allocation98_spill] sm:$0xff] }
 0x320   :  { %3203 = vst [vmem:[#allocation5 + $0x3f0] sm:$0xff] %v3014_v23  ;;  %3204 = vst [vmem:[#allocation5 + $0x3f8] sm:$0xff] %v3015_v47  ;;  %v2300_v60 = vmul.f32 %v6159_v9, %v6994_v32  ;;  %v2301_v56 = vmul.f32 %v6159_v9, %v6995_v40  ;;  %v2302_v61 = vmul.f32 %v6159_v9, %v6996_v52  ;;  %v7001_v24 = vld [vmem:[#allocation123_spill] sm:$0xff]  ;;  %v7002_v47 = vld [vmem:[#allocation125_spill] sm:$0xff] }
 0x321   :  { %3205 = vst [vmem:[#allocation5 + $0x400] sm:$0xff] %v3016_v7  ;;  %3206 = vst [vmem:[#allocation5 + $0x408] sm:$0xff] %v3017_v41  ;;  %v2303_v30 = vmul.f32 %v6159_v9, %v6997_v33  ;;  %v2304_v39 = vmul.f32 %v6159_v9, %v6998_v11  ;;  %v2622_v35 = vadd.f32 %v6230_v51, %v2298_v45  ;;  %v2169_v7 = vpop.permute.xlu0 %2168  ;;  %v7003_v41 = vld [vmem:[#allocation174_spill] sm:$0xff]  ;;  %v2834_v32 = vld [vmem:[#allocation2 + $0x438] sm:$0xff] }
 0x322   :  { %3207 = vst [vmem:[#allocation5 + $0x410] sm:$0xff] %v3018_v5  ;;  %3208 = vst [vmem:[#allocation5 + $0x418] sm:$0xff] %v3019_v38  ;;  %v2623_v4 = vadd.f32 %v6230_v51, %v2299_v43  ;;  %v2624_v53 = vadd.f32 %v6230_v51, %v2300_v60  ;;  %v2625_v27 = vadd.f32 %v6230_v51, %v2301_v56  ;;  %v2832_v43 = vld [vmem:[#allocation2 + $0x428] sm:$0xff]  ;;  %v2835_v60 = vld [vmem:[#allocation2 + $0x440] sm:$0xff] }
 0x323   :  { %3209 = vst.msk [vmem:[#allocation5 + $0x420] sm:$0xff] %vm1056_vm2, %v3020_v58  ;;  %v2626_v50 = vadd.f32 %v6230_v51, %v2302_v61  ;;  %v6275_v21 = vmul.f32 %v2159_v6, %v6999_v36  ;;  %v2627_v9 = vadd.f32 %v6230_v51, %v2303_v30  ;;  %v2628_v31 = vadd.f32 %v6230_v51, %v2304_v39  ;;  %v2833_v51 = vld [vmem:[#allocation2 + $0x430] sm:$0xff]  ;;  %v7004_v38 = vld [vmem:[#allocation175_spill] sm:$0xff]  ;;  %v2838_v61 = vld [vmem:[#allocation2 + $0x458] sm:$0xff] }
 0x324   :  { %v3000_v14 = vadd.f32 %v2811_v0, %v2622_v35  ;;  %v3001_v55 = vadd.f32 %v2812_v2, %v2623_v4  ;;  %v3002_v22 = vadd.f32 %v2813_v19, %v2624_v53  ;;  %v3003_v45 = vadd.f32 %v2814_v54, %v2625_v27  ;;  %v7005_v0 = vld [vmem:[#allocation182_spill] sm:$0xff]  ;;  %v2836_v40 = vld [vmem:[#allocation2 + $0x448] sm:$0xff]  ;;  %v2837_v52 = vld [vmem:[#allocation2 + $0x450] sm:$0xff] }
 0x325   :  { %v3004_v63 = vadd.f32 %v2815_v44, %v2626_v50  ;;  %v6282_v34 = vmul.f32 %v2159_v6, %v7000_v10  ;;  %v3005_v15 = vadd.f32 %v2816_v25, %v2627_v9  ;;  %v3006_v3 = vadd.f32 %v2817_v26, %v2628_v31  ;;  %v7006_v11 = vld [vmem:[#allocation12_spill] sm:$0xff]  ;;  %v7011_v31 = vld [vmem:[#allocation183_spill] sm:$0xff] }
 0x326   :  { %3189 = vst [vmem:[#allocation5 + $0x380] sm:$0xff] %v3000_v14  ;;  %3190 = vst [vmem:[#allocation5 + $0x388] sm:$0xff] %v3001_v55  ;;  %v6285_v23 = vmul.f32 %v2159_v6, %v7001_v24  ;;  %v6288_v28 = vmul.f32 %v2159_v6, %v7002_v47  ;;  %v6291_v5 = vmul.f32 %v2159_v6, %v7003_v41  ;;  %v7010_v36 = vld [vmem:[#allocation180_spill] sm:$0xff]  ;;  %v7012_v55 = vld [vmem:[#allocation181_spill] sm:$0xff] }
 0x327   :  { %3191 = vst [vmem:[#allocation5 + $0x390] sm:$0xff] %v3002_v22  ;;  %3192 = vst [vmem:[#allocation5 + $0x398] sm:$0xff] %v3003_v45  ;;  %v6294_v58 = vmul.f32 %v2159_v6, %v7004_v38  ;;  %v6297_v2 = vmul.f32 %v2159_v6, %v7005_v0  ;;  %v2643_v56 = vadd.f32 %v6211_v1, %v6143_v18  ;;  %v2819_v45 = vld [vmem:[#allocation2 + $0x3c0] sm:$0xff]  ;;  %v2821_v10 = vld [vmem:[#allocation2 + $0x3d0] sm:$0xff] }
 0x328   :  { %3193 = vst [vmem:[#allocation5 + $0x3a0] sm:$0xff] %v3004_v63  ;;  %3194 = vst [vmem:[#allocation5 + $0x3a8] sm:$0xff] %v3005_v15  ;;  %v2644_v19 = vadd.f32 %v6211_v1, %v6149_v62  ;;  %v2645_v54 = vadd.f32 %v6211_v1, %v6153_v48  ;;  %v2646_v6 = vadd.f32 %v6211_v1, %v6157_v37  ;;  %v6317_v62 = vpop.permute.xlu1 %2163  ;;  %v2820_v63 = vld [vmem:[#allocation2 + $0x3c8] sm:$0xff]  ;;  %v2822_v15 = vld [vmem:[#allocation2 + $0x3d8] sm:$0xff] }
 0x329   :  { %3195 = vst.msk [vmem:[#allocation5 + $0x3b0] sm:$0xff] %vm1056_vm2, %v3006_v3  ;;  %v2647_v44 = vadd.f32 %v6211_v1, %v6163_v20  ;;  %v2648_v18 = vadd.f32 %v6211_v1, %v6167_v49  ;;  %v2649_v33 = vadd.f32 %v6211_v1, %v6171_v57  ;;  %v3021_v30 = vadd.f32 %v2832_v43, %v2643_v56  ;;  %v7007_v20 = vld [vmem:[#allocation14_spill] sm:$0xff]  ;;  %v7008_v49 = vld [vmem:[#allocation131_spill] sm:$0xff]  ;;  %v2818_v57 = vld [vmem:[#allocation2 + $0x3b8] sm:$0xff] }
 0x32a   :  { %v6315_v39 = vmul.f32 %v2169_v7, %v7006_v11  ;;  %v3022_v35 = vadd.f32 %v2833_v51, %v2644_v19  ;;  %v3023_v48 = vadd.f32 %v2834_v32, %v2645_v54  ;;  %v3024_v4 = vadd.f32 %v2835_v60, %v2646_v6  ;;  %v7009_v1 = vld [vmem:[#allocation133_spill] sm:$0xff]  ;;  %v2823_v3 = vld [vmem:[#allocation2 + $0x3e0] sm:$0xff]  ;;  %v2824_v24 = vld [vmem:[#allocation2 + $0x3e8] sm:$0xff]  ;;  %v2478_v19 = vpop.permute.xlu0 %2477 }
 0x32b   :  { %v3025_v25 = vadd.f32 %v2836_v40, %v2647_v44  ;;  %v3026_v37 = vadd.f32 %v2837_v52, %v2648_v18  ;;  %v3027_v26 = vadd.f32 %v2838_v61, %v2649_v33  ;;  %3210 = vst [vmem:[#allocation5 + $0x428] sm:$0xff] %v3021_v30  ;;  %v6320_v53 = vmul.f32 %v2169_v7, %v7007_v20  ;;  %v7013_v32 = vld [vmem:[#allocation91_spill] sm:$0xff]  ;;  %v7016_v18 = vld [vmem:[#allocation121_spill] sm:$0xff] }
 0x32c   :  { %v6323_v27 = vmul.f32 %v2169_v7, %v7008_v49  ;;  %3211 = vst [vmem:[#allocation5 + $0x430] sm:$0xff] %v3022_v35  ;;  %3212 = vst [vmem:[#allocation5 + $0x438] sm:$0xff] %v3023_v48  ;;  %v6326_v50 = vmul.f32 %v2169_v7, %v7009_v1  ;;  %v6329_v9 = vmul.f32 %v2169_v7, %v7010_v36  ;;  %v7015_v6 = vld [vmem:[#allocation119_spill] sm:$0xff]  ;;  %v7018_v35 = vld [vmem:[#allocation173_spill] sm:$0xff] }
 0x32d   :  { %3213 = vst [vmem:[#allocation5 + $0x440] sm:$0xff] %v3024_v4  ;;  %3214 = vst [vmem:[#allocation5 + $0x448] sm:$0xff] %v3025_v25  ;;  %v6332_v14 = vmul.f32 %v2169_v7, %v7011_v31  ;;  %v6335_v22 = vmul.f32 %v7012_v55, %v2169_v7  ;;  %v2629_v47 = vadd.f32 %v6249_v29, %v6189_v17  ;;  %v7017_v30 = vld [vmem:[#allocation171_spill] sm:$0xff]  ;;  %v2842_v4 = vld [vmem:[#allocation2 + $0x478] sm:$0xff] }
 0x32e   :  { %3215 = vst [vmem:[#allocation5 + $0x450] sm:$0xff] %v3026_v37  ;;  %3216 = vst.msk [vmem:[#allocation5 + $0x458] sm:$0xff] %vm1056_vm2, %v3027_v26  ;;  %v2630_v43 = vadd.f32 %v6249_v29, %v6194_v12  ;;  %v2631_v51 = vadd.f32 %v6249_v29, %v6197_v46  ;;  %v2632_v7 = vadd.f32 %v6249_v29, %v6200_v16  ;;  %v6354_v46 = vpop.permute.xlu1 %2482  ;;  %v2843_v25 = vld [vmem:[#allocation2 + $0x480] sm:$0xff]  ;;  %v2844_v37 = vld [vmem:[#allocation2 + $0x488] sm:$0xff] }
 0x32f   :  { %v2633_v41 = vadd.f32 %v6249_v29, %v6203_v8  ;;  %v2634_v38 = vadd.f32 %v6249_v29, %v6206_v59  ;;  %v2635_v0 = vadd.f32 %v6249_v29, %v6209_v42  ;;  %v2326_v17 = vmul.f32 %v6277_v13, %v7013_v32  ;;  %v7014_v8 = vld [vmem:[#allocation93_spill] sm:$0xff]  ;;  %v2839_v59 = vld [vmem:[#allocation2 + $0x460] sm:$0xff]  ;;  %v2840_v42 = vld [vmem:[#allocation2 + $0x468] sm:$0xff]  ;;  %v2488_v32 = vpop.permute.xlu0 %2487 }
 0x330   :  { %v3007_v60 = vadd.f32 %v2818_v57, %v2629_v47  ;;  %v3008_v12 = vadd.f32 %v2819_v45, %v2630_v43  ;;  %v3009_v40 = vadd.f32 %v2820_v63, %v2631_v51  ;;  %v3010_v56 = vadd.f32 %v2821_v10, %v2632_v7  ;;  %v2841_v29 = vld [vmem:[#allocation2 + $0x470] sm:$0xff]  ;;  %v7019_v26 = vld [vmem:[#allocation178_spill] sm:$0xff] }
 0x331   :  { %v3011_v52 = vadd.f32 %v2822_v15, %v2633_v41  ;;  %v3012_v16 = vadd.f32 %v2823_v3, %v2634_v38  ;;  %v3013_v61 = vadd.f32 %v2824_v24, %v2635_v0  ;;  %v2327_v54 = vmul.f32 %v6277_v13, %v7014_v8  ;;  %v7020_v1 = vld [vmem:[#allocation8_spill] sm:$0xff]  ;;  %v7021_v47 = vld [vmem:[#allocation10_spill] sm:$0xff]  ;;  %v2856_v8 = vld [vmem:[#allocation2 + $0x4e8] sm:$0xff] }
 0x332   :  { %3196 = vst [vmem:[#allocation5 + $0x3b8] sm:$0xff] %v3007_v60  ;;  %3197 = vst [vmem:[#allocation5 + $0x3c0] sm:$0xff] %v3008_v12  ;;  %v2328_v44 = vmul.f32 %v6277_v13, %v7015_v6  ;;  %v2329_v33 = vmul.f32 %v6277_v13, %v7016_v18  ;;  %v2330_v11 = vmul.f32 %v6277_v13, %v7017_v30  ;;  %v2845_v31 = vld [vmem:[#allocation2 + $0x490] sm:$0xff]  ;;  %v6373_v38 = vpop.permute.xlu1 %2492  ;;  %v2854_v60 = vld [vmem:[#allocation2 + $0x4d8] sm:$0xff] }
 0x333   :  { %3198 = vst [vmem:[#allocation5 + $0x3c8] sm:$0xff] %v3009_v40  ;;  %3199 = vst [vmem:[#allocation5 + $0x3d0] sm:$0xff] %v3010_v56  ;;  %v2331_v48 = vmul.f32 %v6277_v13, %v7018_v35  ;;  %v2332_v20 = vmul.f32 %v6277_v13, %v7019_v26  ;;  %v2650_v49 = vadd.f32 %v2478_v19, %v2326_v17  ;;  %v2853_v17 = vld [vmem:[#allocation2 + $0x4d0] sm:$0xff]  ;;  %v7022_v12 = vld [vmem:[#allocation127_spill] sm:$0xff] }
 0x334   :  { %3200 = vst [vmem:[#allocation5 + $0x3d8] sm:$0xff] %v3011_v52  ;;  %3201 = vst [vmem:[#allocation5 + $0x3e0] sm:$0xff] %v3012_v16  ;;  %v2651_v57 = vadd.f32 %v2478_v19, %v2327_v54  ;;  %v2340_v36 = vmul.f32 %v6317_v62, %v7020_v1  ;;  %v2652_v55 = vadd.f32 %v2478_v19, %v2328_v44  ;;  %v7023_v56 = vld [vmem:[#allocation129_spill] sm:$0xff]  ;;  %v2857_v54 = vld [vmem:[#allocation2 + $0x4f0] sm:$0xff] }
 0x335   :  { %3202 = vst.msk [vmem:[#allocation5 + $0x3e8] sm:$0xff] %vm1056_vm2, %v3013_v61  ;;  %v2653_v45 = vadd.f32 %v2478_v19, %v2329_v33  ;;  %v2654_v63 = vadd.f32 %v2478_v19, %v2330_v11  ;;  %v2655_v10 = vadd.f32 %v2478_v19, %v2331_v48  ;;  %v2656_v15 = vadd.f32 %v2478_v19, %v2332_v20  ;;  %v7024_v16 = vld [vmem:[#allocation177_spill] sm:$0xff]  ;;  %v2855_v19 = vld [vmem:[#allocation2 + $0x4e0] sm:$0xff] }
 0x336   :  { %v3028_v3 = vadd.f32 %v2839_v59, %v2650_v49  ;;  %v3029_v24 = vadd.f32 %v2840_v42, %v2651_v57  ;;  %v2341_v43 = vmul.f32 %v6317_v62, %v7021_v47  ;;  %v3030_v51 = vadd.f32 %v2841_v29, %v2652_v55  ;;  %v7025_v59 = vld [vmem:[#allocation179_spill] sm:$0xff]  ;;  %v7026_v29 = vld [vmem:[#allocation176_spill] sm:$0xff]  ;;  %v2858_v33 = vld [vmem:[#allocation2 + $0x4f8] sm:$0xff] }
 0x337   :  { %v3031_v7 = vadd.f32 %v2842_v4, %v2653_v45  ;;  %v3032_v41 = vadd.f32 %v2843_v25, %v2654_v63  ;;  %v3033_v13 = vadd.f32 %v2844_v37, %v2655_v10  ;;  %v3034_v0 = vadd.f32 %v2845_v31, %v2656_v15  ;;  %v2859_v30 = vld [vmem:[#allocation2 + $0x500] sm:$0xff]  ;;  %v2846_v49 = vld [vmem:[#allocation2 + $0x498] sm:$0xff]  ;;  %v2848_v31 = vld [vmem:[#allocation2 + $0x4a8] sm:$0xff] }
 0x338   :  { %3217 = vst [vmem:[#allocation5 + $0x460] sm:$0xff] %v3028_v3  ;;  %3218 = vst [vmem:[#allocation5 + $0x468] sm:$0xff] %v3029_v24  ;;  %v2342_v40 = vmul.f32 %v6317_v62, %v7022_v12  ;;  %v2343_v52 = vmul.f32 %v6317_v62, %v7023_v56  ;;  %v2344_v61 = vmul.f32 %v6317_v62, %v7024_v16  ;;  %v2849_v55 = vld [vmem:[#allocation2 + $0x4b0] sm:$0xff]  ;;  %v2850_v15 = vld [vmem:[#allocation2 + $0x4b8] sm:$0xff] }
 0x339   :  { %3219 = vst [vmem:[#allocation5 + $0x470] sm:$0xff] %v3030_v51  ;;  %3220 = vst [vmem:[#allocation5 + $0x478] sm:$0xff] %v3031_v7  ;;  %v2345_v42 = vmul.f32 %v6317_v62, %v7025_v59  ;;  %v2346_v6 = vmul.f32 %v7026_v29, %v6317_v62  ;;  %v2664_v44 = vadd.f32 %v2488_v32, %v2340_v36  ;;  %v2847_v36 = vld [vmem:[#allocation2 + $0x4a0] sm:$0xff]  ;;  %v2852_v3 = vld [vmem:[#allocation2 + $0x4c8] sm:$0xff]  ;;  %v6396_v51 = vpop.permute.xlu0 %2178 }
 0x33a   :  { %3221 = vst [vmem:[#allocation5 + $0x480] sm:$0xff] %v3032_v41  ;;  %3222 = vst [vmem:[#allocation5 + $0x488] sm:$0xff] %v3033_v13  ;;  %v2665_v18 = vadd.f32 %v2488_v32, %v2341_v43  ;;  %v2666_v11 = vadd.f32 %v2488_v32, %v2342_v40  ;;  %v2667_v35 = vadd.f32 %v2488_v32, %v2343_v52  ;;  %v6394_v43 = vpop.permute.xlu1 %2173  ;;  %v2864_v52 = vld [vmem:[#allocation2 + $0x528] sm:$0xff]  ;;  %v2866_v16 = vld [vmem:[#allocation2 + $0x538] sm:$0xff] }
 0x33b   :  { %3223 = vst.msk [vmem:[#allocation5 + $0x490] sm:$0xff] %vm1056_vm2, %v3034_v0  ;;  %v2668_v48 = vadd.f32 %v2488_v32, %v2344_v61  ;;  %v2657_v4 = vadd.f32 %v6354_v46, %v6275_v21  ;;  %v2669_v25 = vadd.f32 %v2488_v32, %v2345_v42  ;;  %v2670_v37 = vadd.f32 %v2488_v32, %v2346_v6  ;;  %v2851_v21 = vld [vmem:[#allocation2 + $0x4c0] sm:$0xff]  ;;  %v2860_v32 = vld [vmem:[#allocation2 + $0x508] sm:$0xff]  ;;  %v7027_v42 = vld [vmem:[#allocation16_spill] sm:$0xff] }
 0x33c   :  { %v3042_v26 = vadd.f32 %v2853_v17, %v2664_v44  ;;  %v3043_v20 = vadd.f32 %v2854_v60, %v2665_v18  ;;  %v3044_v57 = vadd.f32 %v2855_v19, %v2666_v11  ;;  %v3045_v1 = vadd.f32 %v2856_v8, %v2667_v35  ;;  %v2861_v17 = vld [vmem:[#allocation2 + $0x510] sm:$0xff]  ;;  %v2862_v60 = vld [vmem:[#allocation2 + $0x518] sm:$0xff]  ;;  %v7029_v35 = vld [vmem:[#allocation135_spill] sm:$0xff] }
 0x33d   :  { %v3046_v62 = vadd.f32 %v2857_v54, %v2668_v48  ;;  %v2658_v45 = vadd.f32 %v6354_v46, %v6282_v34  ;;  %v3047_v63 = vadd.f32 %v2858_v33, %v2669_v25  ;;  %v3048_v10 = vadd.f32 %v2859_v30, %v2670_v37  ;;  %v2498_v18 = vpop.permute.xlu0 %2497  ;;  %v7028_v30 = vld [vmem:[#allocation18_spill] sm:$0xff]  ;;  %v2869_v25 = vld [vmem:[#allocation2 + $0x550] sm:$0xff]  ;;  %v2870_v37 = vld [vmem:[#allocation2 + $0x558] sm:$0xff] }
 0x33e   :  { %3231 = vst [vmem:[#allocation5 + $0x4d0] sm:$0xff] %v3042_v26  ;;  %3232 = vst [vmem:[#allocation5 + $0x4d8] sm:$0xff] %v3043_v20  ;;  %v2659_v24 = vadd.f32 %v6354_v46, %v6285_v23  ;;  %v2660_v47 = vadd.f32 %v6354_v46, %v6288_v28  ;;  %v2661_v34 = vadd.f32 %v6354_v46, %v6291_v5  ;;  %v7031_v26 = vld [vmem:[#allocation184_spill] sm:$0xff] }
 0x33f   :  { %3233 = vst [vmem:[#allocation5 + $0x4e0] sm:$0xff] %v3044_v57  ;;  %3234 = vst [vmem:[#allocation5 + $0x4e8] sm:$0xff] %v3045_v1  ;;  %v2662_v7 = vadd.f32 %v6354_v46, %v6294_v58  ;;  %v2663_v41 = vadd.f32 %v6354_v46, %v6297_v2  ;;  %v3035_v23 = vadd.f32 %v2846_v49, %v2657_v4  ;;  %v2863_v58 = vld [vmem:[#allocation2 + $0x520] sm:$0xff]  ;;  %v2865_v2 = vld [vmem:[#allocation2 + $0x530] sm:$0xff] }
 0x340   :  { %3235 = vst [vmem:[#allocation5 + $0x4f0] sm:$0xff] %v3046_v62  ;;  %3236 = vst [vmem:[#allocation5 + $0x4f8] sm:$0xff] %v3047_v63  ;;  %v3036_v28 = vadd.f32 %v2847_v36, %v2658_v45  ;;  %v3037_v13 = vadd.f32 %v2848_v31, %v2659_v24  ;;  %v3038_v0 = vadd.f32 %v2849_v55, %v2660_v47  ;;  %v2868_v4 = vld [vmem:[#allocation2 + $0x548] sm:$0xff]  ;;  %v7032_v49 = vld [vmem:[#allocation186_spill] sm:$0xff] }
 0x341   :  { %3237 = vst.msk [vmem:[#allocation5 + $0x500] sm:$0xff] %vm1056_vm2, %v3048_v10  ;;  %v2671_v12 = vadd.f32 %v6373_v38, %v6315_v39  ;;  %v3039_v5 = vadd.f32 %v2850_v15, %v2661_v34  ;;  %v3040_v40 = vadd.f32 %v2851_v21, %v2662_v7  ;;  %v3041_v56 = vadd.f32 %v2852_v3, %v2663_v41  ;;  %v7033_v1 = vld [vmem:[#allocation187_spill] sm:$0xff]  ;;  %v2871_v31 = vld [vmem:[#allocation2 + $0x560] sm:$0xff]  ;;  %v2873_v45 = vld [vmem:[#allocation2 + $0x570] sm:$0xff] }
 0x342   :  { %3224 = vst [vmem:[#allocation5 + $0x498] sm:$0xff] %v3035_v23  ;;  %v2672_v46 = vadd.f32 %v6373_v38, %v6320_v53  ;;  %3225 = vst [vmem:[#allocation5 + $0x4a0] sm:$0xff] %v3036_v28  ;;  %v2673_v61 = vadd.f32 %v6373_v38, %v6323_v27  ;;  %v2674_v39 = vadd.f32 %v6373_v38, %v6326_v50  ;;  %v2872_v55 = vld [vmem:[#allocation2 + $0x568] sm:$0xff]  ;;  %v7034_v21 = vld [vmem:[#allocation24_spill] sm:$0xff] }
 0x343   :  { %3226 = vst [vmem:[#allocation5 + $0x4a8] sm:$0xff] %v3037_v13  ;;  %3227 = vst [vmem:[#allocation5 + $0x4b0] sm:$0xff] %v3038_v0  ;;  %v2675_v19 = vadd.f32 %v6373_v38, %v6329_v9  ;;  %v2676_v8 = vadd.f32 %v6373_v38, %v6332_v14  ;;  %v2677_v53 = vadd.f32 %v6373_v38, %v6335_v22  ;;  %v2184_v9 = vpop.permute.xlu1 %2183  ;;  %v2867_v14 = vld [vmem:[#allocation2 + $0x540] sm:$0xff]  ;;  %v7030_v38 = vld [vmem:[#allocation137_spill] sm:$0xff] }
 0x344   :  { %3228 = vst [vmem:[#allocation5 + $0x4b8] sm:$0xff] %v3039_v5  ;;  %3229 = vst [vmem:[#allocation5 + $0x4c0] sm:$0xff] %v3040_v40  ;;  %v3049_v54 = vadd.f32 %v2860_v32, %v2671_v12  ;;  %v3050_v59 = vadd.f32 %v2861_v17, %v2672_v46  ;;  %v2354_v27 = vmul.f32 %v6394_v43, %v7027_v42  ;;  %v7035_v13 = vld [vmem:[#allocation26_spill] sm:$0xff]  ;;  %v2508_v40 = vpop.permute.xlu0 %2507 }
 0x345   :  { %3230 = vst.msk [vmem:[#allocation5 + $0x4c8] sm:$0xff] %vm1056_vm2, %v3041_v56  ;;  %v3051_v29 = vadd.f32 %v2862_v60, %v2673_v61  ;;  %v3052_v50 = vadd.f32 %v2863_v58, %v2674_v39  ;;  %v3053_v6 = vadd.f32 %v2864_v52, %v2675_v19  ;;  %v3054_v44 = vadd.f32 %v2865_v2, %v2676_v8  ;;  %v2881_v60 = vld [vmem:[#allocation2 + $0x5b0] sm:$0xff]  ;;  %v7036_v12 = vld [vmem:[#allocation146_spill] sm:$0xff]  ;;  %v2882_v56 = vld [vmem:[#allocation2 + $0x5b8] sm:$0xff] }
 0x346   :  { %v3055_v33 = vadd.f32 %v2866_v16, %v2677_v53  ;;  %3238 = vst [vmem:[#allocation5 + $0x508] sm:$0xff] %v3049_v54  ;;  %3239 = vst [vmem:[#allocation5 + $0x510] sm:$0xff] %v3050_v59  ;;  %v2355_v11 = vmul.f32 %v6394_v43, %v7028_v30  ;;  %v2356_v22 = vmul.f32 %v6394_v43, %v7029_v35  ;;  %v2883_v58 = vld [vmem:[#allocation2 + $0x5c0] sm:$0xff]  ;;  %v2884_v52 = vld [vmem:[#allocation2 + $0x5c8] sm:$0xff] }
 0x347   :  { %v2357_v48 = vmul.f32 %v6394_v43, %v7030_v38  ;;  %3240 = vst [vmem:[#allocation5 + $0x518] sm:$0xff] %v3051_v29  ;;  %3241 = vst [vmem:[#allocation5 + $0x520] sm:$0xff] %v3052_v50  ;;  %v2358_v20 = vmul.f32 %v6394_v43, %v7031_v26  ;;  %v2359_v57 = vmul.f32 %v6394_v43, %v7032_v49  ;;  %v7037_v2 = vld [vmem:[#allocation148_spill] sm:$0xff]  ;;  %v7038_v16 = vld [vmem:[#allocation143_spill] sm:$0xff] }
 0x348   :  { %3242 = vst [vmem:[#allocation5 + $0x528] sm:$0xff] %v3053_v6  ;;  %3243 = vst [vmem:[#allocation5 + $0x530] sm:$0xff] %v3054_v44  ;;  %v2360_v62 = vmul.f32 %v6394_v43, %v7033_v1  ;;  %v2678_v36 = vadd.f32 %v2498_v18, %v2354_v27  ;;  %v2679_v63 = vadd.f32 %v2498_v18, %v2355_v11  ;;  %v7039_v39 = vld [vmem:[#allocation145_spill] sm:$0xff]  ;;  %v2885_v54 = vld [vmem:[#allocation2 + $0x5d0] sm:$0xff] }
 0x349   :  { %3244 = vst.msk [vmem:[#allocation5 + $0x538] sm:$0xff] %vm1056_vm2, %v3055_v33  ;;  %v2680_v10 = vadd.f32 %v2498_v18, %v2356_v22  ;;  %v2681_v15 = vadd.f32 %v2498_v18, %v2357_v48  ;;  %v2368_v3 = vmul.f32 %v2184_v9, %v7034_v21  ;;  %v2682_v24 = vadd.f32 %v2498_v18, %v2358_v20  ;;  %v7040_v8 = vld [vmem:[#allocation185_spill] sm:$0xff]  ;;  %v2887_v42 = vld [vmem:[#allocation2 + $0x5e0] sm:$0xff]  ;;  %v7041_v6 = vld [vmem:[#allocation20_spill] sm:$0xff]  ;;  %v2503_v22 = vpop.permute.xlu1 %2502 }
 0x34a   :  { %v2683_v47 = vadd.f32 %v2498_v18, %v2359_v57  ;;  %v2684_v34 = vadd.f32 %v2498_v18, %v2360_v62  ;;  %v3056_v7 = vadd.f32 %v2867_v14, %v2678_v36  ;;  %v3057_v41 = vadd.f32 %v2868_v4, %v2679_v63  ;;  %v2886_v59 = vld [vmem:[#allocation2 + $0x5d8] sm:$0xff]  ;;  %v7042_v38 = vld [vmem:[#allocation22_spill] sm:$0xff]  ;;  %v2876_v57 = vld [vmem:[#allocation2 + $0x588] sm:$0xff] }
 0x34b   :  { %v3058_v23 = vadd.f32 %v2869_v25, %v2680_v10  ;;  %v3059_v28 = vadd.f32 %v2870_v37, %v2681_v15  ;;  %v2369_v43 = vmul.f32 %v2184_v9, %v7035_v13  ;;  %v3060_v0 = vadd.f32 %v2871_v31, %v2682_v24  ;;  %v2874_v20 = vld [vmem:[#allocation2 + $0x578] sm:$0xff]  ;;  %v2875_v49 = vld [vmem:[#allocation2 + $0x580] sm:$0xff]  ;;  %v7043_v1 = vld [vmem:[#allocation139_spill] sm:$0xff] }
 0x34c   :  { %v3061_v32 = vadd.f32 %v2872_v55, %v2683_v47  ;;  %v3062_v17 = vadd.f32 %v2873_v45, %v2684_v34  ;;  %3245 = vst [vmem:[#allocation5 + $0x540] sm:$0xff] %v3056_v7  ;;  %v2370_v5 = vmul.f32 %v2184_v9, %v7036_v12  ;;  %3246 = vst [vmem:[#allocation5 + $0x548] sm:$0xff] %v3057_v41  ;;  %v7044_v36 = vld [vmem:[#allocation141_spill] sm:$0xff]  ;;  %v7045_v55 = vld [vmem:[#allocation188_spill] sm:$0xff] }
 0x34d   :  { %3247 = vst [vmem:[#allocation5 + $0x550] sm:$0xff] %v3058_v23  ;;  %3248 = vst [vmem:[#allocation5 + $0x558] sm:$0xff] %v3059_v28  ;;  %v2371_v46 = vmul.f32 %v2184_v9, %v7037_v2  ;;  %v2372_v61 = vmul.f32 %v2184_v9, %v7038_v16  ;;  %v2373_v19 = vmul.f32 %v2184_v9, %v7039_v39  ;;  %v7046_v63 = vld [vmem:[#allocation144_spill] sm:$0xff]  ;;  %v2878_v21 = vld [vmem:[#allocation2 + $0x598] sm:$0xff] }
 0x34e   :  { %v2374_v53 = vmul.f32 %v7040_v8, %v2184_v9  ;;  %3249 = vst [vmem:[#allocation5 + $0x560] sm:$0xff] %v3060_v0  ;;  %3250 = vst [vmem:[#allocation5 + $0x568] sm:$0xff] %v3061_v32  ;;  %v2692_v27 = vadd.f32 %v2508_v40, %v2368_v3  ;;  %v2693_v29 = vadd.f32 %v2508_v40, %v2369_v43  ;;  %v2877_v15 = vld [vmem:[#allocation2 + $0x590] sm:$0xff]  ;;  %v2879_v3 = vld [vmem:[#allocation2 + $0x5a0] sm:$0xff] }
 0x34f   :  { %3251 = vst.msk [vmem:[#allocation5 + $0x570] sm:$0xff] %vm1056_vm2, %v3062_v17  ;;  %v2694_v50 = vadd.f32 %v2508_v40, %v2370_v5  ;;  %v2361_v44 = vmul.f32 %v6396_v51, %v7041_v6  ;;  %v2695_v18 = vadd.f32 %v2508_v40, %v2371_v46  ;;  %v2696_v33 = vadd.f32 %v2508_v40, %v2372_v61  ;;  %v7047_v24 = vld [vmem:[#allocation189_spill] sm:$0xff]  ;;  %v2880_v41 = vld [vmem:[#allocation2 + $0x5a8] sm:$0xff] }
 0x350   :  { %v2697_v14 = vadd.f32 %v2508_v40, %v2373_v19  ;;  %v2698_v30 = vadd.f32 %v2508_v40, %v2374_v53  ;;  %v3070_v11 = vadd.f32 %v2881_v60, %v2692_v27  ;;  %v3071_v35 = vadd.f32 %v2882_v56, %v2693_v29 }
 0x351   :  { %v3072_v9 = vadd.f32 %v2883_v58, %v2694_v50  ;;  %v2362_v48 = vmul.f32 %v6396_v51, %v7042_v38  ;;  %v3073_v4 = vadd.f32 %v2884_v52, %v2695_v18  ;;  %v3074_v25 = vadd.f32 %v2885_v54, %v2696_v33 }
 0x352   :  { %v3075_v37 = vadd.f32 %v2886_v59, %v2697_v14  ;;  %v3076_v26 = vadd.f32 %v2887_v42, %v2698_v30  ;;  %3259 = vst [vmem:[#allocation5 + $0x5b0] sm:$0xff] %v3070_v11  ;;  %3260 = vst [vmem:[#allocation5 + $0x5b8] sm:$0xff] %v3071_v35  ;;  %v2363_v62 = vmul.f32 %v6396_v51, %v7043_v1 }
 0x353   :  { %3261 = vst [vmem:[#allocation5 + $0x5c0] sm:$0xff] %v3072_v9  ;;  %v2364_v31 = vmul.f32 %v6396_v51, %v7044_v36  ;;  %v2365_v45 = vmul.f32 %v6396_v51, %v7045_v55  ;;  %v2366_v10 = vmul.f32 %v6396_v51, %v7046_v63  ;;  %3262 = vst [vmem:[#allocation5 + $0x5c8] sm:$0xff] %v3073_v4 }
 0x354   :  { %3263 = vst [vmem:[#allocation5 + $0x5d0] sm:$0xff] %v3074_v25  ;;  %3264 = vst [vmem:[#allocation5 + $0x5d8] sm:$0xff] %v3075_v37  ;;  %v2367_v47 = vmul.f32 %v6396_v51, %v7047_v24  ;;  %v2685_v34 = vadd.f32 %v2503_v22, %v2361_v44  ;;  %v2686_v7 = vadd.f32 %v2503_v22, %v2362_v48 }
 0x355   :  { %3265 = vst.msk [vmem:[#allocation5 + $0x5e0] sm:$0xff] %vm1056_vm2, %v3076_v26  ;;  %v2687_v23 = vadd.f32 %v2503_v22, %v2363_v62  ;;  %v2688_v28 = vadd.f32 %v2503_v22, %v2364_v31  ;;  %v2689_v13 = vadd.f32 %v2503_v22, %v2365_v45  ;;  %v2690_v43 = vadd.f32 %v2503_v22, %v2366_v10 }
 0x356   :  { %v2691_v0 = vadd.f32 %v2503_v22, %v2367_v47  ;;  %v3063_v32 = vadd.f32 %v2874_v20, %v2685_v34  ;;  %v3064_v17 = vadd.f32 %v2875_v49, %v2686_v7 }
 0x357   :  { %v3065_v60 = vadd.f32 %v2876_v57, %v2687_v23  ;;  %v3066_v12 = vadd.f32 %v2877_v15, %v2688_v28  ;;  %v3067_v5 = vadd.f32 %v2878_v21, %v2689_v13  ;;  %v3068_v40 = vadd.f32 %v2879_v3, %v2690_v43 }
 0x358   :  { %v3069_v56 = vadd.f32 %v2880_v41, %v2691_v0  ;;  %3252 = vst [vmem:[#allocation5 + $0x578] sm:$0xff] %v3063_v32  ;;  %3253 = vst [vmem:[#allocation5 + $0x580] sm:$0xff] %v3064_v17 }
 0x359   :  { %3254 = vst [vmem:[#allocation5 + $0x588] sm:$0xff] %v3065_v60  ;;  %3255 = vst [vmem:[#allocation5 + $0x590] sm:$0xff] %v3066_v12 }
 0x35a   :  { %3256 = vst [vmem:[#allocation5 + $0x598] sm:$0xff] %v3067_v5  ;;  %3257 = vst [vmem:[#allocation5 + $0x5a0] sm:$0xff] %v3068_v40 }
 0x35b   :  { %3258 = vst.msk [vmem:[#allocation5 + $0x5a8] sm:$0xff] %vm1056_vm2, %v3069_v56 }
 0x35c   :  { %3614 = shalt.err (!%p3611_p12)
}
 0x35d   :  { %s3615_s8 = scalar_lea.hbm %s6479_s5, 24192 }
 0x35e   :  { %p3616_p13 = scmp.ne.s32.totalorder %s6479_s5, %s3615_s8  ;;  %p3619_p0 = scmp.lt.u32.totalorder %s3615_s8, %s6479_s5 }
 0x360   :  { %p3621_p1 = pnand %p3619_p0, %p3616_p13 }
 0x362   :  { %3624 = shalt.err (!%p3621_p1)
}
 0x363   :  { %3277 = dma.vmem_to_hbm [thread:$0]  %s3272_s27, 24192, %s6479_s5, [#allocation4], %s3630_s28, %s3630_s28, %s3631_s29  }
 0x364   :  { %3627 = dma.done.wait [#allocation4], 24192  }
 0x365   :  { %3628 = vsyncadd [#allocation4], 4294943104 }
 0x366   :  { %3281 = vsyncpa [#allocation3], 1 }
 0x367   :  { %3282 = vsyncpa [#allocation4], 1 }

</bundles_post_ra>
